<compile_context>
chip_gen: v5e
topology: v5e:2x2
jax: 0.10.0
libtpu: 0.0.40
codegen_flags: <defaults>
</compile_context>

<pallas_src>
import functools

import jax
import jax.numpy as jnp
from jax import lax
from jax.experimental import pallas as pl
from jax.experimental.pallas import tpu as pltpu


def _full_spec(shape):
    nd = len(shape)
    return pl.BlockSpec(shape, lambda i: (0,) * nd)


# ---------------------------------------------------------------------------
# Fused kernel: all bidirectional LSTM layers + BN + FC + softmax
# ---------------------------------------------------------------------------
def _make_fused_kernel(n_layers, T, N, H, num_classes, lane_pad):
    def kernel(x_ref, *refs):
        # refs layout:
        #   [wih_f, whh_f, b_f, wih_b, whh_b, b_b] * n_layers,
        #   gamma, beta, mean, var, w_fc,   out_ref,   xbuf (VMEM scratch)
        n_w = 6 * n_layers
        gamma_ref, beta_ref, mean_ref, var_ref, wfc_ref = refs[n_w:n_w + 5]
        out_ref = refs[n_w + 5]
        xbuf = refs[n_w + 6]

        # Current layer input, flattened time-major: (T*N, F), f32.
        cur = x_ref[...]

        hsum = None
        for l in range(n_layers):
            wih_f, whh_f, b_f, wih_b, whh_b, b_b = refs[6 * l:6 * l + 6]

            # Batched input projection over all T timesteps (bf16 MXU, f32 acc).
            x_bf = cur.astype(jnp.bfloat16)
            xw_f = jnp.dot(x_bf, wih_f[...], preferred_element_type=jnp.float32) + b_f[...]
            xw_b = jnp.dot(x_bf, wih_b[...], preferred_element_type=jnp.float32) + b_b[...]

            whh_f_v = whh_f[...]
            whh_b_v = whh_b[...]

            h_f = jnp.zeros((N, H), jnp.float32)
            c_f = jnp.zeros((N, H), jnp.float32)
            h_b = jnp.zeros((N, H), jnp.float32)
            c_b = jnp.zeros((N, H), jnp.float32)
            hs_f = [None] * T
            hs_b = [None] * T

            # Static unroll; fwd step t and bwd step T-1-t are independent and
            # interleave on the MXU/VPU/EUP.
            for t in range(T):
                tb = T - 1 - t
                g_f = xw_f[t * N:(t + 1) * N, :] + jnp.dot(
                    h_f.astype(jnp.bfloat16), whh_f_v,
                    preferred_element_type=jnp.float32)
                g_b = xw_b[tb * N:(tb + 1) * N, :] + jnp.dot(
                    h_b.astype(jnp.bfloat16), whh_b_v,
                    preferred_element_type=jnp.float32)
                # Gate order (i, f, o, g): one sigmoid + one tanh per direction.
                s_f = jax.nn.sigmoid(g_f[:, :3 * H])
                s_b = jax.nn.sigmoid(g_b[:, :3 * H])
                gg_f = jnp.tanh(g_f[:, 3 * H:])
                gg_b = jnp.tanh(g_b[:, 3 * H:])
                c_f = s_f[:, H:2 * H] * c_f + s_f[:, :H] * gg_f
                c_b = s_b[:, H:2 * H] * c_b + s_b[:, :H] * gg_b
                h_f = s_f[:, 2 * H:3 * H] * jnp.tanh(c_f)
                h_b = s_b[:, 2 * H:3 * H] * jnp.tanh(c_b)
                hs_f[t] = h_f
                hs_b[tb] = h_b

            # Bidirectional sum  (== concat then .view(T,N,2,H).sum(dim=2)).
            hsum = [hs_f[t] + hs_b[t] for t in range(T)]

            if l < n_layers - 1:
                # Stage the next layer's time-major input in VMEM scratch.
                for t in range(T):
                    xbuf[t * N:(t + 1) * N, :] = hsum[t]
                cur = xbuf[...]

        # Classifier head: eval-mode BatchNorm1d -> Linear(no bias) -> softmax.
        # BN params / FC rows were permuted host-side so that the block
        # [t*H:(t+1)*H] corresponds to the reference's H-major features h*T+t.
        eps = 1e-5
        logits = jnp.zeros((N, lane_pad), jnp.float32)
        for t in range(T):
            lo, hi = t * H, (t + 1) * H
            xt = hsum[t]
            xn_t = ((xt - mean_ref[:, lo:hi]) * lax.rsqrt(var_ref[:, lo:hi] + eps)
                    * gamma_ref[:, lo:hi] + beta_ref[:, lo:hi])
            logits = logits + jnp.dot(
                xn_t.astype(jnp.bfloat16), wfc_ref[lo:hi, :],
                preferred_element_type=jnp.float32)

        # Mask padded output lanes, softmax, lane-dense store.
        lane = lax.broadcasted_iota(jnp.int32, (N, lane_pad), 1)
        logits = jnp.where(lane < num_classes, logits, jnp.float32(-1e30))
        m = jnp.max(logits, axis=-1, keepdims=True)
        e = jnp.exp(logits - m)
        out_ref[...] = e / jnp.sum(e, axis=-1, keepdims=True)

    return kernel


# ---------------------------------------------------------------------------
# Wrapper
# ---------------------------------------------------------------------------
def rnn_classifier_forward(x, prep, *, num_classes):
    """x: (N, C_in, T), exactly what the PyTorch RNNClassifier.forward expects."""
    N, C_in, T = x.shape
    layers = prep["layers"]
    n_layers = len(layers)
    H = layers[0]["whh_f"].shape[0]
    fc = prep["fc"]
    lane_pad = fc["w"].shape[1]

    # (N, C_in, T) -> time-major (T, N, C_in) -> (T*N, C_in): host-side layout plumbing.
    x2d = jnp.transpose(x, (2, 0, 1)).astype(jnp.float32).reshape(T * N, C_in)

    inputs = [x2d]
    in_specs = [_full_spec(x2d.shape)]
    for p in layers:
        for name in ("wih_f", "whh_f", "b_f", "wih_b", "whh_b", "b_b"):
            inputs.append(p[name])
            in_specs.append(_full_spec(p[name].shape))
    for name in ("gamma", "beta", "mean", "var", "w"):
        inputs.append(fc[name])
        in_specs.append(_full_spec(fc[name].shape))

    kernel = _make_fused_kernel(n_layers, T, N, H, num_classes, lane_pad)
    out = pl.pallas_call(
        kernel,
        grid=(1,),
        in_specs=in_specs,
        out_specs=_full_spec((N, lane_pad)),
        out_shape=jax.ShapeDtypeStruct((N, lane_pad), jnp.float32),
        scratch_shapes=[pltpu.VMEM((T * N, H), jnp.float32)],
    )(*inputs)
    return out[:, :num_classes]


# ---------------------------------------------------------------------------
# Parameter construction (PyTorch layout) and host-side preparation
# ---------------------------------------------------------------------------
def init_params(key, input_size, hidden_size, n_layers, out_time_feature, output_size):
    """Synthetic weights in PyTorch LSTM layout: W (4H,F) with gate order (i,f,g,o)."""
    params = {"layers": []}
    F = input_size
    H = hidden_size
    for _ in range(n_layers):
        layer = {}
        for d in ("f", "b"):  # forward / backward directions
            key, k1, k2, k3, k4 = jax.random.split(key, 5)
            layer[f"w_ih_{d}"] = 0.1 * jax.random.normal(k1, (4 * H, F), jnp.float32)
            layer[f"w_hh_{d}"] = 0.1 * jax.random.normal(k2, (4 * H, H), jnp.float32)
            layer[f"b_ih_{d}"] = 0.1 * jax.random.normal(k3, (4 * H,), jnp.float32)
            layer[f"b_hh_{d}"] = 0.1 * jax.random.normal(k4, (4 * H,), jnp.float32)
        params["layers"].append(layer)
        F = H
    Ffc = H * out_time_feature
    key, k1, k2, k3 = jax.random.split(key, 4)
    params["fc"] = {
        "gamma": 1.0 + 0.05 * jax.random.normal(k1, (1, Ffc), jnp.float32),
        "beta": 0.05 * jax.random.normal(k2, (1, Ffc), jnp.float32),
        "mean": jnp.zeros((1, Ffc), jnp.float32),
        "var": jnp.ones((1, Ffc), jnp.float32),
        "w": 0.1 * jax.random.normal(k3, (Ffc, output_size), jnp.float32),
    }
    return params


def prepare_params(params, *, T, lane_pad=128):
    """One-time host-side weight prep (pure layout work):
      * LSTM gates reordered (i,f,g,o) -> (i,f,o,g), weights transposed to (F,4H)
        and cast to bf16; biases fused (b_ih + b_hh), kept f32.
      * Head: BN params / FC rows permuted from the reference's H-major feature
        order (h*T + t) to the kernel's T-major order (t*H + h); FC weight
        zero-padded to `lane_pad` output lanes and cast to bf16.
    """
    prep = {"layers": []}
    for p in params["layers"]:
        H = p["w_hh_f"].shape[1]
        ro = jnp.concatenate([
            jnp.arange(0, H), jnp.arange(H, 2 * H),
            jnp.arange(3 * H, 4 * H), jnp.arange(2 * H, 3 * H)])
        lp = {}
        for d in ("f", "b"):
            lp[f"wih_{d}"] = jnp.transpose(p[f"w_ih_{d}"][ro, :]).astype(jnp.bfloat16)
            lp[f"whh_{d}"] = jnp.transpose(p[f"w_hh_{d}"][ro, :]).astype(jnp.bfloat16)
            lp[f"b_{d}"] = (p[f"b_ih_{d}"] + p[f"b_hh_{d}"])[ro].reshape(1, 4 * H).astype(jnp.float32)
        prep["layers"].append(lp)

    fc = params["fc"]
    Ffc, C = fc["w"].shape
    H = Ffc // T
    assert C <= lane_pad
    k = jnp.arange(Ffc)
    perm = (k % H) * T + (k // H)   # kernel feature t*H+h  <-  reference feature h*T+t
    w_perm = fc["w"][perm, :]
    w_pad = jnp.zeros((Ffc, lane_pad), jnp.float32).at[:, :C].set(w_perm).astype(jnp.bfloat16)
    prep["fc"] = {
        "gamma": fc["gamma"][:, perm],
        "beta": fc["beta"][:, perm],
        "mean": fc["mean"][:, perm],
        "var": fc["var"][:, perm],
        "w": w_pad,
    }
    return prep


if __name__ == "__main__":
    # Small shapes consistent with the module:
    #   input_size=16, out_time_feature (T)=8, output_size=10,
    #   rnn_hidden_size=32, n_layers=2, bidirectional=True
    N, C_IN, T = 2, 16, 8
    H, N_LAYERS, OUT = 32, 2, 10

    key = jax.random.PRNGKey(0)
    key, kx, kp = jax.random.split(key, 3)
    x = jax.random.normal(kx, (N, C_IN, T), jnp.float32)
    params = init_params(kp, C_IN, H, N_LAYERS, T, OUT)
    prep = prepare_params(params, T=T)

    fwd = jax.jit(functools.partial(rnn_classifier_forward, num_classes=OUT))
    out = fwd(x, prep)
    out = jax.block_until_ready(out)

    assert out.shape == (N, OUT)
    assert bool(jnp.all(jnp.isfinite(out)))
    assert bool(jnp.allclose(jnp.sum(out, axis=-1), 1.0, atol=1e-4))
    print("KERNEL_OK")
</pallas_src>

<mosaic_0001>
module attributes {stable_mosaic.version = 11 : i64} {
  func.func @kernel(%arg0: i32, %arg1: memref<16x16xf32, #tpu.memory_space<vmem>>, %arg2: memref<16x128xbf16, #tpu.memory_space<vmem>>, %arg3: memref<32x128xbf16, #tpu.memory_space<vmem>>, %arg4: memref<1x128xf32, #tpu.memory_space<vmem>>, %arg5: memref<16x128xbf16, #tpu.memory_space<vmem>>, %arg6: memref<32x128xbf16, #tpu.memory_space<vmem>>, %arg7: memref<1x128xf32, #tpu.memory_space<vmem>>, %arg8: memref<32x128xbf16, #tpu.memory_space<vmem>>, %arg9: memref<32x128xbf16, #tpu.memory_space<vmem>>, %arg10: memref<1x128xf32, #tpu.memory_space<vmem>>, %arg11: memref<32x128xbf16, #tpu.memory_space<vmem>>, %arg12: memref<32x128xbf16, #tpu.memory_space<vmem>>, %arg13: memref<1x128xf32, #tpu.memory_space<vmem>>, %arg14: memref<1x256xf32, #tpu.memory_space<vmem>>, %arg15: memref<1x256xf32, #tpu.memory_space<vmem>>, %arg16: memref<1x256xf32, #tpu.memory_space<vmem>>, %arg17: memref<1x256xf32, #tpu.memory_space<vmem>>, %arg18: memref<256x128xbf16, #tpu.memory_space<vmem>>, %arg19: memref<2x128xf32, #tpu.memory_space<vmem>>, %arg20: memref<16x32xf32, #tpu.memory_space<vmem>>) attributes {dimension_semantics = [#tpu.dimension_semantics<arbitrary>], iteration_bounds = array<i64: 1>, scalar_prefetch = 0 : i64, scratch_operands = 1 : i64, tpu.core_type = #tpu.core_type<tc>, window_params = [{pipeline_mode = #tpu.pipeline_mode<synchronous>, transform_indices = @transform_0, window_bounds = array<i64: 16, 16>}, {pipeline_mode = #tpu.pipeline_mode<synchronous>, transform_indices = @transform_1, window_bounds = array<i64: 16, 128>}, {pipeline_mode = #tpu.pipeline_mode<synchronous>, transform_indices = @transform_2, window_bounds = array<i64: 32, 128>}, {pipeline_mode = #tpu.pipeline_mode<synchronous>, transform_indices = @transform_3, window_bounds = array<i64: 1, 128>}, {pipeline_mode = #tpu.pipeline_mode<synchronous>, transform_indices = @transform_4, window_bounds = array<i64: 16, 128>}, {pipeline_mode = #tpu.pipeline_mode<synchronous>, transform_indices = @transform_5, window_bounds = array<i64: 32, 128>}, {pipeline_mode = #tpu.pipeline_mode<synchronous>, transform_indices = @transform_6, window_bounds = array<i64: 1, 128>}, {pipeline_mode = #tpu.pipeline_mode<synchronous>, transform_indices = @transform_7, window_bounds = array<i64: 32, 128>}, {pipeline_mode = #tpu.pipeline_mode<synchronous>, transform_indices = @transform_8, window_bounds = array<i64: 32, 128>}, {pipeline_mode = #tpu.pipeline_mode<synchronous>, transform_indices = @transform_9, window_bounds = array<i64: 1, 128>}, {pipeline_mode = #tpu.pipeline_mode<synchronous>, transform_indices = @transform_10, window_bounds = array<i64: 32, 128>}, {pipeline_mode = #tpu.pipeline_mode<synchronous>, transform_indices = @transform_11, window_bounds = array<i64: 32, 128>}, {pipeline_mode = #tpu.pipeline_mode<synchronous>, transform_indices = @transform_12, window_bounds = array<i64: 1, 128>}, {pipeline_mode = #tpu.pipeline_mode<synchronous>, transform_indices = @transform_13, window_bounds = array<i64: 1, 256>}, {pipeline_mode = #tpu.pipeline_mode<synchronous>, transform_indices = @transform_14, window_bounds = array<i64: 1, 256>}, {pipeline_mode = #tpu.pipeline_mode<synchronous>, transform_indices = @transform_15, window_bounds = array<i64: 1, 256>}, {pipeline_mode = #tpu.pipeline_mode<synchronous>, transform_indices = @transform_16, window_bounds = array<i64: 1, 256>}, {pipeline_mode = #tpu.pipeline_mode<synchronous>, transform_indices = @transform_17, window_bounds = array<i64: 256, 128>}, {pipeline_mode = #tpu.pipeline_mode<synchronous>, transform_indices = @transform_18, window_bounds = array<i64: 2, 128>}]} {
    %c0 = arith.constant 0 : index
    %c0_0 = arith.constant 0 : index
    %0 = vector.load %arg1[%c0, %c0_0] : memref<16x16xf32, #tpu.memory_space<vmem>>, vector<16x16xf32>
    %1 = arith.truncf %0 : vector<16x16xf32> to vector<16x16xbf16>
    %c0_1 = arith.constant 0 : index
    %c0_2 = arith.constant 0 : index
    %2 = vector.load %arg2[%c0_1, %c0_2] : memref<16x128xbf16, #tpu.memory_space<vmem>>, vector<16x128xbf16>
    %cst = arith.constant dense<0.000000e+00> : vector<16x128xf32>
    %3 = tpu.matmul %1, %2, %cst {dimension_numbers = #tpu.dot_dimension_numbers<[1], [0], [0], [1], [0, 0, 1, 1], [], []>} : vector<16x16xbf16>, vector<16x128xbf16>, vector<16x128xf32> -> vector<16x128xf32>
    %c0_3 = arith.constant 0 : index
    %c0_4 = arith.constant 0 : index
    %4 = vector.load %arg4[%c0_3, %c0_4] : memref<1x128xf32, #tpu.memory_space<vmem>>, vector<1x128xf32>
    %5 = vector.broadcast %4 : vector<1x128xf32> to vector<16x128xf32>
    %6 = arith.addf %3, %5 : vector<16x128xf32>
    %c0_5 = arith.constant 0 : index
    %c0_6 = arith.constant 0 : index
    %7 = vector.load %arg5[%c0_5, %c0_6] : memref<16x128xbf16, #tpu.memory_space<vmem>>, vector<16x128xbf16>
    %cst_7 = arith.constant dense<0.000000e+00> : vector<16x128xf32>
    %8 = tpu.matmul %1, %7, %cst_7 {dimension_numbers = #tpu.dot_dimension_numbers<[1], [0], [0], [1], [0, 0, 1, 1], [], []>} : vector<16x16xbf16>, vector<16x128xbf16>, vector<16x128xf32> -> vector<16x128xf32>
    %c0_8 = arith.constant 0 : index
    %c0_9 = arith.constant 0 : index
    %9 = vector.load %arg7[%c0_8, %c0_9] : memref<1x128xf32, #tpu.memory_space<vmem>>, vector<1x128xf32>
    %10 = vector.broadcast %9 : vector<1x128xf32> to vector<16x128xf32>
    %11 = arith.addf %8, %10 : vector<16x128xf32>
    %c0_10 = arith.constant 0 : index
    %c0_11 = arith.constant 0 : index
    %12 = vector.load %arg3[%c0_10, %c0_11] : memref<32x128xbf16, #tpu.memory_space<vmem>>, vector<32x128xbf16>
    %c0_12 = arith.constant 0 : index
    %c0_13 = arith.constant 0 : index
    %13 = vector.load %arg6[%c0_12, %c0_13] : memref<32x128xbf16, #tpu.memory_space<vmem>>, vector<32x128xbf16>
    %cst_14 = arith.constant 0.000000e+00 : f32
    %14 = vector.broadcast %cst_14 : f32 to vector<2x32xf32>
    %cst_15 = arith.constant 0.000000e+00 : f32
    %15 = vector.broadcast %cst_15 : f32 to vector<2x32xf32>
    %cst_16 = arith.constant 0.000000e+00 : f32
    %16 = vector.broadcast %cst_16 : f32 to vector<2x32xf32>
    %cst_17 = arith.constant 0.000000e+00 : f32
    %17 = vector.broadcast %cst_17 : f32 to vector<2x32xf32>
    %18 = vector.extract_strided_slice %6 {offsets = [0, 0], sizes = [2, 128], strides = [1, 1]} : vector<16x128xf32> to vector<2x128xf32>
    %19 = arith.truncf %14 : vector<2x32xf32> to vector<2x32xbf16>
    %cst_18 = arith.constant dense<0.000000e+00> : vector<2x128xf32>
    %20 = tpu.matmul %19, %12, %cst_18 {dimension_numbers = #tpu.dot_dimension_numbers<[1], [0], [0], [1], [0, 0, 1, 1], [], []>} : vector<2x32xbf16>, vector<32x128xbf16>, vector<2x128xf32> -> vector<2x128xf32>
    %21 = arith.addf %18, %20 : vector<2x128xf32>
    %22 = vector.extract_strided_slice %11 {offsets = [14, 0], sizes = [2, 128], strides = [1, 1]} : vector<16x128xf32> to vector<2x128xf32>
    %23 = arith.truncf %16 : vector<2x32xf32> to vector<2x32xbf16>
    %cst_19 = arith.constant dense<0.000000e+00> : vector<2x128xf32>
    %24 = tpu.matmul %23, %13, %cst_19 {dimension_numbers = #tpu.dot_dimension_numbers<[1], [0], [0], [1], [0, 0, 1, 1], [], []>} : vector<2x32xbf16>, vector<32x128xbf16>, vector<2x128xf32> -> vector<2x128xf32>
    %25 = arith.addf %22, %24 : vector<2x128xf32>
    %26 = vector.extract_strided_slice %21 {offsets = [0, 0], sizes = [2, 96], strides = [1, 1]} : vector<2x128xf32> to vector<2x96xf32>
    %27 = arith.negf %26 : vector<2x96xf32>
    %28 = math.exp %27 : vector<2x96xf32>
    %cst_20 = arith.constant 1.000000e+00 : f32
    %29 = vector.broadcast %cst_20 : f32 to vector<2x96xf32>
    %30 = arith.addf %29, %28 : vector<2x96xf32>
    %31 = arith.divf %29, %30 : vector<2x96xf32>
    %32 = vector.extract_strided_slice %25 {offsets = [0, 0], sizes = [2, 96], strides = [1, 1]} : vector<2x128xf32> to vector<2x96xf32>
    %33 = arith.negf %32 : vector<2x96xf32>
    %34 = math.exp %33 : vector<2x96xf32>
    %cst_21 = arith.constant 1.000000e+00 : f32
    %35 = vector.broadcast %cst_21 : f32 to vector<2x96xf32>
    %36 = arith.addf %35, %34 : vector<2x96xf32>
    %37 = arith.divf %35, %36 : vector<2x96xf32>
    %38 = vector.extract_strided_slice %21 {offsets = [0, 96], sizes = [2, 32], strides = [1, 1]} : vector<2x128xf32> to vector<2x32xf32>
    %39 = math.tanh %38 : vector<2x32xf32>
    %40 = vector.extract_strided_slice %25 {offsets = [0, 96], sizes = [2, 32], strides = [1, 1]} : vector<2x128xf32> to vector<2x32xf32>
    %41 = math.tanh %40 : vector<2x32xf32>
    %42 = vector.extract_strided_slice %31 {offsets = [0, 32], sizes = [2, 32], strides = [1, 1]} : vector<2x96xf32> to vector<2x32xf32>
    %43 = arith.mulf %42, %15 : vector<2x32xf32>
    %44 = vector.extract_strided_slice %31 {offsets = [0, 0], sizes = [2, 32], strides = [1, 1]} : vector<2x96xf32> to vector<2x32xf32>
    %45 = arith.mulf %44, %39 : vector<2x32xf32>
    %46 = arith.addf %43, %45 : vector<2x32xf32>
    %47 = vector.extract_strided_slice %37 {offsets = [0, 32], sizes = [2, 32], strides = [1, 1]} : vector<2x96xf32> to vector<2x32xf32>
    %48 = arith.mulf %47, %17 : vector<2x32xf32>
    %49 = vector.extract_strided_slice %37 {offsets = [0, 0], sizes = [2, 32], strides = [1, 1]} : vector<2x96xf32> to vector<2x32xf32>
    %50 = arith.mulf %49, %41 : vector<2x32xf32>
    %51 = arith.addf %48, %50 : vector<2x32xf32>
    %52 = vector.extract_strided_slice %31 {offsets = [0, 64], sizes = [2, 32], strides = [1, 1]} : vector<2x96xf32> to vector<2x32xf32>
    %53 = math.tanh %46 : vector<2x32xf32>
    %54 = arith.mulf %52, %53 : vector<2x32xf32>
    %55 = vector.extract_strided_slice %37 {offsets = [0, 64], sizes = [2, 32], strides = [1, 1]} : vector<2x96xf32> to vector<2x32xf32>
    %56 = math.tanh %51 : vector<2x32xf32>
    %57 = arith.mulf %55, %56 : vector<2x32xf32>
    %58 = vector.extract_strided_slice %6 {offsets = [2, 0], sizes = [2, 128], strides = [1, 1]} : vector<16x128xf32> to vector<2x128xf32>
    %59 = arith.truncf %54 : vector<2x32xf32> to vector<2x32xbf16>
    %cst_22 = arith.constant dense<0.000000e+00> : vector<2x128xf32>
    %60 = tpu.matmul %59, %12, %cst_22 {dimension_numbers = #tpu.dot_dimension_numbers<[1], [0], [0], [1], [0, 0, 1, 1], [], []>} : vector<2x32xbf16>, vector<32x128xbf16>, vector<2x128xf32> -> vector<2x128xf32>
    %61 = arith.addf %58, %60 : vector<2x128xf32>
    %62 = vector.extract_strided_slice %11 {offsets = [12, 0], sizes = [2, 128], strides = [1, 1]} : vector<16x128xf32> to vector<2x128xf32>
    %63 = arith.truncf %57 : vector<2x32xf32> to vector<2x32xbf16>
    %cst_23 = arith.constant dense<0.000000e+00> : vector<2x128xf32>
    %64 = tpu.matmul %63, %13, %cst_23 {dimension_numbers = #tpu.dot_dimension_numbers<[1], [0], [0], [1], [0, 0, 1, 1], [], []>} : vector<2x32xbf16>, vector<32x128xbf16>, vector<2x128xf32> -> vector<2x128xf32>
    %65 = arith.addf %62, %64 : vector<2x128xf32>
    %66 = vector.extract_strided_slice %61 {offsets = [0, 0], sizes = [2, 96], strides = [1, 1]} : vector<2x128xf32> to vector<2x96xf32>
    %67 = arith.negf %66 : vector<2x96xf32>
    %68 = math.exp %67 : vector<2x96xf32>
    %cst_24 = arith.constant 1.000000e+00 : f32
    %69 = vector.broadcast %cst_24 : f32 to vector<2x96xf32>
    %70 = arith.addf %69, %68 : vector<2x96xf32>
    %71 = arith.divf %69, %70 : vector<2x96xf32>
    %72 = vector.extract_strided_slice %65 {offsets = [0, 0], sizes = [2, 96], strides = [1, 1]} : vector<2x128xf32> to vector<2x96xf32>
    %73 = arith.negf %72 : vector<2x96xf32>
    %74 = math.exp %73 : vector<2x96xf32>
    %cst_25 = arith.constant 1.000000e+00 : f32
    %75 = vector.broadcast %cst_25 : f32 to vector<2x96xf32>
    %76 = arith.addf %75, %74 : vector<2x96xf32>
    %77 = arith.divf %75, %76 : vector<2x96xf32>
    %78 = vector.extract_strided_slice %61 {offsets = [0, 96], sizes = [2, 32], strides = [1, 1]} : vector<2x128xf32> to vector<2x32xf32>
    %79 = math.tanh %78 : vector<2x32xf32>
    %80 = vector.extract_strided_slice %65 {offsets = [0, 96], sizes = [2, 32], strides = [1, 1]} : vector<2x128xf32> to vector<2x32xf32>
    %81 = math.tanh %80 : vector<2x32xf32>
    %82 = vector.extract_strided_slice %71 {offsets = [0, 32], sizes = [2, 32], strides = [1, 1]} : vector<2x96xf32> to vector<2x32xf32>
    %83 = arith.mulf %82, %46 : vector<2x32xf32>
    %84 = vector.extract_strided_slice %71 {offsets = [0, 0], sizes = [2, 32], strides = [1, 1]} : vector<2x96xf32> to vector<2x32xf32>
    %85 = arith.mulf %84, %79 : vector<2x32xf32>
    %86 = arith.addf %83, %85 : vector<2x32xf32>
    %87 = vector.extract_strided_slice %77 {offsets = [0, 32], sizes = [2, 32], strides = [1, 1]} : vector<2x96xf32> to vector<2x32xf32>
    %88 = arith.mulf %87, %51 : vector<2x32xf32>
    %89 = vector.extract_strided_slice %77 {offsets = [0, 0], sizes = [2, 32], strides = [1, 1]} : vector<2x96xf32> to vector<2x32xf32>
    %90 = arith.mulf %89, %81 : vector<2x32xf32>
    %91 = arith.addf %88, %90 : vector<2x32xf32>
    %92 = vector.extract_strided_slice %71 {offsets = [0, 64], sizes = [2, 32], strides = [1, 1]} : vector<2x96xf32> to vector<2x32xf32>
    %93 = math.tanh %86 : vector<2x32xf32>
    %94 = arith.mulf %92, %93 : vector<2x32xf32>
    %95 = vector.extract_strided_slice %77 {offsets = [0, 64], sizes = [2, 32], strides = [1, 1]} : vector<2x96xf32> to vector<2x32xf32>
    %96 = math.tanh %91 : vector<2x32xf32>
    %97 = arith.mulf %95, %96 : vector<2x32xf32>
    %98 = vector.extract_strided_slice %6 {offsets = [4, 0], sizes = [2, 128], strides = [1, 1]} : vector<16x128xf32> to vector<2x128xf32>
    %99 = arith.truncf %94 : vector<2x32xf32> to vector<2x32xbf16>
    %cst_26 = arith.constant dense<0.000000e+00> : vector<2x128xf32>
    %100 = tpu.matmul %99, %12, %cst_26 {dimension_numbers = #tpu.dot_dimension_numbers<[1], [0], [0], [1], [0, 0, 1, 1], [], []>} : vector<2x32xbf16>, vector<32x128xbf16>, vector<2x128xf32> -> vector<2x128xf32>
    %101 = arith.addf %98, %100 : vector<2x128xf32>
    %102 = vector.extract_strided_slice %11 {offsets = [10, 0], sizes = [2, 128], strides = [1, 1]} : vector<16x128xf32> to vector<2x128xf32>
    %103 = arith.truncf %97 : vector<2x32xf32> to vector<2x32xbf16>
    %cst_27 = arith.constant dense<0.000000e+00> : vector<2x128xf32>
    %104 = tpu.matmul %103, %13, %cst_27 {dimension_numbers = #tpu.dot_dimension_numbers<[1], [0], [0], [1], [0, 0, 1, 1], [], []>} : vector<2x32xbf16>, vector<32x128xbf16>, vector<2x128xf32> -> vector<2x128xf32>
    %105 = arith.addf %102, %104 : vector<2x128xf32>
    %106 = vector.extract_strided_slice %101 {offsets = [0, 0], sizes = [2, 96], strides = [1, 1]} : vector<2x128xf32> to vector<2x96xf32>
    %107 = arith.negf %106 : vector<2x96xf32>
    %108 = math.exp %107 : vector<2x96xf32>
    %cst_28 = arith.constant 1.000000e+00 : f32
    %109 = vector.broadcast %cst_28 : f32 to vector<2x96xf32>
    %110 = arith.addf %109, %108 : vector<2x96xf32>
    %111 = arith.divf %109, %110 : vector<2x96xf32>
    %112 = vector.extract_strided_slice %105 {offsets = [0, 0], sizes = [2, 96], strides = [1, 1]} : vector<2x128xf32> to vector<2x96xf32>
    %113 = arith.negf %112 : vector<2x96xf32>
    %114 = math.exp %113 : vector<2x96xf32>
    %cst_29 = arith.constant 1.000000e+00 : f32
    %115 = vector.broadcast %cst_29 : f32 to vector<2x96xf32>
    %116 = arith.addf %115, %114 : vector<2x96xf32>
    %117 = arith.divf %115, %116 : vector<2x96xf32>
    %118 = vector.extract_strided_slice %101 {offsets = [0, 96], sizes = [2, 32], strides = [1, 1]} : vector<2x128xf32> to vector<2x32xf32>
    %119 = math.tanh %118 : vector<2x32xf32>
    %120 = vector.extract_strided_slice %105 {offsets = [0, 96], sizes = [2, 32], strides = [1, 1]} : vector<2x128xf32> to vector<2x32xf32>
    %121 = math.tanh %120 : vector<2x32xf32>
    %122 = vector.extract_strided_slice %111 {offsets = [0, 32], sizes = [2, 32], strides = [1, 1]} : vector<2x96xf32> to vector<2x32xf32>
    %123 = arith.mulf %122, %86 : vector<2x32xf32>
    %124 = vector.extract_strided_slice %111 {offsets = [0, 0], sizes = [2, 32], strides = [1, 1]} : vector<2x96xf32> to vector<2x32xf32>
    %125 = arith.mulf %124, %119 : vector<2x32xf32>
    %126 = arith.addf %123, %125 : vector<2x32xf32>
    %127 = vector.extract_strided_slice %117 {offsets = [0, 32], sizes = [2, 32], strides = [1, 1]} : vector<2x96xf32> to vector<2x32xf32>
    %128 = arith.mulf %127, %91 : vector<2x32xf32>
    %129 = vector.extract_strided_slice %117 {offsets = [0, 0], sizes = [2, 32], strides = [1, 1]} : vector<2x96xf32> to vector<2x32xf32>
    %130 = arith.mulf %129, %121 : vector<2x32xf32>
    %131 = arith.addf %128, %130 : vector<2x32xf32>
    %132 = vector.extract_strided_slice %111 {offsets = [0, 64], sizes = [2, 32], strides = [1, 1]} : vector<2x96xf32> to vector<2x32xf32>
    %133 = math.tanh %126 : vector<2x32xf32>
    %134 = arith.mulf %132, %133 : vector<2x32xf32>
    %135 = vector.extract_strided_slice %117 {offsets = [0, 64], sizes = [2, 32], strides = [1, 1]} : vector<2x96xf32> to vector<2x32xf32>
    %136 = math.tanh %131 : vector<2x32xf32>
    %137 = arith.mulf %135, %136 : vector<2x32xf32>
    %138 = vector.extract_strided_slice %6 {offsets = [6, 0], sizes = [2, 128], strides = [1, 1]} : vector<16x128xf32> to vector<2x128xf32>
    %139 = arith.truncf %134 : vector<2x32xf32> to vector<2x32xbf16>
    %cst_30 = arith.constant dense<0.000000e+00> : vector<2x128xf32>
    %140 = tpu.matmul %139, %12, %cst_30 {dimension_numbers = #tpu.dot_dimension_numbers<[1], [0], [0], [1], [0, 0, 1, 1], [], []>} : vector<2x32xbf16>, vector<32x128xbf16>, vector<2x128xf32> -> vector<2x128xf32>
    %141 = arith.addf %138, %140 : vector<2x128xf32>
    %142 = vector.extract_strided_slice %11 {offsets = [8, 0], sizes = [2, 128], strides = [1, 1]} : vector<16x128xf32> to vector<2x128xf32>
    %143 = arith.truncf %137 : vector<2x32xf32> to vector<2x32xbf16>
    %cst_31 = arith.constant dense<0.000000e+00> : vector<2x128xf32>
    %144 = tpu.matmul %143, %13, %cst_31 {dimension_numbers = #tpu.dot_dimension_numbers<[1], [0], [0], [1], [0, 0, 1, 1], [], []>} : vector<2x32xbf16>, vector<32x128xbf16>, vector<2x128xf32> -> vector<2x128xf32>
    %145 = arith.addf %142, %144 : vector<2x128xf32>
    %146 = vector.extract_strided_slice %141 {offsets = [0, 0], sizes = [2, 96], strides = [1, 1]} : vector<2x128xf32> to vector<2x96xf32>
    %147 = arith.negf %146 : vector<2x96xf32>
    %148 = math.exp %147 : vector<2x96xf32>
    %cst_32 = arith.constant 1.000000e+00 : f32
    %149 = vector.broadcast %cst_32 : f32 to vector<2x96xf32>
    %150 = arith.addf %149, %148 : vector<2x96xf32>
    %151 = arith.divf %149, %150 : vector<2x96xf32>
    %152 = vector.extract_strided_slice %145 {offsets = [0, 0], sizes = [2, 96], strides = [1, 1]} : vector<2x128xf32> to vector<2x96xf32>
    %153 = arith.negf %152 : vector<2x96xf32>
    %154 = math.exp %153 : vector<2x96xf32>
    %cst_33 = arith.constant 1.000000e+00 : f32
    %155 = vector.broadcast %cst_33 : f32 to vector<2x96xf32>
    %156 = arith.addf %155, %154 : vector<2x96xf32>
    %157 = arith.divf %155, %156 : vector<2x96xf32>
    %158 = vector.extract_strided_slice %141 {offsets = [0, 96], sizes = [2, 32], strides = [1, 1]} : vector<2x128xf32> to vector<2x32xf32>
    %159 = math.tanh %158 : vector<2x32xf32>
    %160 = vector.extract_strided_slice %145 {offsets = [0, 96], sizes = [2, 32], strides = [1, 1]} : vector<2x128xf32> to vector<2x32xf32>
    %161 = math.tanh %160 : vector<2x32xf32>
    %162 = vector.extract_strided_slice %151 {offsets = [0, 32], sizes = [2, 32], strides = [1, 1]} : vector<2x96xf32> to vector<2x32xf32>
    %163 = arith.mulf %162, %126 : vector<2x32xf32>
    %164 = vector.extract_strided_slice %151 {offsets = [0, 0], sizes = [2, 32], strides = [1, 1]} : vector<2x96xf32> to vector<2x32xf32>
    %165 = arith.mulf %164, %159 : vector<2x32xf32>
    %166 = arith.addf %163, %165 : vector<2x32xf32>
    %167 = vector.extract_strided_slice %157 {offsets = [0, 32], sizes = [2, 32], strides = [1, 1]} : vector<2x96xf32> to vector<2x32xf32>
    %168 = arith.mulf %167, %131 : vector<2x32xf32>
    %169 = vector.extract_strided_slice %157 {offsets = [0, 0], sizes = [2, 32], strides = [1, 1]} : vector<2x96xf32> to vector<2x32xf32>
    %170 = arith.mulf %169, %161 : vector<2x32xf32>
    %171 = arith.addf %168, %170 : vector<2x32xf32>
    %172 = vector.extract_strided_slice %151 {offsets = [0, 64], sizes = [2, 32], strides = [1, 1]} : vector<2x96xf32> to vector<2x32xf32>
    %173 = math.tanh %166 : vector<2x32xf32>
    %174 = arith.mulf %172, %173 : vector<2x32xf32>
    %175 = vector.extract_strided_slice %157 {offsets = [0, 64], sizes = [2, 32], strides = [1, 1]} : vector<2x96xf32> to vector<2x32xf32>
    %176 = math.tanh %171 : vector<2x32xf32>
    %177 = arith.mulf %175, %176 : vector<2x32xf32>
    %178 = vector.extract_strided_slice %6 {offsets = [8, 0], sizes = [2, 128], strides = [1, 1]} : vector<16x128xf32> to vector<2x128xf32>
    %179 = arith.truncf %174 : vector<2x32xf32> to vector<2x32xbf16>
    %cst_34 = arith.constant dense<0.000000e+00> : vector<2x128xf32>
    %180 = tpu.matmul %179, %12, %cst_34 {dimension_numbers = #tpu.dot_dimension_numbers<[1], [0], [0], [1], [0, 0, 1, 1], [], []>} : vector<2x32xbf16>, vector<32x128xbf16>, vector<2x128xf32> -> vector<2x128xf32>
    %181 = arith.addf %178, %180 : vector<2x128xf32>
    %182 = vector.extract_strided_slice %11 {offsets = [6, 0], sizes = [2, 128], strides = [1, 1]} : vector<16x128xf32> to vector<2x128xf32>
    %183 = arith.truncf %177 : vector<2x32xf32> to vector<2x32xbf16>
    %cst_35 = arith.constant dense<0.000000e+00> : vector<2x128xf32>
    %184 = tpu.matmul %183, %13, %cst_35 {dimension_numbers = #tpu.dot_dimension_numbers<[1], [0], [0], [1], [0, 0, 1, 1], [], []>} : vector<2x32xbf16>, vector<32x128xbf16>, vector<2x128xf32> -> vector<2x128xf32>
    %185 = arith.addf %182, %184 : vector<2x128xf32>
    %186 = vector.extract_strided_slice %181 {offsets = [0, 0], sizes = [2, 96], strides = [1, 1]} : vector<2x128xf32> to vector<2x96xf32>
    %187 = arith.negf %186 : vector<2x96xf32>
    %188 = math.exp %187 : vector<2x96xf32>
    %cst_36 = arith.constant 1.000000e+00 : f32
    %189 = vector.broadcast %cst_36 : f32 to vector<2x96xf32>
    %190 = arith.addf %189, %188 : vector<2x96xf32>
    %191 = arith.divf %189, %190 : vector<2x96xf32>
    %192 = vector.extract_strided_slice %185 {offsets = [0, 0], sizes = [2, 96], strides = [1, 1]} : vector<2x128xf32> to vector<2x96xf32>
    %193 = arith.negf %192 : vector<2x96xf32>
    %194 = math.exp %193 : vector<2x96xf32>
    %cst_37 = arith.constant 1.000000e+00 : f32
    %195 = vector.broadcast %cst_37 : f32 to vector<2x96xf32>
    %196 = arith.addf %195, %194 : vector<2x96xf32>
    %197 = arith.divf %195, %196 : vector<2x96xf32>
    %198 = vector.extract_strided_slice %181 {offsets = [0, 96], sizes = [2, 32], strides = [1, 1]} : vector<2x128xf32> to vector<2x32xf32>
    %199 = math.tanh %198 : vector<2x32xf32>
    %200 = vector.extract_strided_slice %185 {offsets = [0, 96], sizes = [2, 32], strides = [1, 1]} : vector<2x128xf32> to vector<2x32xf32>
    %201 = math.tanh %200 : vector<2x32xf32>
    %202 = vector.extract_strided_slice %191 {offsets = [0, 32], sizes = [2, 32], strides = [1, 1]} : vector<2x96xf32> to vector<2x32xf32>
    %203 = arith.mulf %202, %166 : vector<2x32xf32>
    %204 = vector.extract_strided_slice %191 {offsets = [0, 0], sizes = [2, 32], strides = [1, 1]} : vector<2x96xf32> to vector<2x32xf32>
    %205 = arith.mulf %204, %199 : vector<2x32xf32>
    %206 = arith.addf %203, %205 : vector<2x32xf32>
    %207 = vector.extract_strided_slice %197 {offsets = [0, 32], sizes = [2, 32], strides = [1, 1]} : vector<2x96xf32> to vector<2x32xf32>
    %208 = arith.mulf %207, %171 : vector<2x32xf32>
    %209 = vector.extract_strided_slice %197 {offsets = [0, 0], sizes = [2, 32], strides = [1, 1]} : vector<2x96xf32> to vector<2x32xf32>
    %210 = arith.mulf %209, %201 : vector<2x32xf32>
    %211 = arith.addf %208, %210 : vector<2x32xf32>
    %212 = vector.extract_strided_slice %191 {offsets = [0, 64], sizes = [2, 32], strides = [1, 1]} : vector<2x96xf32> to vector<2x32xf32>
    %213 = math.tanh %206 : vector<2x32xf32>
    %214 = arith.mulf %212, %213 : vector<2x32xf32>
    %215 = vector.extract_strided_slice %197 {offsets = [0, 64], sizes = [2, 32], strides = [1, 1]} : vector<2x96xf32> to vector<2x32xf32>
    %216 = math.tanh %211 : vector<2x32xf32>
    %217 = arith.mulf %215, %216 : vector<2x32xf32>
    %218 = vector.extract_strided_slice %6 {offsets = [10, 0], sizes = [2, 128], strides = [1, 1]} : vector<16x128xf32> to vector<2x128xf32>
    %219 = arith.truncf %214 : vector<2x32xf32> to vector<2x32xbf16>
    %cst_38 = arith.constant dense<0.000000e+00> : vector<2x128xf32>
    %220 = tpu.matmul %219, %12, %cst_38 {dimension_numbers = #tpu.dot_dimension_numbers<[1], [0], [0], [1], [0, 0, 1, 1], [], []>} : vector<2x32xbf16>, vector<32x128xbf16>, vector<2x128xf32> -> vector<2x128xf32>
    %221 = arith.addf %218, %220 : vector<2x128xf32>
    %222 = vector.extract_strided_slice %11 {offsets = [4, 0], sizes = [2, 128], strides = [1, 1]} : vector<16x128xf32> to vector<2x128xf32>
    %223 = arith.truncf %217 : vector<2x32xf32> to vector<2x32xbf16>
    %cst_39 = arith.constant dense<0.000000e+00> : vector<2x128xf32>
    %224 = tpu.matmul %223, %13, %cst_39 {dimension_numbers = #tpu.dot_dimension_numbers<[1], [0], [0], [1], [0, 0, 1, 1], [], []>} : vector<2x32xbf16>, vector<32x128xbf16>, vector<2x128xf32> -> vector<2x128xf32>
    %225 = arith.addf %222, %224 : vector<2x128xf32>
    %226 = vector.extract_strided_slice %221 {offsets = [0, 0], sizes = [2, 96], strides = [1, 1]} : vector<2x128xf32> to vector<2x96xf32>
    %227 = arith.negf %226 : vector<2x96xf32>
    %228 = math.exp %227 : vector<2x96xf32>
    %cst_40 = arith.constant 1.000000e+00 : f32
    %229 = vector.broadcast %cst_40 : f32 to vector<2x96xf32>
    %230 = arith.addf %229, %228 : vector<2x96xf32>
    %231 = arith.divf %229, %230 : vector<2x96xf32>
    %232 = vector.extract_strided_slice %225 {offsets = [0, 0], sizes = [2, 96], strides = [1, 1]} : vector<2x128xf32> to vector<2x96xf32>
    %233 = arith.negf %232 : vector<2x96xf32>
    %234 = math.exp %233 : vector<2x96xf32>
    %cst_41 = arith.constant 1.000000e+00 : f32
    %235 = vector.broadcast %cst_41 : f32 to vector<2x96xf32>
    %236 = arith.addf %235, %234 : vector<2x96xf32>
    %237 = arith.divf %235, %236 : vector<2x96xf32>
    %238 = vector.extract_strided_slice %221 {offsets = [0, 96], sizes = [2, 32], strides = [1, 1]} : vector<2x128xf32> to vector<2x32xf32>
    %239 = math.tanh %238 : vector<2x32xf32>
    %240 = vector.extract_strided_slice %225 {offsets = [0, 96], sizes = [2, 32], strides = [1, 1]} : vector<2x128xf32> to vector<2x32xf32>
    %241 = math.tanh %240 : vector<2x32xf32>
    %242 = vector.extract_strided_slice %231 {offsets = [0, 32], sizes = [2, 32], strides = [1, 1]} : vector<2x96xf32> to vector<2x32xf32>
    %243 = arith.mulf %242, %206 : vector<2x32xf32>
    %244 = vector.extract_strided_slice %231 {offsets = [0, 0], sizes = [2, 32], strides = [1, 1]} : vector<2x96xf32> to vector<2x32xf32>
    %245 = arith.mulf %244, %239 : vector<2x32xf32>
    %246 = arith.addf %243, %245 : vector<2x32xf32>
    %247 = vector.extract_strided_slice %237 {offsets = [0, 32], sizes = [2, 32], strides = [1, 1]} : vector<2x96xf32> to vector<2x32xf32>
    %248 = arith.mulf %247, %211 : vector<2x32xf32>
    %249 = vector.extract_strided_slice %237 {offsets = [0, 0], sizes = [2, 32], strides = [1, 1]} : vector<2x96xf32> to vector<2x32xf32>
    %250 = arith.mulf %249, %241 : vector<2x32xf32>
    %251 = arith.addf %248, %250 : vector<2x32xf32>
    %252 = vector.extract_strided_slice %231 {offsets = [0, 64], sizes = [2, 32], strides = [1, 1]} : vector<2x96xf32> to vector<2x32xf32>
    %253 = math.tanh %246 : vector<2x32xf32>
    %254 = arith.mulf %252, %253 : vector<2x32xf32>
    %255 = vector.extract_strided_slice %237 {offsets = [0, 64], sizes = [2, 32], strides = [1, 1]} : vector<2x96xf32> to vector<2x32xf32>
    %256 = math.tanh %251 : vector<2x32xf32>
    %257 = arith.mulf %255, %256 : vector<2x32xf32>
    %258 = vector.extract_strided_slice %6 {offsets = [12, 0], sizes = [2, 128], strides = [1, 1]} : vector<16x128xf32> to vector<2x128xf32>
    %259 = arith.truncf %254 : vector<2x32xf32> to vector<2x32xbf16>
    %cst_42 = arith.constant dense<0.000000e+00> : vector<2x128xf32>
    %260 = tpu.matmul %259, %12, %cst_42 {dimension_numbers = #tpu.dot_dimension_numbers<[1], [0], [0], [1], [0, 0, 1, 1], [], []>} : vector<2x32xbf16>, vector<32x128xbf16>, vector<2x128xf32> -> vector<2x128xf32>
    %261 = arith.addf %258, %260 : vector<2x128xf32>
    %262 = vector.extract_strided_slice %11 {offsets = [2, 0], sizes = [2, 128], strides = [1, 1]} : vector<16x128xf32> to vector<2x128xf32>
    %263 = arith.truncf %257 : vector<2x32xf32> to vector<2x32xbf16>
    %cst_43 = arith.constant dense<0.000000e+00> : vector<2x128xf32>
    %264 = tpu.matmul %263, %13, %cst_43 {dimension_numbers = #tpu.dot_dimension_numbers<[1], [0], [0], [1], [0, 0, 1, 1], [], []>} : vector<2x32xbf16>, vector<32x128xbf16>, vector<2x128xf32> -> vector<2x128xf32>
    %265 = arith.addf %262, %264 : vector<2x128xf32>
    %266 = vector.extract_strided_slice %261 {offsets = [0, 0], sizes = [2, 96], strides = [1, 1]} : vector<2x128xf32> to vector<2x96xf32>
    %267 = arith.negf %266 : vector<2x96xf32>
    %268 = math.exp %267 : vector<2x96xf32>
    %cst_44 = arith.constant 1.000000e+00 : f32
    %269 = vector.broadcast %cst_44 : f32 to vector<2x96xf32>
    %270 = arith.addf %269, %268 : vector<2x96xf32>
    %271 = arith.divf %269, %270 : vector<2x96xf32>
    %272 = vector.extract_strided_slice %265 {offsets = [0, 0], sizes = [2, 96], strides = [1, 1]} : vector<2x128xf32> to vector<2x96xf32>
    %273 = arith.negf %272 : vector<2x96xf32>
    %274 = math.exp %273 : vector<2x96xf32>
    %cst_45 = arith.constant 1.000000e+00 : f32
    %275 = vector.broadcast %cst_45 : f32 to vector<2x96xf32>
    %276 = arith.addf %275, %274 : vector<2x96xf32>
    %277 = arith.divf %275, %276 : vector<2x96xf32>
    %278 = vector.extract_strided_slice %261 {offsets = [0, 96], sizes = [2, 32], strides = [1, 1]} : vector<2x128xf32> to vector<2x32xf32>
    %279 = math.tanh %278 : vector<2x32xf32>
    %280 = vector.extract_strided_slice %265 {offsets = [0, 96], sizes = [2, 32], strides = [1, 1]} : vector<2x128xf32> to vector<2x32xf32>
    %281 = math.tanh %280 : vector<2x32xf32>
    %282 = vector.extract_strided_slice %271 {offsets = [0, 32], sizes = [2, 32], strides = [1, 1]} : vector<2x96xf32> to vector<2x32xf32>
    %283 = arith.mulf %282, %246 : vector<2x32xf32>
    %284 = vector.extract_strided_slice %271 {offsets = [0, 0], sizes = [2, 32], strides = [1, 1]} : vector<2x96xf32> to vector<2x32xf32>
    %285 = arith.mulf %284, %279 : vector<2x32xf32>
    %286 = arith.addf %283, %285 : vector<2x32xf32>
    %287 = vector.extract_strided_slice %277 {offsets = [0, 32], sizes = [2, 32], strides = [1, 1]} : vector<2x96xf32> to vector<2x32xf32>
    %288 = arith.mulf %287, %251 : vector<2x32xf32>
    %289 = vector.extract_strided_slice %277 {offsets = [0, 0], sizes = [2, 32], strides = [1, 1]} : vector<2x96xf32> to vector<2x32xf32>
    %290 = arith.mulf %289, %281 : vector<2x32xf32>
    %291 = arith.addf %288, %290 : vector<2x32xf32>
    %292 = vector.extract_strided_slice %271 {offsets = [0, 64], sizes = [2, 32], strides = [1, 1]} : vector<2x96xf32> to vector<2x32xf32>
    %293 = math.tanh %286 : vector<2x32xf32>
    %294 = arith.mulf %292, %293 : vector<2x32xf32>
    %295 = vector.extract_strided_slice %277 {offsets = [0, 64], sizes = [2, 32], strides = [1, 1]} : vector<2x96xf32> to vector<2x32xf32>
    %296 = math.tanh %291 : vector<2x32xf32>
    %297 = arith.mulf %295, %296 : vector<2x32xf32>
    %298 = vector.extract_strided_slice %6 {offsets = [14, 0], sizes = [2, 128], strides = [1, 1]} : vector<16x128xf32> to vector<2x128xf32>
    %299 = arith.truncf %294 : vector<2x32xf32> to vector<2x32xbf16>
    %cst_46 = arith.constant dense<0.000000e+00> : vector<2x128xf32>
    %300 = tpu.matmul %299, %12, %cst_46 {dimension_numbers = #tpu.dot_dimension_numbers<[1], [0], [0], [1], [0, 0, 1, 1], [], []>} : vector<2x32xbf16>, vector<32x128xbf16>, vector<2x128xf32> -> vector<2x128xf32>
    %301 = arith.addf %298, %300 : vector<2x128xf32>
    %302 = vector.extract_strided_slice %11 {offsets = [0, 0], sizes = [2, 128], strides = [1, 1]} : vector<16x128xf32> to vector<2x128xf32>
    %303 = arith.truncf %297 : vector<2x32xf32> to vector<2x32xbf16>
    %cst_47 = arith.constant dense<0.000000e+00> : vector<2x128xf32>
    %304 = tpu.matmul %303, %13, %cst_47 {dimension_numbers = #tpu.dot_dimension_numbers<[1], [0], [0], [1], [0, 0, 1, 1], [], []>} : vector<2x32xbf16>, vector<32x128xbf16>, vector<2x128xf32> -> vector<2x128xf32>
    %305 = arith.addf %302, %304 : vector<2x128xf32>
    %306 = vector.extract_strided_slice %301 {offsets = [0, 0], sizes = [2, 96], strides = [1, 1]} : vector<2x128xf32> to vector<2x96xf32>
    %307 = arith.negf %306 : vector<2x96xf32>
    %308 = math.exp %307 : vector<2x96xf32>
    %cst_48 = arith.constant 1.000000e+00 : f32
    %309 = vector.broadcast %cst_48 : f32 to vector<2x96xf32>
    %310 = arith.addf %309, %308 : vector<2x96xf32>
    %311 = arith.divf %309, %310 : vector<2x96xf32>
    %312 = vector.extract_strided_slice %305 {offsets = [0, 0], sizes = [2, 96], strides = [1, 1]} : vector<2x128xf32> to vector<2x96xf32>
    %313 = arith.negf %312 : vector<2x96xf32>
    %314 = math.exp %313 : vector<2x96xf32>
    %cst_49 = arith.constant 1.000000e+00 : f32
    %315 = vector.broadcast %cst_49 : f32 to vector<2x96xf32>
    %316 = arith.addf %315, %314 : vector<2x96xf32>
    %317 = arith.divf %315, %316 : vector<2x96xf32>
    %318 = vector.extract_strided_slice %301 {offsets = [0, 96], sizes = [2, 32], strides = [1, 1]} : vector<2x128xf32> to vector<2x32xf32>
    %319 = math.tanh %318 : vector<2x32xf32>
    %320 = vector.extract_strided_slice %305 {offsets = [0, 96], sizes = [2, 32], strides = [1, 1]} : vector<2x128xf32> to vector<2x32xf32>
    %321 = math.tanh %320 : vector<2x32xf32>
    %322 = vector.extract_strided_slice %311 {offsets = [0, 32], sizes = [2, 32], strides = [1, 1]} : vector<2x96xf32> to vector<2x32xf32>
    %323 = arith.mulf %322, %286 : vector<2x32xf32>
    %324 = vector.extract_strided_slice %311 {offsets = [0, 0], sizes = [2, 32], strides = [1, 1]} : vector<2x96xf32> to vector<2x32xf32>
    %325 = arith.mulf %324, %319 : vector<2x32xf32>
    %326 = arith.addf %323, %325 : vector<2x32xf32>
    %327 = vector.extract_strided_slice %317 {offsets = [0, 32], sizes = [2, 32], strides = [1, 1]} : vector<2x96xf32> to vector<2x32xf32>
    %328 = arith.mulf %327, %291 : vector<2x32xf32>
    %329 = vector.extract_strided_slice %317 {offsets = [0, 0], sizes = [2, 32], strides = [1, 1]} : vector<2x96xf32> to vector<2x32xf32>
    %330 = arith.mulf %329, %321 : vector<2x32xf32>
    %331 = arith.addf %328, %330 : vector<2x32xf32>
    %332 = vector.extract_strided_slice %311 {offsets = [0, 64], sizes = [2, 32], strides = [1, 1]} : vector<2x96xf32> to vector<2x32xf32>
    %333 = math.tanh %326 : vector<2x32xf32>
    %334 = arith.mulf %332, %333 : vector<2x32xf32>
    %335 = vector.extract_strided_slice %317 {offsets = [0, 64], sizes = [2, 32], strides = [1, 1]} : vector<2x96xf32> to vector<2x32xf32>
    %336 = math.tanh %331 : vector<2x32xf32>
    %337 = arith.mulf %335, %336 : vector<2x32xf32>
    %338 = arith.addf %54, %337 : vector<2x32xf32>
    %339 = arith.addf %94, %297 : vector<2x32xf32>
    %340 = arith.addf %134, %257 : vector<2x32xf32>
    %341 = arith.addf %174, %217 : vector<2x32xf32>
    %342 = arith.addf %214, %177 : vector<2x32xf32>
    %343 = arith.addf %254, %137 : vector<2x32xf32>
    %344 = arith.addf %294, %97 : vector<2x32xf32>
    %345 = arith.addf %334, %57 : vector<2x32xf32>
    %c0_50 = arith.constant 0 : index
    %c0_51 = arith.constant 0 : index
    %346 = vector.load %arg20[%c0_50, %c0_51] : memref<16x32xf32, #tpu.memory_space<vmem>>, vector<2x32xf32>
    tpu.vector_store %arg20[%c0_50, %c0_51], %338 {strides = array<i32>} : memref<16x32xf32, #tpu.memory_space<vmem>>, vector<2x32xf32>,
    %c2 = arith.constant 2 : index
    %c0_52 = arith.constant 0 : index
    %347 = vector.load %arg20[%c2, %c0_52] : memref<16x32xf32, #tpu.memory_space<vmem>>, vector<2x32xf32>
    tpu.vector_store %arg20[%c2, %c0_52], %339 {strides = array<i32>} : memref<16x32xf32, #tpu.memory_space<vmem>>, vector<2x32xf32>,
    %c4 = arith.constant 4 : index
    %c0_53 = arith.constant 0 : index
    %348 = vector.load %arg20[%c4, %c0_53] : memref<16x32xf32, #tpu.memory_space<vmem>>, vector<2x32xf32>
    tpu.vector_store %arg20[%c4, %c0_53], %340 {strides = array<i32>} : memref<16x32xf32, #tpu.memory_space<vmem>>, vector<2x32xf32>,
    %c6 = arith.constant 6 : index
    %c0_54 = arith.constant 0 : index
    %349 = vector.load %arg20[%c6, %c0_54] : memref<16x32xf32, #tpu.memory_space<vmem>>, vector<2x32xf32>
    tpu.vector_store %arg20[%c6, %c0_54], %341 {strides = array<i32>} : memref<16x32xf32, #tpu.memory_space<vmem>>, vector<2x32xf32>,
    %c8 = arith.constant 8 : index
    %c0_55 = arith.constant 0 : index
    %350 = vector.load %arg20[%c8, %c0_55] : memref<16x32xf32, #tpu.memory_space<vmem>>, vector<2x32xf32>
    tpu.vector_store %arg20[%c8, %c0_55], %342 {strides = array<i32>} : memref<16x32xf32, #tpu.memory_space<vmem>>, vector<2x32xf32>,
    %c10 = arith.constant 10 : index
    %c0_56 = arith.constant 0 : index
    %351 = vector.load %arg20[%c10, %c0_56] : memref<16x32xf32, #tpu.memory_space<vmem>>, vector<2x32xf32>
    tpu.vector_store %arg20[%c10, %c0_56], %343 {strides = array<i32>} : memref<16x32xf32, #tpu.memory_space<vmem>>, vector<2x32xf32>,
    %c12 = arith.constant 12 : index
    %c0_57 = arith.constant 0 : index
    %352 = vector.load %arg20[%c12, %c0_57] : memref<16x32xf32, #tpu.memory_space<vmem>>, vector<2x32xf32>
    tpu.vector_store %arg20[%c12, %c0_57], %344 {strides = array<i32>} : memref<16x32xf32, #tpu.memory_space<vmem>>, vector<2x32xf32>,
    %c14 = arith.constant 14 : index
    %c0_58 = arith.constant 0 : index
    %353 = vector.load %arg20[%c14, %c0_58] : memref<16x32xf32, #tpu.memory_space<vmem>>, vector<2x32xf32>
    tpu.vector_store %arg20[%c14, %c0_58], %345 {strides = array<i32>} : memref<16x32xf32, #tpu.memory_space<vmem>>, vector<2x32xf32>,
    %c0_59 = arith.constant 0 : index
    %c0_60 = arith.constant 0 : index
    %354 = vector.load %arg20[%c0_59, %c0_60] : memref<16x32xf32, #tpu.memory_space<vmem>>, vector<16x32xf32>
    %355 = arith.truncf %354 : vector<16x32xf32> to vector<16x32xbf16>
    %c0_61 = arith.constant 0 : index
    %c0_62 = arith.constant 0 : index
    %356 = vector.load %arg8[%c0_61, %c0_62] : memref<32x128xbf16, #tpu.memory_space<vmem>>, vector<32x128xbf16>
    %cst_63 = arith.constant dense<0.000000e+00> : vector<16x128xf32>
    %357 = tpu.matmul %355, %356, %cst_63 {dimension_numbers = #tpu.dot_dimension_numbers<[1], [0], [0], [1], [0, 0, 1, 1], [], []>} : vector<16x32xbf16>, vector<32x128xbf16>, vector<16x128xf32> -> vector<16x128xf32>
    %c0_64 = arith.constant 0 : index
    %c0_65 = arith.constant 0 : index
    %358 = vector.load %arg10[%c0_64, %c0_65] : memref<1x128xf32, #tpu.memory_space<vmem>>, vector<1x128xf32>
    %359 = vector.broadcast %358 : vector<1x128xf32> to vector<16x128xf32>
    %360 = arith.addf %357, %359 : vector<16x128xf32>
    %c0_66 = arith.constant 0 : index
    %c0_67 = arith.constant 0 : index
    %361 = vector.load %arg11[%c0_66, %c0_67] : memref<32x128xbf16, #tpu.memory_space<vmem>>, vector<32x128xbf16>
    %cst_68 = arith.constant dense<0.000000e+00> : vector<16x128xf32>
    %362 = tpu.matmul %355, %361, %cst_68 {dimension_numbers = #tpu.dot_dimension_numbers<[1], [0], [0], [1], [0, 0, 1, 1], [], []>} : vector<16x32xbf16>, vector<32x128xbf16>, vector<16x128xf32> -> vector<16x128xf32>
    %c0_69 = arith.constant 0 : index
    %c0_70 = arith.constant 0 : index
    %363 = vector.load %arg13[%c0_69, %c0_70] : memref<1x128xf32, #tpu.memory_space<vmem>>, vector<1x128xf32>
    %364 = vector.broadcast %363 : vector<1x128xf32> to vector<16x128xf32>
    %365 = arith.addf %362, %364 : vector<16x128xf32>
    %c0_71 = arith.constant 0 : index
    %c0_72 = arith.constant 0 : index
    %366 = vector.load %arg9[%c0_71, %c0_72] : memref<32x128xbf16, #tpu.memory_space<vmem>>, vector<32x128xbf16>
    %c0_73 = arith.constant 0 : index
    %c0_74 = arith.constant 0 : index
    %367 = vector.load %arg12[%c0_73, %c0_74] : memref<32x128xbf16, #tpu.memory_space<vmem>>, vector<32x128xbf16>
    %cst_75 = arith.constant 0.000000e+00 : f32
    %368 = vector.broadcast %cst_75 : f32 to vector<2x32xf32>
    %cst_76 = arith.constant 0.000000e+00 : f32
    %369 = vector.broadcast %cst_76 : f32 to vector<2x32xf32>
    %cst_77 = arith.constant 0.000000e+00 : f32
    %370 = vector.broadcast %cst_77 : f32 to vector<2x32xf32>
    %cst_78 = arith.constant 0.000000e+00 : f32
    %371 = vector.broadcast %cst_78 : f32 to vector<2x32xf32>
    %372 = vector.extract_strided_slice %360 {offsets = [0, 0], sizes = [2, 128], strides = [1, 1]} : vector<16x128xf32> to vector<2x128xf32>
    %373 = arith.truncf %368 : vector<2x32xf32> to vector<2x32xbf16>
    %cst_79 = arith.constant dense<0.000000e+00> : vector<2x128xf32>
    %374 = tpu.matmul %373, %366, %cst_79 {dimension_numbers = #tpu.dot_dimension_numbers<[1], [0], [0], [1], [0, 0, 1, 1], [], []>} : vector<2x32xbf16>, vector<32x128xbf16>, vector<2x128xf32> -> vector<2x128xf32>
    %375 = arith.addf %372, %374 : vector<2x128xf32>
    %376 = vector.extract_strided_slice %365 {offsets = [14, 0], sizes = [2, 128], strides = [1, 1]} : vector<16x128xf32> to vector<2x128xf32>
    %377 = arith.truncf %370 : vector<2x32xf32> to vector<2x32xbf16>
    %cst_80 = arith.constant dense<0.000000e+00> : vector<2x128xf32>
    %378 = tpu.matmul %377, %367, %cst_80 {dimension_numbers = #tpu.dot_dimension_numbers<[1], [0], [0], [1], [0, 0, 1, 1], [], []>} : vector<2x32xbf16>, vector<32x128xbf16>, vector<2x128xf32> -> vector<2x128xf32>
    %379 = arith.addf %376, %378 : vector<2x128xf32>
    %380 = vector.extract_strided_slice %375 {offsets = [0, 0], sizes = [2, 96], strides = [1, 1]} : vector<2x128xf32> to vector<2x96xf32>
    %381 = arith.negf %380 : vector<2x96xf32>
    %382 = math.exp %381 : vector<2x96xf32>
    %cst_81 = arith.constant 1.000000e+00 : f32
    %383 = vector.broadcast %cst_81 : f32 to vector<2x96xf32>
    %384 = arith.addf %383, %382 : vector<2x96xf32>
    %385 = arith.divf %383, %384 : vector<2x96xf32>
    %386 = vector.extract_strided_slice %379 {offsets = [0, 0], sizes = [2, 96], strides = [1, 1]} : vector<2x128xf32> to vector<2x96xf32>
    %387 = arith.negf %386 : vector<2x96xf32>
    %388 = math.exp %387 : vector<2x96xf32>
    %cst_82 = arith.constant 1.000000e+00 : f32
    %389 = vector.broadcast %cst_82 : f32 to vector<2x96xf32>
    %390 = arith.addf %389, %388 : vector<2x96xf32>
    %391 = arith.divf %389, %390 : vector<2x96xf32>
    %392 = vector.extract_strided_slice %375 {offsets = [0, 96], sizes = [2, 32], strides = [1, 1]} : vector<2x128xf32> to vector<2x32xf32>
    %393 = math.tanh %392 : vector<2x32xf32>
    %394 = vector.extract_strided_slice %379 {offsets = [0, 96], sizes = [2, 32], strides = [1, 1]} : vector<2x128xf32> to vector<2x32xf32>
    %395 = math.tanh %394 : vector<2x32xf32>
    %396 = vector.extract_strided_slice %385 {offsets = [0, 32], sizes = [2, 32], strides = [1, 1]} : vector<2x96xf32> to vector<2x32xf32>
    %397 = arith.mulf %396, %369 : vector<2x32xf32>
    %398 = vector.extract_strided_slice %385 {offsets = [0, 0], sizes = [2, 32], strides = [1, 1]} : vector<2x96xf32> to vector<2x32xf32>
    %399 = arith.mulf %398, %393 : vector<2x32xf32>
    %400 = arith.addf %397, %399 : vector<2x32xf32>
    %401 = vector.extract_strided_slice %391 {offsets = [0, 32], sizes = [2, 32], strides = [1, 1]} : vector<2x96xf32> to vector<2x32xf32>
    %402 = arith.mulf %401, %371 : vector<2x32xf32>
    %403 = vector.extract_strided_slice %391 {offsets = [0, 0], sizes = [2, 32], strides = [1, 1]} : vector<2x96xf32> to vector<2x32xf32>
    %404 = arith.mulf %403, %395 : vector<2x32xf32>
    %405 = arith.addf %402, %404 : vector<2x32xf32>
    %406 = vector.extract_strided_slice %385 {offsets = [0, 64], sizes = [2, 32], strides = [1, 1]} : vector<2x96xf32> to vector<2x32xf32>
    %407 = math.tanh %400 : vector<2x32xf32>
    %408 = arith.mulf %406, %407 : vector<2x32xf32>
    %409 = vector.extract_strided_slice %391 {offsets = [0, 64], sizes = [2, 32], strides = [1, 1]} : vector<2x96xf32> to vector<2x32xf32>
    %410 = math.tanh %405 : vector<2x32xf32>
    %411 = arith.mulf %409, %410 : vector<2x32xf32>
    %412 = vector.extract_strided_slice %360 {offsets = [2, 0], sizes = [2, 128], strides = [1, 1]} : vector<16x128xf32> to vector<2x128xf32>
    %413 = arith.truncf %408 : vector<2x32xf32> to vector<2x32xbf16>
    %cst_83 = arith.constant dense<0.000000e+00> : vector<2x128xf32>
    %414 = tpu.matmul %413, %366, %cst_83 {dimension_numbers = #tpu.dot_dimension_numbers<[1], [0], [0], [1], [0, 0, 1, 1], [], []>} : vector<2x32xbf16>, vector<32x128xbf16>, vector<2x128xf32> -> vector<2x128xf32>
    %415 = arith.addf %412, %414 : vector<2x128xf32>
    %416 = vector.extract_strided_slice %365 {offsets = [12, 0], sizes = [2, 128], strides = [1, 1]} : vector<16x128xf32> to vector<2x128xf32>
    %417 = arith.truncf %411 : vector<2x32xf32> to vector<2x32xbf16>
    %cst_84 = arith.constant dense<0.000000e+00> : vector<2x128xf32>
    %418 = tpu.matmul %417, %367, %cst_84 {dimension_numbers = #tpu.dot_dimension_numbers<[1], [0], [0], [1], [0, 0, 1, 1], [], []>} : vector<2x32xbf16>, vector<32x128xbf16>, vector<2x128xf32> -> vector<2x128xf32>
    %419 = arith.addf %416, %418 : vector<2x128xf32>
    %420 = vector.extract_strided_slice %415 {offsets = [0, 0], sizes = [2, 96], strides = [1, 1]} : vector<2x128xf32> to vector<2x96xf32>
    %421 = arith.negf %420 : vector<2x96xf32>
    %422 = math.exp %421 : vector<2x96xf32>
    %cst_85 = arith.constant 1.000000e+00 : f32
    %423 = vector.broadcast %cst_85 : f32 to vector<2x96xf32>
    %424 = arith.addf %423, %422 : vector<2x96xf32>
    %425 = arith.divf %423, %424 : vector<2x96xf32>
    %426 = vector.extract_strided_slice %419 {offsets = [0, 0], sizes = [2, 96], strides = [1, 1]} : vector<2x128xf32> to vector<2x96xf32>
    %427 = arith.negf %426 : vector<2x96xf32>
    %428 = math.exp %427 : vector<2x96xf32>
    %cst_86 = arith.constant 1.000000e+00 : f32
    %429 = vector.broadcast %cst_86 : f32 to vector<2x96xf32>
    %430 = arith.addf %429, %428 : vector<2x96xf32>
    %431 = arith.divf %429, %430 : vector<2x96xf32>
    %432 = vector.extract_strided_slice %415 {offsets = [0, 96], sizes = [2, 32], strides = [1, 1]} : vector<2x128xf32> to vector<2x32xf32>
    %433 = math.tanh %432 : vector<2x32xf32>
    %434 = vector.extract_strided_slice %419 {offsets = [0, 96], sizes = [2, 32], strides = [1, 1]} : vector<2x128xf32> to vector<2x32xf32>
    %435 = math.tanh %434 : vector<2x32xf32>
    %436 = vector.extract_strided_slice %425 {offsets = [0, 32], sizes = [2, 32], strides = [1, 1]} : vector<2x96xf32> to vector<2x32xf32>
    %437 = arith.mulf %436, %400 : vector<2x32xf32>
    %438 = vector.extract_strided_slice %425 {offsets = [0, 0], sizes = [2, 32], strides = [1, 1]} : vector<2x96xf32> to vector<2x32xf32>
    %439 = arith.mulf %438, %433 : vector<2x32xf32>
    %440 = arith.addf %437, %439 : vector<2x32xf32>
    %441 = vector.extract_strided_slice %431 {offsets = [0, 32], sizes = [2, 32], strides = [1, 1]} : vector<2x96xf32> to vector<2x32xf32>
    %442 = arith.mulf %441, %405 : vector<2x32xf32>
    %443 = vector.extract_strided_slice %431 {offsets = [0, 0], sizes = [2, 32], strides = [1, 1]} : vector<2x96xf32> to vector<2x32xf32>
    %444 = arith.mulf %443, %435 : vector<2x32xf32>
    %445 = arith.addf %442, %444 : vector<2x32xf32>
    %446 = vector.extract_strided_slice %425 {offsets = [0, 64], sizes = [2, 32], strides = [1, 1]} : vector<2x96xf32> to vector<2x32xf32>
    %447 = math.tanh %440 : vector<2x32xf32>
    %448 = arith.mulf %446, %447 : vector<2x32xf32>
    %449 = vector.extract_strided_slice %431 {offsets = [0, 64], sizes = [2, 32], strides = [1, 1]} : vector<2x96xf32> to vector<2x32xf32>
    %450 = math.tanh %445 : vector<2x32xf32>
    %451 = arith.mulf %449, %450 : vector<2x32xf32>
    %452 = vector.extract_strided_slice %360 {offsets = [4, 0], sizes = [2, 128], strides = [1, 1]} : vector<16x128xf32> to vector<2x128xf32>
    %453 = arith.truncf %448 : vector<2x32xf32> to vector<2x32xbf16>
    %cst_87 = arith.constant dense<0.000000e+00> : vector<2x128xf32>
    %454 = tpu.matmul %453, %366, %cst_87 {dimension_numbers = #tpu.dot_dimension_numbers<[1], [0], [0], [1], [0, 0, 1, 1], [], []>} : vector<2x32xbf16>, vector<32x128xbf16>, vector<2x128xf32> -> vector<2x128xf32>
    %455 = arith.addf %452, %454 : vector<2x128xf32>
    %456 = vector.extract_strided_slice %365 {offsets = [10, 0], sizes = [2, 128], strides = [1, 1]} : vector<16x128xf32> to vector<2x128xf32>
    %457 = arith.truncf %451 : vector<2x32xf32> to vector<2x32xbf16>
    %cst_88 = arith.constant dense<0.000000e+00> : vector<2x128xf32>
    %458 = tpu.matmul %457, %367, %cst_88 {dimension_numbers = #tpu.dot_dimension_numbers<[1], [0], [0], [1], [0, 0, 1, 1], [], []>} : vector<2x32xbf16>, vector<32x128xbf16>, vector<2x128xf32> -> vector<2x128xf32>
    %459 = arith.addf %456, %458 : vector<2x128xf32>
    %460 = vector.extract_strided_slice %455 {offsets = [0, 0], sizes = [2, 96], strides = [1, 1]} : vector<2x128xf32> to vector<2x96xf32>
    %461 = arith.negf %460 : vector<2x96xf32>
    %462 = math.exp %461 : vector<2x96xf32>
    %cst_89 = arith.constant 1.000000e+00 : f32
    %463 = vector.broadcast %cst_89 : f32 to vector<2x96xf32>
    %464 = arith.addf %463, %462 : vector<2x96xf32>
    %465 = arith.divf %463, %464 : vector<2x96xf32>
    %466 = vector.extract_strided_slice %459 {offsets = [0, 0], sizes = [2, 96], strides = [1, 1]} : vector<2x128xf32> to vector<2x96xf32>
    %467 = arith.negf %466 : vector<2x96xf32>
    %468 = math.exp %467 : vector<2x96xf32>
    %cst_90 = arith.constant 1.000000e+00 : f32
    %469 = vector.broadcast %cst_90 : f32 to vector<2x96xf32>
    %470 = arith.addf %469, %468 : vector<2x96xf32>
    %471 = arith.divf %469, %470 : vector<2x96xf32>
    %472 = vector.extract_strided_slice %455 {offsets = [0, 96], sizes = [2, 32], strides = [1, 1]} : vector<2x128xf32> to vector<2x32xf32>
    %473 = math.tanh %472 : vector<2x32xf32>
    %474 = vector.extract_strided_slice %459 {offsets = [0, 96], sizes = [2, 32], strides = [1, 1]} : vector<2x128xf32> to vector<2x32xf32>
    %475 = math.tanh %474 : vector<2x32xf32>
    %476 = vector.extract_strided_slice %465 {offsets = [0, 32], sizes = [2, 32], strides = [1, 1]} : vector<2x96xf32> to vector<2x32xf32>
    %477 = arith.mulf %476, %440 : vector<2x32xf32>
    %478 = vector.extract_strided_slice %465 {offsets = [0, 0], sizes = [2, 32], strides = [1, 1]} : vector<2x96xf32> to vector<2x32xf32>
    %479 = arith.mulf %478, %473 : vector<2x32xf32>
    %480 = arith.addf %477, %479 : vector<2x32xf32>
    %481 = vector.extract_strided_slice %471 {offsets = [0, 32], sizes = [2, 32], strides = [1, 1]} : vector<2x96xf32> to vector<2x32xf32>
    %482 = arith.mulf %481, %445 : vector<2x32xf32>
    %483 = vector.extract_strided_slice %471 {offsets = [0, 0], sizes = [2, 32], strides = [1, 1]} : vector<2x96xf32> to vector<2x32xf32>
    %484 = arith.mulf %483, %475 : vector<2x32xf32>
    %485 = arith.addf %482, %484 : vector<2x32xf32>
    %486 = vector.extract_strided_slice %465 {offsets = [0, 64], sizes = [2, 32], strides = [1, 1]} : vector<2x96xf32> to vector<2x32xf32>
    %487 = math.tanh %480 : vector<2x32xf32>
    %488 = arith.mulf %486, %487 : vector<2x32xf32>
    %489 = vector.extract_strided_slice %471 {offsets = [0, 64], sizes = [2, 32], strides = [1, 1]} : vector<2x96xf32> to vector<2x32xf32>
    %490 = math.tanh %485 : vector<2x32xf32>
    %491 = arith.mulf %489, %490 : vector<2x32xf32>
    %492 = vector.extract_strided_slice %360 {offsets = [6, 0], sizes = [2, 128], strides = [1, 1]} : vector<16x128xf32> to vector<2x128xf32>
    %493 = arith.truncf %488 : vector<2x32xf32> to vector<2x32xbf16>
    %cst_91 = arith.constant dense<0.000000e+00> : vector<2x128xf32>
    %494 = tpu.matmul %493, %366, %cst_91 {dimension_numbers = #tpu.dot_dimension_numbers<[1], [0], [0], [1], [0, 0, 1, 1], [], []>} : vector<2x32xbf16>, vector<32x128xbf16>, vector<2x128xf32> -> vector<2x128xf32>
    %495 = arith.addf %492, %494 : vector<2x128xf32>
    %496 = vector.extract_strided_slice %365 {offsets = [8, 0], sizes = [2, 128], strides = [1, 1]} : vector<16x128xf32> to vector<2x128xf32>
    %497 = arith.truncf %491 : vector<2x32xf32> to vector<2x32xbf16>
    %cst_92 = arith.constant dense<0.000000e+00> : vector<2x128xf32>
    %498 = tpu.matmul %497, %367, %cst_92 {dimension_numbers = #tpu.dot_dimension_numbers<[1], [0], [0], [1], [0, 0, 1, 1], [], []>} : vector<2x32xbf16>, vector<32x128xbf16>, vector<2x128xf32> -> vector<2x128xf32>
    %499 = arith.addf %496, %498 : vector<2x128xf32>
    %500 = vector.extract_strided_slice %495 {offsets = [0, 0], sizes = [2, 96], strides = [1, 1]} : vector<2x128xf32> to vector<2x96xf32>
    %501 = arith.negf %500 : vector<2x96xf32>
    %502 = math.exp %501 : vector<2x96xf32>
    %cst_93 = arith.constant 1.000000e+00 : f32
    %503 = vector.broadcast %cst_93 : f32 to vector<2x96xf32>
    %504 = arith.addf %503, %502 : vector<2x96xf32>
    %505 = arith.divf %503, %504 : vector<2x96xf32>
    %506 = vector.extract_strided_slice %499 {offsets = [0, 0], sizes = [2, 96], strides = [1, 1]} : vector<2x128xf32> to vector<2x96xf32>
    %507 = arith.negf %506 : vector<2x96xf32>
    %508 = math.exp %507 : vector<2x96xf32>
    %cst_94 = arith.constant 1.000000e+00 : f32
    %509 = vector.broadcast %cst_94 : f32 to vector<2x96xf32>
    %510 = arith.addf %509, %508 : vector<2x96xf32>
    %511 = arith.divf %509, %510 : vector<2x96xf32>
    %512 = vector.extract_strided_slice %495 {offsets = [0, 96], sizes = [2, 32], strides = [1, 1]} : vector<2x128xf32> to vector<2x32xf32>
    %513 = math.tanh %512 : vector<2x32xf32>
    %514 = vector.extract_strided_slice %499 {offsets = [0, 96], sizes = [2, 32], strides = [1, 1]} : vector<2x128xf32> to vector<2x32xf32>
    %515 = math.tanh %514 : vector<2x32xf32>
    %516 = vector.extract_strided_slice %505 {offsets = [0, 32], sizes = [2, 32], strides = [1, 1]} : vector<2x96xf32> to vector<2x32xf32>
    %517 = arith.mulf %516, %480 : vector<2x32xf32>
    %518 = vector.extract_strided_slice %505 {offsets = [0, 0], sizes = [2, 32], strides = [1, 1]} : vector<2x96xf32> to vector<2x32xf32>
    %519 = arith.mulf %518, %513 : vector<2x32xf32>
    %520 = arith.addf %517, %519 : vector<2x32xf32>
    %521 = vector.extract_strided_slice %511 {offsets = [0, 32], sizes = [2, 32], strides = [1, 1]} : vector<2x96xf32> to vector<2x32xf32>
    %522 = arith.mulf %521, %485 : vector<2x32xf32>
    %523 = vector.extract_strided_slice %511 {offsets = [0, 0], sizes = [2, 32], strides = [1, 1]} : vector<2x96xf32> to vector<2x32xf32>
    %524 = arith.mulf %523, %515 : vector<2x32xf32>
    %525 = arith.addf %522, %524 : vector<2x32xf32>
    %526 = vector.extract_strided_slice %505 {offsets = [0, 64], sizes = [2, 32], strides = [1, 1]} : vector<2x96xf32> to vector<2x32xf32>
    %527 = math.tanh %520 : vector<2x32xf32>
    %528 = arith.mulf %526, %527 : vector<2x32xf32>
    %529 = vector.extract_strided_slice %511 {offsets = [0, 64], sizes = [2, 32], strides = [1, 1]} : vector<2x96xf32> to vector<2x32xf32>
    %530 = math.tanh %525 : vector<2x32xf32>
    %531 = arith.mulf %529, %530 : vector<2x32xf32>
    %532 = vector.extract_strided_slice %360 {offsets = [8, 0], sizes = [2, 128], strides = [1, 1]} : vector<16x128xf32> to vector<2x128xf32>
    %533 = arith.truncf %528 : vector<2x32xf32> to vector<2x32xbf16>
    %cst_95 = arith.constant dense<0.000000e+00> : vector<2x128xf32>
    %534 = tpu.matmul %533, %366, %cst_95 {dimension_numbers = #tpu.dot_dimension_numbers<[1], [0], [0], [1], [0, 0, 1, 1], [], []>} : vector<2x32xbf16>, vector<32x128xbf16>, vector<2x128xf32> -> vector<2x128xf32>
    %535 = arith.addf %532, %534 : vector<2x128xf32>
    %536 = vector.extract_strided_slice %365 {offsets = [6, 0], sizes = [2, 128], strides = [1, 1]} : vector<16x128xf32> to vector<2x128xf32>
    %537 = arith.truncf %531 : vector<2x32xf32> to vector<2x32xbf16>
    %cst_96 = arith.constant dense<0.000000e+00> : vector<2x128xf32>
    %538 = tpu.matmul %537, %367, %cst_96 {dimension_numbers = #tpu.dot_dimension_numbers<[1], [0], [0], [1], [0, 0, 1, 1], [], []>} : vector<2x32xbf16>, vector<32x128xbf16>, vector<2x128xf32> -> vector<2x128xf32>
    %539 = arith.addf %536, %538 : vector<2x128xf32>
    %540 = vector.extract_strided_slice %535 {offsets = [0, 0], sizes = [2, 96], strides = [1, 1]} : vector<2x128xf32> to vector<2x96xf32>
    %541 = arith.negf %540 : vector<2x96xf32>
    %542 = math.exp %541 : vector<2x96xf32>
    %cst_97 = arith.constant 1.000000e+00 : f32
    %543 = vector.broadcast %cst_97 : f32 to vector<2x96xf32>
    %544 = arith.addf %543, %542 : vector<2x96xf32>
    %545 = arith.divf %543, %544 : vector<2x96xf32>
    %546 = vector.extract_strided_slice %539 {offsets = [0, 0], sizes = [2, 96], strides = [1, 1]} : vector<2x128xf32> to vector<2x96xf32>
    %547 = arith.negf %546 : vector<2x96xf32>
    %548 = math.exp %547 : vector<2x96xf32>
    %cst_98 = arith.constant 1.000000e+00 : f32
    %549 = vector.broadcast %cst_98 : f32 to vector<2x96xf32>
    %550 = arith.addf %549, %548 : vector<2x96xf32>
    %551 = arith.divf %549, %550 : vector<2x96xf32>
    %552 = vector.extract_strided_slice %535 {offsets = [0, 96], sizes = [2, 32], strides = [1, 1]} : vector<2x128xf32> to vector<2x32xf32>
    %553 = math.tanh %552 : vector<2x32xf32>
    %554 = vector.extract_strided_slice %539 {offsets = [0, 96], sizes = [2, 32], strides = [1, 1]} : vector<2x128xf32> to vector<2x32xf32>
    %555 = math.tanh %554 : vector<2x32xf32>
    %556 = vector.extract_strided_slice %545 {offsets = [0, 32], sizes = [2, 32], strides = [1, 1]} : vector<2x96xf32> to vector<2x32xf32>
    %557 = arith.mulf %556, %520 : vector<2x32xf32>
    %558 = vector.extract_strided_slice %545 {offsets = [0, 0], sizes = [2, 32], strides = [1, 1]} : vector<2x96xf32> to vector<2x32xf32>
    %559 = arith.mulf %558, %553 : vector<2x32xf32>
    %560 = arith.addf %557, %559 : vector<2x32xf32>
    %561 = vector.extract_strided_slice %551 {offsets = [0, 32], sizes = [2, 32], strides = [1, 1]} : vector<2x96xf32> to vector<2x32xf32>
    %562 = arith.mulf %561, %525 : vector<2x32xf32>
    %563 = vector.extract_strided_slice %551 {offsets = [0, 0], sizes = [2, 32], strides = [1, 1]} : vector<2x96xf32> to vector<2x32xf32>
    %564 = arith.mulf %563, %555 : vector<2x32xf32>
    %565 = arith.addf %562, %564 : vector<2x32xf32>
    %566 = vector.extract_strided_slice %545 {offsets = [0, 64], sizes = [2, 32], strides = [1, 1]} : vector<2x96xf32> to vector<2x32xf32>
    %567 = math.tanh %560 : vector<2x32xf32>
    %568 = arith.mulf %566, %567 : vector<2x32xf32>
    %569 = vector.extract_strided_slice %551 {offsets = [0, 64], sizes = [2, 32], strides = [1, 1]} : vector<2x96xf32> to vector<2x32xf32>
    %570 = math.tanh %565 : vector<2x32xf32>
    %571 = arith.mulf %569, %570 : vector<2x32xf32>
    %572 = vector.extract_strided_slice %360 {offsets = [10, 0], sizes = [2, 128], strides = [1, 1]} : vector<16x128xf32> to vector<2x128xf32>
    %573 = arith.truncf %568 : vector<2x32xf32> to vector<2x32xbf16>
    %cst_99 = arith.constant dense<0.000000e+00> : vector<2x128xf32>
    %574 = tpu.matmul %573, %366, %cst_99 {dimension_numbers = #tpu.dot_dimension_numbers<[1], [0], [0], [1], [0, 0, 1, 1], [], []>} : vector<2x32xbf16>, vector<32x128xbf16>, vector<2x128xf32> -> vector<2x128xf32>
    %575 = arith.addf %572, %574 : vector<2x128xf32>
    %576 = vector.extract_strided_slice %365 {offsets = [4, 0], sizes = [2, 128], strides = [1, 1]} : vector<16x128xf32> to vector<2x128xf32>
    %577 = arith.truncf %571 : vector<2x32xf32> to vector<2x32xbf16>
    %cst_100 = arith.constant dense<0.000000e+00> : vector<2x128xf32>
    %578 = tpu.matmul %577, %367, %cst_100 {dimension_numbers = #tpu.dot_dimension_numbers<[1], [0], [0], [1], [0, 0, 1, 1], [], []>} : vector<2x32xbf16>, vector<32x128xbf16>, vector<2x128xf32> -> vector<2x128xf32>
    %579 = arith.addf %576, %578 : vector<2x128xf32>
    %580 = vector.extract_strided_slice %575 {offsets = [0, 0], sizes = [2, 96], strides = [1, 1]} : vector<2x128xf32> to vector<2x96xf32>
    %581 = arith.negf %580 : vector<2x96xf32>
    %582 = math.exp %581 : vector<2x96xf32>
    %cst_101 = arith.constant 1.000000e+00 : f32
    %583 = vector.broadcast %cst_101 : f32 to vector<2x96xf32>
    %584 = arith.addf %583, %582 : vector<2x96xf32>
    %585 = arith.divf %583, %584 : vector<2x96xf32>
    %586 = vector.extract_strided_slice %579 {offsets = [0, 0], sizes = [2, 96], strides = [1, 1]} : vector<2x128xf32> to vector<2x96xf32>
    %587 = arith.negf %586 : vector<2x96xf32>
    %588 = math.exp %587 : vector<2x96xf32>
    %cst_102 = arith.constant 1.000000e+00 : f32
    %589 = vector.broadcast %cst_102 : f32 to vector<2x96xf32>
    %590 = arith.addf %589, %588 : vector<2x96xf32>
    %591 = arith.divf %589, %590 : vector<2x96xf32>
    %592 = vector.extract_strided_slice %575 {offsets = [0, 96], sizes = [2, 32], strides = [1, 1]} : vector<2x128xf32> to vector<2x32xf32>
    %593 = math.tanh %592 : vector<2x32xf32>
    %594 = vector.extract_strided_slice %579 {offsets = [0, 96], sizes = [2, 32], strides = [1, 1]} : vector<2x128xf32> to vector<2x32xf32>
    %595 = math.tanh %594 : vector<2x32xf32>
    %596 = vector.extract_strided_slice %585 {offsets = [0, 32], sizes = [2, 32], strides = [1, 1]} : vector<2x96xf32> to vector<2x32xf32>
    %597 = arith.mulf %596, %560 : vector<2x32xf32>
    %598 = vector.extract_strided_slice %585 {offsets = [0, 0], sizes = [2, 32], strides = [1, 1]} : vector<2x96xf32> to vector<2x32xf32>
    %599 = arith.mulf %598, %593 : vector<2x32xf32>
    %600 = arith.addf %597, %599 : vector<2x32xf32>
    %601 = vector.extract_strided_slice %591 {offsets = [0, 32], sizes = [2, 32], strides = [1, 1]} : vector<2x96xf32> to vector<2x32xf32>
    %602 = arith.mulf %601, %565 : vector<2x32xf32>
    %603 = vector.extract_strided_slice %591 {offsets = [0, 0], sizes = [2, 32], strides = [1, 1]} : vector<2x96xf32> to vector<2x32xf32>
    %604 = arith.mulf %603, %595 : vector<2x32xf32>
    %605 = arith.addf %602, %604 : vector<2x32xf32>
    %606 = vector.extract_strided_slice %585 {offsets = [0, 64], sizes = [2, 32], strides = [1, 1]} : vector<2x96xf32> to vector<2x32xf32>
    %607 = math.tanh %600 : vector<2x32xf32>
    %608 = arith.mulf %606, %607 : vector<2x32xf32>
    %609 = vector.extract_strided_slice %591 {offsets = [0, 64], sizes = [2, 32], strides = [1, 1]} : vector<2x96xf32> to vector<2x32xf32>
    %610 = math.tanh %605 : vector<2x32xf32>
    %611 = arith.mulf %609, %610 : vector<2x32xf32>
    %612 = vector.extract_strided_slice %360 {offsets = [12, 0], sizes = [2, 128], strides = [1, 1]} : vector<16x128xf32> to vector<2x128xf32>
    %613 = arith.truncf %608 : vector<2x32xf32> to vector<2x32xbf16>
    %cst_103 = arith.constant dense<0.000000e+00> : vector<2x128xf32>
    %614 = tpu.matmul %613, %366, %cst_103 {dimension_numbers = #tpu.dot_dimension_numbers<[1], [0], [0], [1], [0, 0, 1, 1], [], []>} : vector<2x32xbf16>, vector<32x128xbf16>, vector<2x128xf32> -> vector<2x128xf32>
    %615 = arith.addf %612, %614 : vector<2x128xf32>
    %616 = vector.extract_strided_slice %365 {offsets = [2, 0], sizes = [2, 128], strides = [1, 1]} : vector<16x128xf32> to vector<2x128xf32>
    %617 = arith.truncf %611 : vector<2x32xf32> to vector<2x32xbf16>
    %cst_104 = arith.constant dense<0.000000e+00> : vector<2x128xf32>
    %618 = tpu.matmul %617, %367, %cst_104 {dimension_numbers = #tpu.dot_dimension_numbers<[1], [0], [0], [1], [0, 0, 1, 1], [], []>} : vector<2x32xbf16>, vector<32x128xbf16>, vector<2x128xf32> -> vector<2x128xf32>
    %619 = arith.addf %616, %618 : vector<2x128xf32>
    %620 = vector.extract_strided_slice %615 {offsets = [0, 0], sizes = [2, 96], strides = [1, 1]} : vector<2x128xf32> to vector<2x96xf32>
    %621 = arith.negf %620 : vector<2x96xf32>
    %622 = math.exp %621 : vector<2x96xf32>
    %cst_105 = arith.constant 1.000000e+00 : f32
    %623 = vector.broadcast %cst_105 : f32 to vector<2x96xf32>
    %624 = arith.addf %623, %622 : vector<2x96xf32>
    %625 = arith.divf %623, %624 : vector<2x96xf32>
    %626 = vector.extract_strided_slice %619 {offsets = [0, 0], sizes = [2, 96], strides = [1, 1]} : vector<2x128xf32> to vector<2x96xf32>
    %627 = arith.negf %626 : vector<2x96xf32>
    %628 = math.exp %627 : vector<2x96xf32>
    %cst_106 = arith.constant 1.000000e+00 : f32
    %629 = vector.broadcast %cst_106 : f32 to vector<2x96xf32>
    %630 = arith.addf %629, %628 : vector<2x96xf32>
    %631 = arith.divf %629, %630 : vector<2x96xf32>
    %632 = vector.extract_strided_slice %615 {offsets = [0, 96], sizes = [2, 32], strides = [1, 1]} : vector<2x128xf32> to vector<2x32xf32>
    %633 = math.tanh %632 : vector<2x32xf32>
    %634 = vector.extract_strided_slice %619 {offsets = [0, 96], sizes = [2, 32], strides = [1, 1]} : vector<2x128xf32> to vector<2x32xf32>
    %635 = math.tanh %634 : vector<2x32xf32>
    %636 = vector.extract_strided_slice %625 {offsets = [0, 32], sizes = [2, 32], strides = [1, 1]} : vector<2x96xf32> to vector<2x32xf32>
    %637 = arith.mulf %636, %600 : vector<2x32xf32>
    %638 = vector.extract_strided_slice %625 {offsets = [0, 0], sizes = [2, 32], strides = [1, 1]} : vector<2x96xf32> to vector<2x32xf32>
    %639 = arith.mulf %638, %633 : vector<2x32xf32>
    %640 = arith.addf %637, %639 : vector<2x32xf32>
    %641 = vector.extract_strided_slice %631 {offsets = [0, 32], sizes = [2, 32], strides = [1, 1]} : vector<2x96xf32> to vector<2x32xf32>
    %642 = arith.mulf %641, %605 : vector<2x32xf32>
    %643 = vector.extract_strided_slice %631 {offsets = [0, 0], sizes = [2, 32], strides = [1, 1]} : vector<2x96xf32> to vector<2x32xf32>
    %644 = arith.mulf %643, %635 : vector<2x32xf32>
    %645 = arith.addf %642, %644 : vector<2x32xf32>
    %646 = vector.extract_strided_slice %625 {offsets = [0, 64], sizes = [2, 32], strides = [1, 1]} : vector<2x96xf32> to vector<2x32xf32>
    %647 = math.tanh %640 : vector<2x32xf32>
    %648 = arith.mulf %646, %647 : vector<2x32xf32>
    %649 = vector.extract_strided_slice %631 {offsets = [0, 64], sizes = [2, 32], strides = [1, 1]} : vector<2x96xf32> to vector<2x32xf32>
    %650 = math.tanh %645 : vector<2x32xf32>
    %651 = arith.mulf %649, %650 : vector<2x32xf32>
    %652 = vector.extract_strided_slice %360 {offsets = [14, 0], sizes = [2, 128], strides = [1, 1]} : vector<16x128xf32> to vector<2x128xf32>
    %653 = arith.truncf %648 : vector<2x32xf32> to vector<2x32xbf16>
    %cst_107 = arith.constant dense<0.000000e+00> : vector<2x128xf32>
    %654 = tpu.matmul %653, %366, %cst_107 {dimension_numbers = #tpu.dot_dimension_numbers<[1], [0], [0], [1], [0, 0, 1, 1], [], []>} : vector<2x32xbf16>, vector<32x128xbf16>, vector<2x128xf32> -> vector<2x128xf32>
    %655 = arith.addf %652, %654 : vector<2x128xf32>
    %656 = vector.extract_strided_slice %365 {offsets = [0, 0], sizes = [2, 128], strides = [1, 1]} : vector<16x128xf32> to vector<2x128xf32>
    %657 = arith.truncf %651 : vector<2x32xf32> to vector<2x32xbf16>
    %cst_108 = arith.constant dense<0.000000e+00> : vector<2x128xf32>
    %658 = tpu.matmul %657, %367, %cst_108 {dimension_numbers = #tpu.dot_dimension_numbers<[1], [0], [0], [1], [0, 0, 1, 1], [], []>} : vector<2x32xbf16>, vector<32x128xbf16>, vector<2x128xf32> -> vector<2x128xf32>
    %659 = arith.addf %656, %658 : vector<2x128xf32>
    %660 = vector.extract_strided_slice %655 {offsets = [0, 0], sizes = [2, 96], strides = [1, 1]} : vector<2x128xf32> to vector<2x96xf32>
    %661 = arith.negf %660 : vector<2x96xf32>
    %662 = math.exp %661 : vector<2x96xf32>
    %cst_109 = arith.constant 1.000000e+00 : f32
    %663 = vector.broadcast %cst_109 : f32 to vector<2x96xf32>
    %664 = arith.addf %663, %662 : vector<2x96xf32>
    %665 = arith.divf %663, %664 : vector<2x96xf32>
    %666 = vector.extract_strided_slice %659 {offsets = [0, 0], sizes = [2, 96], strides = [1, 1]} : vector<2x128xf32> to vector<2x96xf32>
    %667 = arith.negf %666 : vector<2x96xf32>
    %668 = math.exp %667 : vector<2x96xf32>
    %cst_110 = arith.constant 1.000000e+00 : f32
    %669 = vector.broadcast %cst_110 : f32 to vector<2x96xf32>
    %670 = arith.addf %669, %668 : vector<2x96xf32>
    %671 = arith.divf %669, %670 : vector<2x96xf32>
    %672 = vector.extract_strided_slice %655 {offsets = [0, 96], sizes = [2, 32], strides = [1, 1]} : vector<2x128xf32> to vector<2x32xf32>
    %673 = math.tanh %672 : vector<2x32xf32>
    %674 = vector.extract_strided_slice %659 {offsets = [0, 96], sizes = [2, 32], strides = [1, 1]} : vector<2x128xf32> to vector<2x32xf32>
    %675 = math.tanh %674 : vector<2x32xf32>
    %676 = vector.extract_strided_slice %665 {offsets = [0, 32], sizes = [2, 32], strides = [1, 1]} : vector<2x96xf32> to vector<2x32xf32>
    %677 = arith.mulf %676, %640 : vector<2x32xf32>
    %678 = vector.extract_strided_slice %665 {offsets = [0, 0], sizes = [2, 32], strides = [1, 1]} : vector<2x96xf32> to vector<2x32xf32>
    %679 = arith.mulf %678, %673 : vector<2x32xf32>
    %680 = arith.addf %677, %679 : vector<2x32xf32>
    %681 = vector.extract_strided_slice %671 {offsets = [0, 32], sizes = [2, 32], strides = [1, 1]} : vector<2x96xf32> to vector<2x32xf32>
    %682 = arith.mulf %681, %645 : vector<2x32xf32>
    %683 = vector.extract_strided_slice %671 {offsets = [0, 0], sizes = [2, 32], strides = [1, 1]} : vector<2x96xf32> to vector<2x32xf32>
    %684 = arith.mulf %683, %675 : vector<2x32xf32>
    %685 = arith.addf %682, %684 : vector<2x32xf32>
    %686 = vector.extract_strided_slice %665 {offsets = [0, 64], sizes = [2, 32], strides = [1, 1]} : vector<2x96xf32> to vector<2x32xf32>
    %687 = math.tanh %680 : vector<2x32xf32>
    %688 = arith.mulf %686, %687 : vector<2x32xf32>
    %689 = vector.extract_strided_slice %671 {offsets = [0, 64], sizes = [2, 32], strides = [1, 1]} : vector<2x96xf32> to vector<2x32xf32>
    %690 = math.tanh %685 : vector<2x32xf32>
    %691 = arith.mulf %689, %690 : vector<2x32xf32>
    %692 = arith.addf %408, %691 : vector<2x32xf32>
    %693 = arith.addf %448, %651 : vector<2x32xf32>
    %694 = arith.addf %488, %611 : vector<2x32xf32>
    %695 = arith.addf %528, %571 : vector<2x32xf32>
    %696 = arith.addf %568, %531 : vector<2x32xf32>
    %697 = arith.addf %608, %491 : vector<2x32xf32>
    %698 = arith.addf %648, %451 : vector<2x32xf32>
    %699 = arith.addf %688, %411 : vector<2x32xf32>
    %cst_111 = arith.constant 0.000000e+00 : f32
    %700 = vector.broadcast %cst_111 : f32 to vector<2x128xf32>
    %c0_112 = arith.constant 0 : index
    %c0_113 = arith.constant 0 : index
    %701 = vector.load %arg16[%c0_112, %c0_113] : memref<1x256xf32, #tpu.memory_space<vmem>>, vector<1x32xf32>
    %702 = vector.broadcast %701 : vector<1x32xf32> to vector<2x32xf32>
    %703 = arith.subf %692, %702 : vector<2x32xf32>
    %c0_114 = arith.constant 0 : index
    %c0_115 = arith.constant 0 : index
    %704 = vector.load %arg17[%c0_114, %c0_115] : memref<1x256xf32, #tpu.memory_space<vmem>>, vector<1x32xf32>
    %cst_116 = arith.constant 9.99999974E-6 : f32
    %705 = vector.broadcast %cst_116 : f32 to vector<1x32xf32>
    %706 = arith.addf %704, %705 : vector<1x32xf32>
    %707 = math.rsqrt %706 : vector<1x32xf32>
    %708 = vector.broadcast %707 : vector<1x32xf32> to vector<2x32xf32>
    %709 = arith.mulf %703, %708 : vector<2x32xf32>
    %c0_117 = arith.constant 0 : index
    %c0_118 = arith.constant 0 : index
    %710 = vector.load %arg14[%c0_117, %c0_118] : memref<1x256xf32, #tpu.memory_space<vmem>>, vector<1x32xf32>
    %711 = vector.broadcast %710 : vector<1x32xf32> to vector<2x32xf32>
    %712 = arith.mulf %709, %711 : vector<2x32xf32>
    %c0_119 = arith.constant 0 : index
    %c0_120 = arith.constant 0 : index
    %713 = vector.load %arg15[%c0_119, %c0_120] : memref<1x256xf32, #tpu.memory_space<vmem>>, vector<1x32xf32>
    %714 = vector.broadcast %713 : vector<1x32xf32> to vector<2x32xf32>
    %715 = arith.addf %712, %714 : vector<2x32xf32>
    %716 = arith.truncf %715 : vector<2x32xf32> to vector<2x32xbf16>
    %c0_121 = arith.constant 0 : index
    %c0_122 = arith.constant 0 : index
    %717 = vector.load %arg18[%c0_121, %c0_122] : memref<256x128xbf16, #tpu.memory_space<vmem>>, vector<32x128xbf16>
    %cst_123 = arith.constant dense<0.000000e+00> : vector<2x128xf32>
    %718 = tpu.matmul %716, %717, %cst_123 {dimension_numbers = #tpu.dot_dimension_numbers<[1], [0], [0], [1], [0, 0, 1, 1], [], []>} : vector<2x32xbf16>, vector<32x128xbf16>, vector<2x128xf32> -> vector<2x128xf32>
    %719 = arith.addf %700, %718 : vector<2x128xf32>
    %c0_124 = arith.constant 0 : index
    %c32 = arith.constant 32 : index
    %720 = vector.load %arg16[%c0_124, %c32] : memref<1x256xf32, #tpu.memory_space<vmem>>, vector<1x32xf32>
    %721 = vector.broadcast %720 : vector<1x32xf32> to vector<2x32xf32>
    %722 = arith.subf %693, %721 : vector<2x32xf32>
    %c0_125 = arith.constant 0 : index
    %c32_126 = arith.constant 32 : index
    %723 = vector.load %arg17[%c0_125, %c32_126] : memref<1x256xf32, #tpu.memory_space<vmem>>, vector<1x32xf32>
    %cst_127 = arith.constant 9.99999974E-6 : f32
    %724 = vector.broadcast %cst_127 : f32 to vector<1x32xf32>
    %725 = arith.addf %723, %724 : vector<1x32xf32>
    %726 = math.rsqrt %725 : vector<1x32xf32>
    %727 = vector.broadcast %726 : vector<1x32xf32> to vector<2x32xf32>
    %728 = arith.mulf %722, %727 : vector<2x32xf32>
    %c0_128 = arith.constant 0 : index
    %c32_129 = arith.constant 32 : index
    %729 = vector.load %arg14[%c0_128, %c32_129] : memref<1x256xf32, #tpu.memory_space<vmem>>, vector<1x32xf32>
    %730 = vector.broadcast %729 : vector<1x32xf32> to vector<2x32xf32>
    %731 = arith.mulf %728, %730 : vector<2x32xf32>
    %c0_130 = arith.constant 0 : index
    %c32_131 = arith.constant 32 : index
    %732 = vector.load %arg15[%c0_130, %c32_131] : memref<1x256xf32, #tpu.memory_space<vmem>>, vector<1x32xf32>
    %733 = vector.broadcast %732 : vector<1x32xf32> to vector<2x32xf32>
    %734 = arith.addf %731, %733 : vector<2x32xf32>
    %735 = arith.truncf %734 : vector<2x32xf32> to vector<2x32xbf16>
    %c32_132 = arith.constant 32 : index
    %c0_133 = arith.constant 0 : index
    %736 = vector.load %arg18[%c32_132, %c0_133] : memref<256x128xbf16, #tpu.memory_space<vmem>>, vector<32x128xbf16>
    %cst_134 = arith.constant dense<0.000000e+00> : vector<2x128xf32>
    %737 = tpu.matmul %735, %736, %cst_134 {dimension_numbers = #tpu.dot_dimension_numbers<[1], [0], [0], [1], [0, 0, 1, 1], [], []>} : vector<2x32xbf16>, vector<32x128xbf16>, vector<2x128xf32> -> vector<2x128xf32>
    %738 = arith.addf %719, %737 : vector<2x128xf32>
    %c0_135 = arith.constant 0 : index
    %c64 = arith.constant 64 : index
    %739 = vector.load %arg16[%c0_135, %c64] : memref<1x256xf32, #tpu.memory_space<vmem>>, vector<1x32xf32>
    %740 = vector.broadcast %739 : vector<1x32xf32> to vector<2x32xf32>
    %741 = arith.subf %694, %740 : vector<2x32xf32>
    %c0_136 = arith.constant 0 : index
    %c64_137 = arith.constant 64 : index
    %742 = vector.load %arg17[%c0_136, %c64_137] : memref<1x256xf32, #tpu.memory_space<vmem>>, vector<1x32xf32>
    %cst_138 = arith.constant 9.99999974E-6 : f32
    %743 = vector.broadcast %cst_138 : f32 to vector<1x32xf32>
    %744 = arith.addf %742, %743 : vector<1x32xf32>
    %745 = math.rsqrt %744 : vector<1x32xf32>
    %746 = vector.broadcast %745 : vector<1x32xf32> to vector<2x32xf32>
    %747 = arith.mulf %741, %746 : vector<2x32xf32>
    %c0_139 = arith.constant 0 : index
    %c64_140 = arith.constant 64 : index
    %748 = vector.load %arg14[%c0_139, %c64_140] : memref<1x256xf32, #tpu.memory_space<vmem>>, vector<1x32xf32>
    %749 = vector.broadcast %748 : vector<1x32xf32> to vector<2x32xf32>
    %750 = arith.mulf %747, %749 : vector<2x32xf32>
    %c0_141 = arith.constant 0 : index
    %c64_142 = arith.constant 64 : index
    %751 = vector.load %arg15[%c0_141, %c64_142] : memref<1x256xf32, #tpu.memory_space<vmem>>, vector<1x32xf32>
    %752 = vector.broadcast %751 : vector<1x32xf32> to vector<2x32xf32>
    %753 = arith.addf %750, %752 : vector<2x32xf32>
    %754 = arith.truncf %753 : vector<2x32xf32> to vector<2x32xbf16>
    %c64_143 = arith.constant 64 : index
    %c0_144 = arith.constant 0 : index
    %755 = vector.load %arg18[%c64_143, %c0_144] : memref<256x128xbf16, #tpu.memory_space<vmem>>, vector<32x128xbf16>
    %cst_145 = arith.constant dense<0.000000e+00> : vector<2x128xf32>
    %756 = tpu.matmul %754, %755, %cst_145 {dimension_numbers = #tpu.dot_dimension_numbers<[1], [0], [0], [1], [0, 0, 1, 1], [], []>} : vector<2x32xbf16>, vector<32x128xbf16>, vector<2x128xf32> -> vector<2x128xf32>
    %757 = arith.addf %738, %756 : vector<2x128xf32>
    %c0_146 = arith.constant 0 : index
    %c96 = arith.constant 96 : index
    %758 = vector.load %arg16[%c0_146, %c96] : memref<1x256xf32, #tpu.memory_space<vmem>>, vector<1x32xf32>
    %759 = vector.broadcast %758 : vector<1x32xf32> to vector<2x32xf32>
    %760 = arith.subf %695, %759 : vector<2x32xf32>
    %c0_147 = arith.constant 0 : index
    %c96_148 = arith.constant 96 : index
    %761 = vector.load %arg17[%c0_147, %c96_148] : memref<1x256xf32, #tpu.memory_space<vmem>>, vector<1x32xf32>
    %cst_149 = arith.constant 9.99999974E-6 : f32
    %762 = vector.broadcast %cst_149 : f32 to vector<1x32xf32>
    %763 = arith.addf %761, %762 : vector<1x32xf32>
    %764 = math.rsqrt %763 : vector<1x32xf32>
    %765 = vector.broadcast %764 : vector<1x32xf32> to vector<2x32xf32>
    %766 = arith.mulf %760, %765 : vector<2x32xf32>
    %c0_150 = arith.constant 0 : index
    %c96_151 = arith.constant 96 : index
    %767 = vector.load %arg14[%c0_150, %c96_151] : memref<1x256xf32, #tpu.memory_space<vmem>>, vector<1x32xf32>
    %768 = vector.broadcast %767 : vector<1x32xf32> to vector<2x32xf32>
    %769 = arith.mulf %766, %768 : vector<2x32xf32>
    %c0_152 = arith.constant 0 : index
    %c96_153 = arith.constant 96 : index
    %770 = vector.load %arg15[%c0_152, %c96_153] : memref<1x256xf32, #tpu.memory_space<vmem>>, vector<1x32xf32>
    %771 = vector.broadcast %770 : vector<1x32xf32> to vector<2x32xf32>
    %772 = arith.addf %769, %771 : vector<2x32xf32>
    %773 = arith.truncf %772 : vector<2x32xf32> to vector<2x32xbf16>
    %c96_154 = arith.constant 96 : index
    %c0_155 = arith.constant 0 : index
    %774 = vector.load %arg18[%c96_154, %c0_155] : memref<256x128xbf16, #tpu.memory_space<vmem>>, vector<32x128xbf16>
    %cst_156 = arith.constant dense<0.000000e+00> : vector<2x128xf32>
    %775 = tpu.matmul %773, %774, %cst_156 {dimension_numbers = #tpu.dot_dimension_numbers<[1], [0], [0], [1], [0, 0, 1, 1], [], []>} : vector<2x32xbf16>, vector<32x128xbf16>, vector<2x128xf32> -> vector<2x128xf32>
    %776 = arith.addf %757, %775 : vector<2x128xf32>
    %c0_157 = arith.constant 0 : index
    %c128 = arith.constant 128 : index
    %777 = vector.load %arg16[%c0_157, %c128] : memref<1x256xf32, #tpu.memory_space<vmem>>, vector<1x32xf32>
    %778 = vector.broadcast %777 : vector<1x32xf32> to vector<2x32xf32>
    %779 = arith.subf %696, %778 : vector<2x32xf32>
    %c0_158 = arith.constant 0 : index
    %c128_159 = arith.constant 128 : index
    %780 = vector.load %arg17[%c0_158, %c128_159] : memref<1x256xf32, #tpu.memory_space<vmem>>, vector<1x32xf32>
    %cst_160 = arith.constant 9.99999974E-6 : f32
    %781 = vector.broadcast %cst_160 : f32 to vector<1x32xf32>
    %782 = arith.addf %780, %781 : vector<1x32xf32>
    %783 = math.rsqrt %782 : vector<1x32xf32>
    %784 = vector.broadcast %783 : vector<1x32xf32> to vector<2x32xf32>
    %785 = arith.mulf %779, %784 : vector<2x32xf32>
    %c0_161 = arith.constant 0 : index
    %c128_162 = arith.constant 128 : index
    %786 = vector.load %arg14[%c0_161, %c128_162] : memref<1x256xf32, #tpu.memory_space<vmem>>, vector<1x32xf32>
    %787 = vector.broadcast %786 : vector<1x32xf32> to vector<2x32xf32>
    %788 = arith.mulf %785, %787 : vector<2x32xf32>
    %c0_163 = arith.constant 0 : index
    %c128_164 = arith.constant 128 : index
    %789 = vector.load %arg15[%c0_163, %c128_164] : memref<1x256xf32, #tpu.memory_space<vmem>>, vector<1x32xf32>
    %790 = vector.broadcast %789 : vector<1x32xf32> to vector<2x32xf32>
    %791 = arith.addf %788, %790 : vector<2x32xf32>
    %792 = arith.truncf %791 : vector<2x32xf32> to vector<2x32xbf16>
    %c128_165 = arith.constant 128 : index
    %c0_166 = arith.constant 0 : index
    %793 = vector.load %arg18[%c128_165, %c0_166] : memref<256x128xbf16, #tpu.memory_space<vmem>>, vector<32x128xbf16>
    %cst_167 = arith.constant dense<0.000000e+00> : vector<2x128xf32>
    %794 = tpu.matmul %792, %793, %cst_167 {dimension_numbers = #tpu.dot_dimension_numbers<[1], [0], [0], [1], [0, 0, 1, 1], [], []>} : vector<2x32xbf16>, vector<32x128xbf16>, vector<2x128xf32> -> vector<2x128xf32>
    %795 = arith.addf %776, %794 : vector<2x128xf32>
    %c0_168 = arith.constant 0 : index
    %c160 = arith.constant 160 : index
    %796 = vector.load %arg16[%c0_168, %c160] : memref<1x256xf32, #tpu.memory_space<vmem>>, vector<1x32xf32>
    %797 = vector.broadcast %796 : vector<1x32xf32> to vector<2x32xf32>
    %798 = arith.subf %697, %797 : vector<2x32xf32>
    %c0_169 = arith.constant 0 : index
    %c160_170 = arith.constant 160 : index
    %799 = vector.load %arg17[%c0_169, %c160_170] : memref<1x256xf32, #tpu.memory_space<vmem>>, vector<1x32xf32>
    %cst_171 = arith.constant 9.99999974E-6 : f32
    %800 = vector.broadcast %cst_171 : f32 to vector<1x32xf32>
    %801 = arith.addf %799, %800 : vector<1x32xf32>
    %802 = math.rsqrt %801 : vector<1x32xf32>
    %803 = vector.broadcast %802 : vector<1x32xf32> to vector<2x32xf32>
    %804 = arith.mulf %798, %803 : vector<2x32xf32>
    %c0_172 = arith.constant 0 : index
    %c160_173 = arith.constant 160 : index
    %805 = vector.load %arg14[%c0_172, %c160_173] : memref<1x256xf32, #tpu.memory_space<vmem>>, vector<1x32xf32>
    %806 = vector.broadcast %805 : vector<1x32xf32> to vector<2x32xf32>
    %807 = arith.mulf %804, %806 : vector<2x32xf32>
    %c0_174 = arith.constant 0 : index
    %c160_175 = arith.constant 160 : index
    %808 = vector.load %arg15[%c0_174, %c160_175] : memref<1x256xf32, #tpu.memory_space<vmem>>, vector<1x32xf32>
    %809 = vector.broadcast %808 : vector<1x32xf32> to vector<2x32xf32>
    %810 = arith.addf %807, %809 : vector<2x32xf32>
    %811 = arith.truncf %810 : vector<2x32xf32> to vector<2x32xbf16>
    %c160_176 = arith.constant 160 : index
    %c0_177 = arith.constant 0 : index
    %812 = vector.load %arg18[%c160_176, %c0_177] : memref<256x128xbf16, #tpu.memory_space<vmem>>, vector<32x128xbf16>
    %cst_178 = arith.constant dense<0.000000e+00> : vector<2x128xf32>
    %813 = tpu.matmul %811, %812, %cst_178 {dimension_numbers = #tpu.dot_dimension_numbers<[1], [0], [0], [1], [0, 0, 1, 1], [], []>} : vector<2x32xbf16>, vector<32x128xbf16>, vector<2x128xf32> -> vector<2x128xf32>
    %814 = arith.addf %795, %813 : vector<2x128xf32>
    %c0_179 = arith.constant 0 : index
    %c192 = arith.constant 192 : index
    %815 = vector.load %arg16[%c0_179, %c192] : memref<1x256xf32, #tpu.memory_space<vmem>>, vector<1x32xf32>
    %816 = vector.broadcast %815 : vector<1x32xf32> to vector<2x32xf32>
    %817 = arith.subf %698, %816 : vector<2x32xf32>
    %c0_180 = arith.constant 0 : index
    %c192_181 = arith.constant 192 : index
    %818 = vector.load %arg17[%c0_180, %c192_181] : memref<1x256xf32, #tpu.memory_space<vmem>>, vector<1x32xf32>
    %cst_182 = arith.constant 9.99999974E-6 : f32
    %819 = vector.broadcast %cst_182 : f32 to vector<1x32xf32>
    %820 = arith.addf %818, %819 : vector<1x32xf32>
    %821 = math.rsqrt %820 : vector<1x32xf32>
    %822 = vector.broadcast %821 : vector<1x32xf32> to vector<2x32xf32>
    %823 = arith.mulf %817, %822 : vector<2x32xf32>
    %c0_183 = arith.constant 0 : index
    %c192_184 = arith.constant 192 : index
    %824 = vector.load %arg14[%c0_183, %c192_184] : memref<1x256xf32, #tpu.memory_space<vmem>>, vector<1x32xf32>
    %825 = vector.broadcast %824 : vector<1x32xf32> to vector<2x32xf32>
    %826 = arith.mulf %823, %825 : vector<2x32xf32>
    %c0_185 = arith.constant 0 : index
    %c192_186 = arith.constant 192 : index
    %827 = vector.load %arg15[%c0_185, %c192_186] : memref<1x256xf32, #tpu.memory_space<vmem>>, vector<1x32xf32>
    %828 = vector.broadcast %827 : vector<1x32xf32> to vector<2x32xf32>
    %829 = arith.addf %826, %828 : vector<2x32xf32>
    %830 = arith.truncf %829 : vector<2x32xf32> to vector<2x32xbf16>
    %c192_187 = arith.constant 192 : index
    %c0_188 = arith.constant 0 : index
    %831 = vector.load %arg18[%c192_187, %c0_188] : memref<256x128xbf16, #tpu.memory_space<vmem>>, vector<32x128xbf16>
    %cst_189 = arith.constant dense<0.000000e+00> : vector<2x128xf32>
    %832 = tpu.matmul %830, %831, %cst_189 {dimension_numbers = #tpu.dot_dimension_numbers<[1], [0], [0], [1], [0, 0, 1, 1], [], []>} : vector<2x32xbf16>, vector<32x128xbf16>, vector<2x128xf32> -> vector<2x128xf32>
    %833 = arith.addf %814, %832 : vector<2x128xf32>
    %c0_190 = arith.constant 0 : index
    %c224 = arith.constant 224 : index
    %834 = vector.load %arg16[%c0_190, %c224] : memref<1x256xf32, #tpu.memory_space<vmem>>, vector<1x32xf32>
    %835 = vector.broadcast %834 : vector<1x32xf32> to vector<2x32xf32>
    %836 = arith.subf %699, %835 : vector<2x32xf32>
    %c0_191 = arith.constant 0 : index
    %c224_192 = arith.constant 224 : index
    %837 = vector.load %arg17[%c0_191, %c224_192] : memref<1x256xf32, #tpu.memory_space<vmem>>, vector<1x32xf32>
    %cst_193 = arith.constant 9.99999974E-6 : f32
    %838 = vector.broadcast %cst_193 : f32 to vector<1x32xf32>
    %839 = arith.addf %837, %838 : vector<1x32xf32>
    %840 = math.rsqrt %839 : vector<1x32xf32>
    %841 = vector.broadcast %840 : vector<1x32xf32> to vector<2x32xf32>
    %842 = arith.mulf %836, %841 : vector<2x32xf32>
    %c0_194 = arith.constant 0 : index
    %c224_195 = arith.constant 224 : index
    %843 = vector.load %arg14[%c0_194, %c224_195] : memref<1x256xf32, #tpu.memory_space<vmem>>, vector<1x32xf32>
    %844 = vector.broadcast %843 : vector<1x32xf32> to vector<2x32xf32>
    %845 = arith.mulf %842, %844 : vector<2x32xf32>
    %c0_196 = arith.constant 0 : index
    %c224_197 = arith.constant 224 : index
    %846 = vector.load %arg15[%c0_196, %c224_197] : memref<1x256xf32, #tpu.memory_space<vmem>>, vector<1x32xf32>
    %847 = vector.broadcast %846 : vector<1x32xf32> to vector<2x32xf32>
    %848 = arith.addf %845, %847 : vector<2x32xf32>
    %849 = arith.truncf %848 : vector<2x32xf32> to vector<2x32xbf16>
    %c224_198 = arith.constant 224 : index
    %c0_199 = arith.constant 0 : index
    %850 = vector.load %arg18[%c224_198, %c0_199] : memref<256x128xbf16, #tpu.memory_space<vmem>>, vector<32x128xbf16>
    %cst_200 = arith.constant dense<0.000000e+00> : vector<2x128xf32>
    %851 = tpu.matmul %849, %850, %cst_200 {dimension_numbers = #tpu.dot_dimension_numbers<[1], [0], [0], [1], [0, 0, 1, 1], [], []>} : vector<2x32xbf16>, vector<32x128xbf16>, vector<2x128xf32> -> vector<2x128xf32>
    %852 = arith.addf %833, %851 : vector<2x128xf32>
    %853 = tpu.iota {dimensions = array<i32: 1>} : vector<2x128xi32>
    %c10_i32 = arith.constant 10 : i32
    %854 = vector.broadcast %c10_i32 : i32 to vector<2x128xi32>
    %855 = arith.cmpi slt, %853, %854 : vector<2x128xi32>
    %cst_201 = arith.constant -1.000000e+30 : f32
    %856 = vector.broadcast %cst_201 : f32 to vector<2x128xf32>
    %857 = arith.select %855, %852, %856 : vector<2x128xi1>, vector<2x128xf32>
    %cst_202 = arith.constant dense<0xFF800000> : vector<2xf32>
    %858 = vector.multi_reduction <maximumf>, %857, %cst_202 [1] : vector<2x128xf32> to vector<2xf32>
    %859 = vector.shape_cast %858 : vector<2xf32> to vector<2x1xf32>
    %860 = vector.broadcast %859 : vector<2x1xf32> to vector<2x128xf32>
    %861 = arith.subf %857, %860 : vector<2x128xf32>
    %862 = math.exp %861 : vector<2x128xf32>
    %cst_203 = arith.constant dense<0.000000e+00> : vector<2xf32>
    %863 = vector.multi_reduction <add>, %862, %cst_203 [1] : vector<2x128xf32> to vector<2xf32>
    %864 = vector.shape_cast %863 : vector<2xf32> to vector<2x1xf32>
    %865 = vector.broadcast %864 : vector<2x1xf32> to vector<2x128xf32>
    %866 = arith.divf %862, %865 : vector<2x128xf32>
    %c0_204 = arith.constant 0 : index
    %c0_205 = arith.constant 0 : index
    %867 = vector.load %arg19[%c0_204, %c0_205] : memref<2x128xf32, #tpu.memory_space<vmem>>, vector<2x128xf32>
    tpu.vector_store %arg19[%c0_204, %c0_205], %866 {strides = array<i32>} : memref<2x128xf32, #tpu.memory_space<vmem>>, vector<2x128xf32>,
    return
  }
  func.func @transform_0(%arg0: i32) -> (i32, i32) {
    %c0_i32 = arith.constant 0 : i32
    %c0_i32_0 = arith.constant 0 : i32
    %c0_i32_1 = arith.constant 0 : i32
    return %c0_i32, %c0_i32_0 : i32, i32
  }
  func.func @transform_1(%arg0: i32) -> (i32, i32) {
    %c0_i32 = arith.constant 0 : i32
    %c0_i32_0 = arith.constant 0 : i32
    %c0_i32_1 = arith.constant 0 : i32
    return %c0_i32, %c0_i32_0 : i32, i32
  }
  func.func @transform_2(%arg0: i32) -> (i32, i32) {
    %c0_i32 = arith.constant 0 : i32
    %c0_i32_0 = arith.constant 0 : i32
    %c0_i32_1 = arith.constant 0 : i32
    return %c0_i32, %c0_i32_0 : i32, i32
  }
  func.func @transform_3(%arg0: i32) -> (i32, i32) {
    %c0_i32 = arith.constant 0 : i32
    %c0_i32_0 = arith.constant 0 : i32
    %c0_i32_1 = arith.constant 0 : i32
    return %c0_i32, %c0_i32_0 : i32, i32
  }
  func.func @transform_4(%arg0: i32) -> (i32, i32) {
    %c0_i32 = arith.constant 0 : i32
    %c0_i32_0 = arith.constant 0 : i32
    %c0_i32_1 = arith.constant 0 : i32
    return %c0_i32, %c0_i32_0 : i32, i32
  }
  func.func @transform_5(%arg0: i32) -> (i32, i32) {
    %c0_i32 = arith.constant 0 : i32
    %c0_i32_0 = arith.constant 0 : i32
    %c0_i32_1 = arith.constant 0 : i32
    return %c0_i32, %c0_i32_0 : i32, i32
  }
  func.func @transform_6(%arg0: i32) -> (i32, i32) {
    %c0_i32 = arith.constant 0 : i32
    %c0_i32_0 = arith.constant 0 : i32
    %c0_i32_1 = arith.constant 0 : i32
    return %c0_i32, %c0_i32_0 : i32, i32
  }
  func.func @transform_7(%arg0: i32) -> (i32, i32) {
    %c0_i32 = arith.constant 0 : i32
    %c0_i32_0 = arith.constant 0 : i32
    %c0_i32_1 = arith.constant 0 : i32
    return %c0_i32, %c0_i32_0 : i32, i32
  }
  func.func @transform_8(%arg0: i32) -> (i32, i32) {
    %c0_i32 = arith.constant 0 : i32
    %c0_i32_0 = arith.constant 0 : i32
    %c0_i32_1 = arith.constant 0 : i32
    return %c0_i32, %c0_i32_0 : i32, i32
  }
  func.func @transform_9(%arg0: i32) -> (i32, i32) {
    %c0_i32 = arith.constant 0 : i32
    %c0_i32_0 = arith.constant 0 : i32
    %c0_i32_1 = arith.constant 0 : i32
    return %c0_i32, %c0_i32_0 : i32, i32
  }
  func.func @transform_10(%arg0: i32) -> (i32, i32) {
    %c0_i32 = arith.constant 0 : i32
    %c0_i32_0 = arith.constant 0 : i32
    %c0_i32_1 = arith.constant 0 : i32
    return %c0_i32, %c0_i32_0 : i32, i32
  }
  func.func @transform_11(%arg0: i32) -> (i32, i32) {
    %c0_i32 = arith.constant 0 : i32
    %c0_i32_0 = arith.constant 0 : i32
    %c0_i32_1 = arith.constant 0 : i32
    return %c0_i32, %c0_i32_0 : i32, i32
  }
  func.func @transform_12(%arg0: i32) -> (i32, i32) {
    %c0_i32 = arith.constant 0 : i32
    %c0_i32_0 = arith.constant 0 : i32
    %c0_i32_1 = arith.constant 0 : i32
    return %c0_i32, %c0_i32_0 : i32, i32
  }
  func.func @transform_13(%arg0: i32) -> (i32, i32) {
    %c0_i32 = arith.constant 0 : i32
    %c0_i32_0 = arith.constant 0 : i32
    %c0_i32_1 = arith.constant 0 : i32
    return %c0_i32, %c0_i32_0 : i32, i32
  }
  func.func @transform_14(%arg0: i32) -> (i32, i32) {
    %c0_i32 = arith.constant 0 : i32
    %c0_i32_0 = arith.constant 0 : i32
    %c0_i32_1 = arith.constant 0 : i32
    return %c0_i32, %c0_i32_0 : i32, i32
  }
  func.func @transform_15(%arg0: i32) -> (i32, i32) {
    %c0_i32 = arith.constant 0 : i32
    %c0_i32_0 = arith.constant 0 : i32
    %c0_i32_1 = arith.constant 0 : i32
    return %c0_i32, %c0_i32_0 : i32, i32
  }
  func.func @transform_16(%arg0: i32) -> (i32, i32) {
    %c0_i32 = arith.constant 0 : i32
    %c0_i32_0 = arith.constant 0 : i32
    %c0_i32_1 = arith.constant 0 : i32
    return %c0_i32, %c0_i32_0 : i32, i32
  }
  func.func @transform_17(%arg0: i32) -> (i32, i32) {
    %c0_i32 = arith.constant 0 : i32
    %c0_i32_0 = arith.constant 0 : i32
    %c0_i32_1 = arith.constant 0 : i32
    return %c0_i32, %c0_i32_0 : i32, i32
  }
  func.func @transform_18(%arg0: i32) -> (i32, i32) {
    %c0_i32 = arith.constant 0 : i32
    %c0_i32_0 = arith.constant 0 : i32
    %c0_i32_1 = arith.constant 0 : i32
    return %c0_i32, %c0_i32_0 : i32, i32
  }
}

</mosaic_0001>

<bundles_post_ra>
// kernel: rnn_classifier_forward.1
= control target key start
LH: loop header
LB: loop body
LE: loop exit
PB: predicated region body
PF: predicated region fallthrough
CT: control target
= control target key end

     0   :  { %s4801_s0 = inlined_call_operand.vmem [shape: f32[16,16], index: 0, kind: input, shape index: {}]   ;;  %s4802_s1 = inlined_call_operand.hbm [shape: bf16[16,128], index: 1, kind: input, shape index: {}]   ;;  %s4803_s2 = inlined_call_operand.vmem [shape: bf16[32,128], index: 2, kind: input, shape index: {}]   ;;  %s4804_s3 = inlined_call_operand.hbm [shape: f32[1,128], index: 3, kind: input, shape index: {}]   ;;  %s4805_s4 = inlined_call_operand.hbm [shape: bf16[16,128], index: 4, kind: input, shape index: {}]   ;;  %s4806_s5 = inlined_call_operand.vmem [shape: bf16[32,128], index: 5, kind: input, shape index: {}]   ;;  %s4807_s6 = inlined_call_operand.hbm [shape: f32[1,128], index: 6, kind: input, shape index: {}]   ;;  %s4808_s7 = inlined_call_operand.vmem [shape: bf16[32,128], index: 7, kind: input, shape index: {}]   ;;  %s4809_s8 = inlined_call_operand.hbm [shape: bf16[32,128], index: 8, kind: input, shape index: {}]   ;;  %s4810_s9 = inlined_call_operand.hbm [shape: f32[1,128], index: 9, kind: input, shape index: {}]   ;;  %s4811_s10 = inlined_call_operand.hbm [shape: bf16[32,128], index: 10, kind: input, shape index: {}]   ;;  %s4812_s11 = inlined_call_operand.hbm [shape: bf16[32,128], index: 11, kind: input, shape index: {}]   ;;  %s4813_s12 = inlined_call_operand.hbm [shape: f32[1,128], index: 12, kind: input, shape index: {}]   ;;  %s4814_s13 = inlined_call_operand.hbm [shape: f32[1,256], index: 13, kind: input, shape index: {}]   ;;  %s4815_s14 = inlined_call_operand.hbm [shape: f32[1,256], index: 14, kind: input, shape index: {}]   ;;  %s4816_s15 = inlined_call_operand.hbm [shape: f32[1,256], index: 15, kind: input, shape index: {}]   ;;  %s4817_s16 = inlined_call_operand.hbm [shape: f32[1,256], index: 16, kind: input, shape index: {}]   ;;  %s4818_s17 = inlined_call_operand.hbm [shape: bf16[256,128], index: 17, kind: input, shape index: {}]   ;;  %s4819_s18 = inlined_call_operand.hbm [shape: f32[2,128], index: 18, kind: output, shape index: {}]  }
   0x1   :  { %4822 = sst [smem:[#allocation36_spill]] %s4801_s0 }
   0x2   :  { %4823 = sst [smem:[#allocation37_spill]] %s4802_s1 }
   0x3   :  { %4824 = sst [smem:[#allocation38_spill]] %s4803_s2 }
   0x4   :  { %23 = vsyncpa [#allocation4], 0 }
   0x5   :  { %24 = vsyncpa [#allocation7], 0 }
   0x6   :  { %25 = vsyncpa [#allocation10], 0 }
   0x7   :  { %26 = vsyncpa [#allocation13], 0 }
   0x8   :  { %27 = vsyncpa [#allocation16], 0 }
   0x9   :  { %28 = vsyncpa [#allocation19], 0 }
   0xa   :  { %29 = vsyncpa [#allocation22], 0 }
   0xb   :  { %30 = vsyncpa [#allocation25], 0  ;;  %s54_s29 = sshll.u32 %s4804_s3, 4  ;;  %s55_s29 = int_to_ptr.hbm [resolvable:$true] %s54_s29 }
   0xc   :  { %31 = vsyncpa [#allocation5], 0  ;;  %s3936_s30 = smov [#allocation6]   ;;  %s80_s20 = sshll.u32 %s4807_s6, 4  ;;  %s81_s20 = int_to_ptr.hbm [resolvable:$true] %s80_s20 }
   0xd   :  { %s56_s0 = sshll.u32 %s3936_s30, 4  ;;  %s3937_s21 = smov [#allocation9]   ;;  %s57_s0 = int_to_ptr.vmem [resolvable:$true] %s56_s0 }
   0xe   :  { %59 = dma.hbm_to_vmem [thread:$0]  %s55_s29, 16, %s57_s0, [#allocation7]  }
   0xf   :  { %s82_s22 = sshll.u32 %s3937_s21, 4  ;;  %s106_s24 = sshll.u32 %s4810_s9, 4  ;;  %s83_s22 = int_to_ptr.vmem [resolvable:$true] %s82_s22  ;;  %s107_s24 = int_to_ptr.hbm [resolvable:$true] %s106_s24 }
  0x10   :  { %85 = dma.hbm_to_vmem [thread:$0]  %s81_s20, 16, %s83_s22, [#allocation10]  }
  0x11   :  { %s3938_s3 = smov [#allocation12]   ;;  %s129_s28 = sshll.u32 %s4812_s11, 4  ;;  %s130_s28 = int_to_ptr.hbm [resolvable:$true] %s129_s28 }
  0x12   :  { %s108_s25 = sshll.u32 %s3938_s3, 4  ;;  %s3939_s6 = smov [#allocation15]   ;;  %s109_s25 = int_to_ptr.vmem [resolvable:$true] %s108_s25 }
  0x13   :  { %111 = dma.hbm_to_vmem [thread:$0]  %s107_s24, 16, %s109_s25, [#allocation13]  }
  0x14   :  { %s131_s29 = sshll.u32 %s3939_s6, 4  ;;  %s154_s19 = sshll.u32 %s4814_s13, 4  ;;  %s132_s29 = int_to_ptr.vmem [resolvable:$true] %s131_s29  ;;  %s155_s19 = int_to_ptr.hbm [resolvable:$true] %s154_s19 }
  0x15   :  { %s3940_s9 = smov 64   ;;  %s3941_s1 = smov 4  }
  0x16   :  { %137 = dma.hbm_to_vmem [thread:$0]  %s130_s28, 256, %s132_s29, [#allocation16], %s3940_s9, %s3940_s9, %s3941_s1  }
  0x17   :  { %s176_s11 = sshll.u32 %s4816_s15, 4  ;;  %s3942_s22 = smov [#allocation18]   ;;  %s177_s11 = int_to_ptr.hbm [resolvable:$true] %s176_s11 }
  0x18   :  { %s156_s2 = sshll.u32 %s3942_s22, 4  ;;  %s3943_s23 = smov [#allocation21]   ;;  %s157_s2 = int_to_ptr.vmem [resolvable:$true] %s156_s2 }
  0x19   :  { %159 = dma.hbm_to_vmem [thread:$0]  %s155_s19, 32, %s157_s2, [#allocation19]  }
  0x1a   :  { %s178_s24 = sshll.u32 %s3943_s23, 4  ;;  %s4825_s25 = sld [smem:[#allocation37_spill]]  ;;  %s179_s24 = int_to_ptr.vmem [resolvable:$true] %s178_s24 }
  0x1b   :  { %181 = dma.hbm_to_vmem [thread:$0]  %s177_s11, 32, %s179_s24, [#allocation22]  }
  0x1c   :  { %s64_s6 = sshll.u32 %s4805_s4, 4  ;;  %s3944_s29 = smov [#allocation3]   ;;  %s65_s6 = int_to_ptr.hbm [resolvable:$true] %s64_s6 }
  0x1d   :  { %s40_s15 = sshll.u32 %s3944_s29, 4  ;;  %s3945_s30 = smov [#allocation8]   ;;  %s41_s15 = int_to_ptr.vmem [resolvable:$true] %s40_s15 }
  0x1e   :  { %s66_s0 = sshll.u32 %s3945_s30, 4  ;;  %s92_s21 = sshll.u32 %s4809_s8, 4  ;;  %s67_s0 = int_to_ptr.vmem [resolvable:$true] %s66_s0  ;;  %s93_s21 = int_to_ptr.hbm [resolvable:$true] %s92_s21 }
  0x1f   :  { %72 = dma.hbm_to_vmem [thread:$0]  %s65_s6, 128, %s67_s0, [#allocation7], %s3940_s9, %s3940_s9, %s3941_s1  }
  0x20   :  { %s38_s26 = sshll.u32 %s4825_s25, 4  ;;  %s116_s22 = sshll.u32 %s4811_s10, 4  ;;  %s39_s26 = int_to_ptr.hbm [resolvable:$true] %s38_s26  ;;  %s117_s22 = int_to_ptr.hbm [resolvable:$true] %s116_s22 }
  0x21   :  { %46 = dma.hbm_to_vmem [thread:$0]  %s39_s26, 128, %s41_s15, [#allocation4], %s3940_s9, %s3940_s9, %s3941_s1  }
  0x22   :  { %s3946_s2 = smov [#allocation11]   ;;  %s3947_s24 = smov [#allocation14]  }
  0x23   :  { %s94_s23 = sshll.u32 %s3946_s2, 4  ;;  %s118_s8 = sshll.u32 %s3947_s24, 4  ;;  %s95_s23 = int_to_ptr.vmem [resolvable:$true] %s94_s23  ;;  %s119_s8 = int_to_ptr.vmem [resolvable:$true] %s118_s8 }
  0x24   :  { %100 = dma.hbm_to_vmem [thread:$0]  %s93_s21, 256, %s95_s23, [#allocation10], %s3940_s9, %s3940_s9, %s3941_s1  }
  0x25   :  { %s143_s25 = sshll.u32 %s4813_s12, 4  ;;  %s165_s27 = sshll.u32 %s4815_s14, 4  ;;  %s144_s25 = int_to_ptr.hbm [resolvable:$true] %s143_s25  ;;  %s166_s27 = int_to_ptr.hbm [resolvable:$true] %s165_s27 }
  0x26   :  { %124 = dma.hbm_to_vmem [thread:$0]  %s117_s22, 256, %s119_s8, [#allocation13], %s3940_s9, %s3940_s9, %s3941_s1  }
  0x27   :  { %s3948_s28 = smov [#allocation17]   ;;  %s3949_s29 = smov [#allocation20]  }
  0x28   :  { %s145_s6 = sshll.u32 %s3948_s28, 4  ;;  %s167_s15 = sshll.u32 %s3949_s29, 4  ;;  %s146_s6 = int_to_ptr.vmem [resolvable:$true] %s145_s6  ;;  %s168_s15 = int_to_ptr.vmem [resolvable:$true] %s167_s15 }
  0x29   :  { %148 = dma.hbm_to_vmem [thread:$0]  %s144_s25, 16, %s146_s6, [#allocation16]  }
  0x2a   :  { %s187_s12 = sshll.u32 %s4817_s16, 4  ;;  %s197_s21 = sshll.u32 %s4818_s17, 4  ;;  %s188_s12 = int_to_ptr.hbm [resolvable:$true] %s187_s12  ;;  %s198_s21 = int_to_ptr.hbm [resolvable:$true] %s197_s21 }
  0x2b   :  { %170 = dma.hbm_to_vmem [thread:$0]  %s166_s27, 32, %s168_s15, [#allocation19]  }
  0x2c   :  { %s3950_s4 = smov [#allocation23]   ;;  %s3951_s11 = smov [#allocation24]  }
  0x2d   :  { %s189_s14 = sshll.u32 %s3950_s4, 4  ;;  %s199_s22 = sshll.u32 %s3951_s11, 4  ;;  %s190_s14 = int_to_ptr.vmem [resolvable:$true] %s189_s14  ;;  %s200_s22 = int_to_ptr.vmem [resolvable:$true] %s199_s22 }
  0x2e   :  { %192 = dma.hbm_to_vmem [thread:$0]  %s188_s12, 32, %s190_s14, [#allocation22]  }
  0x2f   :  { %205 = dma.hbm_to_vmem [thread:$0]  %s198_s21, 2048, %s200_s22, [#allocation25], %s3940_s9, %s3940_s9, %s3941_s1  }
  0x30   :  { %3918 = dma.done.wait [#allocation4], 128  }
  0x31   :  { %3919 = vsyncadd [#allocation4], 4294967168 }
  0x32   :  { %3920 = dma.done.wait [#allocation7], 144  }
  0x33   :  { %3921 = vsyncadd [#allocation7], 4294967152 }
  0x34   :  { %3922 = dma.done.wait [#allocation10], 272  }
  0x35   :  { %3923 = vsyncadd [#allocation10], 4294967024 }
  0x36   :  { %3924 = dma.done.wait [#allocation13], 272  }
  0x37   :  { %3925 = vsyncadd [#allocation13], 4294967024 }
  0x38   :  { %3926 = dma.done.wait [#allocation16], 272  }
  0x39   :  { %3927 = vsyncadd [#allocation16], 4294967024 }
  0x3a   :  { %3928 = dma.done.wait [#allocation19], 64  }
  0x3b   :  { %3929 = vsyncadd [#allocation19], 4294967232 }
  0x3c   :  { %3930 = dma.done.wait [#allocation22], 64  }
  0x3d   :  { %3931 = vsyncadd [#allocation22], 4294967232 }
  0x3e   :  { %3932 = dma.done.wait [#allocation25], 2048  }
  0x3f   :  { %3933 = vsyncadd [#allocation25], 4294965248  ;;  %v3234_v0 = vld [vmem:[#allocation3] sm:$0xff]  ;;  %s4826_s1 = sld [smem:[#allocation38_spill]]  ;;  %v4119_v2 = vld [vmem:[%s4806_s5 + $0x8] sm:$0xff]  ;;  %vm278_vm0 = vcmask 130048  }
  0x40   :  { %v3235_v3 = vld [vmem:[#allocation8] sm:$0xff]  ;;  %s4827_s13 = sld [smem:[#allocation36_spill]]  ;;  %289 = vmatpush.bf16.msra.mxu0 %v3234_v0  ;;  %378 = vmatpush.bf16.msra.mxu3 %v4119_v2  ;;  %v3952_v9 = vmov 0   ;;  %v3285_v10 = vld [vmem:[#allocation9] ss:$0 sm:$0xff]  ;;  %vm342_vm9 = vcmask 261120  }
  0x41   :  { %315 = vmatpush.bf16.msra.mxu1 %v3235_v3  ;;  %v4137_v8 = vld [vmem:[%s4806_s5] sm:$0xff]  ;;  %v4161_v13 = vld [vmem:[#allocation6] ss:$0 sm:$0xff]  ;;  %s3953_s5 = smov 32   ;;  %s3025_s20 = sshll.u32 %s4819_s18, 4  ;;  %s3026_s20 = int_to_ptr.hbm [resolvable:$true] %s3025_s20 }
  0x44   :  { %379 = vmatpush.bf16.msra.mxu3 %v4137_v8 }
  0x45   :  { %v4114_v1 = vld [vmem:[%s4826_s1 + $0x8] sm:$0xff]  ;;  %v4131_v7 = vld [vmem:[%s4826_s1] sm:$0xff]  ;;  %501 = vmatpush.bf16.msrb.mxu1 %v4119_v2 }
  0x46   :  { %v263_v4 = vld [vmem:[%s4827_s13] sm:$0xff]  ;;  %v264_v5 = vld [vmem:[%s4827_s13 + $0x8] sm:$0xff]  ;;  %352 = vmatpush.bf16.msra.mxu2 %v4114_v1  ;;  %476 = vmatpush.bf16.msrb.mxu0 %v4114_v1 }
  0x47   :  { %v265_v6 = vpack.c.bf16 %v264_v5, %v263_v4  ;;  %380 = vmatmul.bf16.vlgmr.msra.gmra.mxu3 %v3952_v9 }
  0x48   :  { %631 = vmatpush.bf16.msrb.mxu3 %v4119_v2 }
  0x49   :  { %3046 = vmatmul.msk.bf16.vlgmr.msra.gmra.mxu0 %vm278_vm0, %v265_v6  ;;  %3051 = vmatmul.msk.bf16.vlgmr.msra.gmra.mxu1 %vm278_vm0, %v265_v6 }
  0x4a   :  { %353 = vmatpush.bf16.msra.mxu2 %v4131_v7  ;;  %477 = vmatpush.bf16.msrb.mxu0 %v4131_v7 }
  0x4b   :  { %502 = vmatpush.bf16.msrb.mxu1 %v4137_v8 }
  0x4c   :  { %632 = vmatpush.bf16.msrb.mxu3 %v4137_v8 }
  0x4d   :  { %354 = vmatmul.bf16.vlgmr.msra.gmra.mxu2 %v3952_v9 }
  0x4e   :  { %606 = vmatpush.bf16.msrb.mxu2 %v4114_v1  ;;  %736 = vmatpush.bf16.msra.mxu0 %v4114_v1 }
  0x4f   :  { %761 = vmatpush.bf16.msra.mxu1 %v4119_v2 }
  0x50   :  { %884 = vmatpush.bf16.msra.mxu3 %v4119_v2 }
  0x52   :  { %607 = vmatpush.bf16.msrb.mxu2 %v4131_v7  ;;  %737 = vmatpush.bf16.msra.mxu0 %v4131_v7 }
  0x53   :  { %762 = vmatpush.bf16.msra.mxu1 %v4137_v8 }
  0x54   :  { %885 = vmatpush.bf16.msra.mxu3 %v4137_v8 }
  0x56   :  { %863 = vmatpush.bf16.msra.mxu2 %v4114_v1 }
  0x5a   :  { %864 = vmatpush.bf16.msra.mxu2 %v4131_v7 }
  0xc6   :  { %v317_v11 = vpop.f32.mrf.mxu1  ;;  %v291_v14 = vpop.f32.mrf.mxu0 }
  0xc7   :  { %v4159_v12 = vadd.f32 %v3285_v10, %v317_v11  ;;  %v4164_v15 = vadd.f32 %v4161_v13, %v291_v14 }
  0xca   :  { %v381_v19 = vpop.f32.mrf.mxu3 }
  0xcb   :  { %v386_v21 = vrot.slane %v381_v19, 2 }
  0xce   :  { %v319_v16 = vpop.f32.mrf.mxu1 }
  0xcf   :  { %v4167_v20 = vadd.f32 %v3285_v10, %v319_v16 }
  0xd0   :  { %v355_v17 = vpop.f32.mrf.mxu2 }
  0xd1   :  { %v359_v18 = vadd.f32 %v355_v17, %v4164_v15  ;;  %v388_v22 = vadd.f32 %v386_v21, %v4167_v20 }
  0xd2   :  { %v383_v25 = vpop.f32.mrf.mxu3 }
  0xd3   :  { %3294 = vtanh.f32 %v359_v18  ;;  %v3068_v27 = vmul.f32 -1.442695, %v359_v18  ;;  %v3069_v28 = vmul.f32 -1.442695, %v388_v22  ;;  %v4198_v18 = vpop.f32.mrf.mxu0 }
  0xd4   :  { %3296 = vtanh.f32 %v388_v22 }
  0xd5   :  { %3298 = vpow2.f32 %v3068_v27 }
  0xd6   :  { %3300 = vpow2.f32 %v3069_v28 }
  0xd8   :  { %v357_v23 = vpop.f32.mrf.mxu2 }
  0xd9   :  { %v3295_v24 = vpop.eup %3294 }
  0xda   :  { %431 = vrot.lane.b32.xlu0 %v3295_v24, %s3953_s5  ;;  %v3297_v26 = vpop.eup %3296 }
  0xdb   :  { %v3299_v29 = vpop.eup %3298 }
  0xdc   :  { %v392_v30 = vadd.f32 1.0, %v3299_v29  ;;  %v3301_v31 = vpop.eup %3300 }
  0xdd   :  { %v411_v32 = vadd.f32 1.0, %v3301_v31 }
  0xde   :  { %3302 = vrcp.f32 %v392_v30  ;;  %v404_v41 = vand.u32 2147483648, %v392_v30  ;;  %vm398_vm2 = vweird.f32 %v392_v30  ;;  %v402_v42 = vand.u32 2147483647, %v392_v30 }
  0xdf   :  { %3304 = vrcp.f32 %v411_v32  ;;  %vm417_vm5 = vweird.f32 %v411_v32  ;;  %v423_v50 = vand.u32 2147483648, %v411_v32  ;;  %v421_v51 = vand.u32 2147483647, %v411_v32 }
  0xe0   :  { %v405_v45 = vor.u32 1.1754944e-38, %v404_v41  ;;  %vm403_vm4 = vcmp.eq.f32.partialorder %v402_v42, 8.507059e+37 }
  0xe1   :  { %v424_v53 = vor.u32 1.1754944e-38, %v423_v50  ;;  %vm422_vm8 = vcmp.eq.f32.partialorder %v421_v51, 8.507059e+37 }
  0xe2   :  { %442 = vrot.lane.b32.xlu0 %v3297_v26, %s3953_s5 }
  0xe4   :  { %v3303_v33 = vpop.eup %3302 }
  0xe5   :  { %v394_v34 = vmul.f32 %v3303_v33, %v392_v30  ;;  %v3305_v36 = vpop.eup %3304  ;;  %vm399_vm1 = vweird.f32 %v3303_v33 }
  0xe6   :  { %v413_v38 = vmul.f32 %v3305_v36, %v411_v32  ;;  %vm400_vm3 = vmor %vm398_vm2, %vm399_vm1  ;;  %vm418_vm6 = vweird.f32 %v3305_v36 }
  0xe7   :  { %v395_v35 = vsub.f32 1.0, %v394_v34  ;;  %vm419_vm7 = vmor %vm417_vm5, %vm418_vm6 }
  0xe8   :  { %v414_v40 = vsub.f32 1.0, %v413_v38 }
  0xe9   :  { %v396_v37 = vmul.f32 %v3303_v33, %v395_v35 }
  0xea   :  { %v415_v44 = vmul.f32 %v3305_v36, %v414_v40 }
  0xeb   :  { %v397_v39 = vadd.f32 %v3303_v33, %v396_v37 }
  0xec   :  { %v416_v49 = vadd.f32 %v3305_v36, %v415_v44 }
  0xed   :  { %v401_v43 = vsel %vm400_vm3, %v3303_v33, %v397_v39 }
  0xee   :  { %v406_v47 = vsel %vm403_vm4, %v405_v45, %v401_v43  ;;  %v420_v52 = vsel %vm419_vm7, %v3305_v36, %v416_v49 }
  0xef   :  { %v425_v54 = vsel %vm422_vm8, %v424_v53, %v420_v52  ;;  %v429_v57 = vmul.f32 0.0, %v406_v47 }
  0xf0   :  { %v440_v60 = vmul.f32 0.0, %v425_v54 }
 0x14c   :  { %v432_v46 = vpop.permute.xlu0 %431 }
 0x14d   :  { %v434_v48 = vmul.f32 %v432_v46, %v406_v47 }
 0x14f   :  { %436 = vrot.lane.b32.xlu1 %v434_v48, %s3953_s5 }
 0x154   :  { %v443_v55 = vpop.permute.xlu0 %442 }
 0x155   :  { %v445_v56 = vmul.f32 %v443_v55, %v425_v54 }
 0x157   :  { %447 = vrot.lane.b32.xlu1 %v445_v56, %s3953_s5 }
 0x1c1   :  { %v437_v58 = vpop.permute.xlu1 %436 }
 0x1c2   :  { %v4174_v59 = vadd.f32 %v437_v58, %v429_v57 }
 0x1c4   :  { %3306 = vtanh.f32 %v4174_v59 }
 0x1c9   :  { %v448_v61 = vpop.permute.xlu1 %447 }
 0x1ca   :  { %v3307_v62 = vpop.eup %3306  ;;  %v4177_v63 = vadd.f32 %v448_v61, %v440_v60  ;;  %v553_v61 = vrot.slane %v4174_v59, 6 }
 0x1cb   :  { %453 = vrot.lane.b32.xlu2 %v3307_v62, %s3953_s5 }
 0x1cc   :  { %3308 = vtanh.f32 %v4177_v63 }
 0x1d2   :  { %v3309_v0 = vpop.eup %3308 }
 0x1d3   :  { %459 = vrot.lane.b32.xlu2 %v3309_v0, %s3953_s5 }
 0x225   :  { %v454_v3 = vpop.permute.xlu2 %453 }
 0x226   :  { %v4182_v4 = vmul.f32 %v454_v3, %v406_v47 }
 0x228   :  { %v463_v5 = vpack.c.bf16 %v4182_v4, %v4182_v4 }
 0x22a   :  { %465 = vrot.lane.b32.xlu0 %v463_v5, %s3940_s9  ;;  %v567_v5 = vrot.slane %v4177_v63, 2 }
 0x22d   :  { %v460_v6 = vpop.permute.xlu2 %459 }
 0x22e   :  { %v4187_v10 = vmul.f32 %v460_v6, %v425_v54 }
 0x230   :  { %v487_v11 = vpack.c.bf16 %v4187_v10, %v4187_v10 }
 0x232   :  { %v489_v14 = vrot.slane %v487_v11, 3 }
 0x234   :  { %490 = vrot.lane.b32.xlu1 %v489_v14, %s3940_s9 }
 0x29c   :  { %v466_v16 = vpop.permute.xlu0 %465 }
 0x29d   :  { %3070 = vmatmul.msk.bf16.vlgmr.msrb.gmra.mxu0 %vm342_vm9, %v466_v16 }
 0x29e   :  { %988 = vmatpush.bf16.msrb.mxu0 %v4114_v1 }
 0x2a2   :  { %989 = vmatpush.bf16.msrb.mxu0 %v4131_v7 }
 0x2a6   :  { %v491_v17 = vpop.permute.xlu1 %490 }
 0x2a7   :  { %3071 = vmatmul.msk.bf16.vlgmr.msrb.gmra.mxu1 %vm342_vm9, %v491_v17 }
 0x2a8   :  { %1013 = vmatpush.bf16.msrb.mxu1 %v4119_v2 }
 0x2ac   :  { %1014 = vmatpush.bf16.msrb.mxu1 %v4137_v8 }
 0x31a   :  { %v479_v19 = vpop.f32.mrf.mxu0 }
 0x31b   :  { %v484_v21 = vrot.slane %v479_v19, 6 }
 0x31d   :  { %v486_v22 = vadd.f32 %v484_v21, %v4164_v15 }
 0x31f   :  { %3310 = vtanh.f32 %v486_v22  ;;  %v3072_v30 = vmul.f32 -1.442695, %v486_v22 }
 0x322   :  { %v481_v23 = vpop.f32.mrf.mxu0 }
 0x324   :  { %v504_v24 = vpop.f32.mrf.mxu1 }
 0x325   :  { %v3311_v25 = vpop.eup %3310  ;;  %v509_v26 = vrot.slane %v504_v24, 4 }
 0x326   :  { %557 = vrot.lane.b32.xlu2 %v3311_v25, %s3953_s5 }
 0x327   :  { %v511_v27 = vadd.f32 %v509_v26, %v4167_v20 }
 0x329   :  { %3312 = vtanh.f32 %v511_v27  ;;  %v3073_v36 = vmul.f32 -1.442695, %v511_v27 }
 0x32a   :  { %3314 = vpow2.f32 %v3072_v30 }
 0x32c   :  { %v506_v28 = vpop.f32.mrf.mxu1 }
 0x32f   :  { %v3313_v29 = vpop.eup %3312 }
 0x330   :  { %571 = vrot.lane.b32.xlu0 %v3313_v29, %s3953_s5  ;;  %v3315_v31 = vpop.eup %3314 }
 0x331   :  { %v515_v32 = vadd.f32 1.0, %v3315_v31 }
 0x333   :  { %3316 = vrcp.f32 %v515_v32  ;;  %v527_v39 = vand.u32 2147483648, %v515_v32  ;;  %vm521_vm11 = vweird.f32 %v515_v32  ;;  %v525_v40 = vand.u32 2147483647, %v515_v32 }
 0x334   :  { %3318 = vpow2.f32 %v3073_v36 }
 0x335   :  { %v528_v42 = vor.u32 1.1754944e-38, %v527_v39  ;;  %vm526_vm13 = vcmp.eq.f32.partialorder %v525_v40, 8.507059e+37 }
 0x339   :  { %v3317_v33 = vpop.eup %3316 }
 0x33a   :  { %v517_v34 = vmul.f32 %v3317_v33, %v515_v32  ;;  %vm522_vm10 = vweird.f32 %v3317_v33  ;;  %v3319_v43 = vpop.eup %3318 }
 0x33b   :  { %vm523_vm12 = vmor %vm521_vm11, %vm522_vm10  ;;  %v534_v47 = vadd.f32 1.0, %v3319_v43 }
 0x33c   :  { %v518_v35 = vsub.f32 1.0, %v517_v34 }
 0x33d   :  { %3320 = vrcp.f32 %v534_v47  ;;  %v546_v53 = vand.u32 2147483648, %v534_v47  ;;  %vm540_vm15 = vweird.f32 %v534_v47  ;;  %v544_v54 = vand.u32 2147483647, %v534_v47 }
 0x33e   :  { %v519_v37 = vmul.f32 %v3317_v33, %v518_v35 }
 0x33f   :  { %v547_v56 = vor.u32 1.1754944e-38, %v546_v53  ;;  %vm545_vm1 = vcmp.eq.f32.partialorder %v544_v54, 8.507059e+37 }
 0x340   :  { %v520_v38 = vadd.f32 %v3317_v33, %v519_v37 }
 0x342   :  { %v524_v41 = vsel %vm523_vm12, %v3317_v33, %v520_v38 }
 0x343   :  { %v529_v44 = vsel %vm526_vm13, %v528_v42, %v524_v41  ;;  %v3321_v48 = vpop.eup %3320 }
 0x344   :  { %v536_v49 = vmul.f32 %v3321_v48, %v534_v47  ;;  %vm541_vm14 = vweird.f32 %v3321_v48  ;;  %v555_v62 = vmul.f32 %v553_v61, %v529_v44 }
 0x345   :  { %vm542_vm0 = vmor %vm540_vm15, %vm541_vm14 }
 0x346   :  { %v537_v50 = vsub.f32 1.0, %v536_v49 }
 0x348   :  { %v538_v51 = vmul.f32 %v3321_v48, %v537_v50 }
 0x34a   :  { %v539_v52 = vadd.f32 %v3321_v48, %v538_v51 }
 0x34c   :  { %v543_v55 = vsel %vm542_vm0, %v3321_v48, %v539_v52 }
 0x34d   :  { %v548_v58 = vsel %vm545_vm1, %v547_v56, %v543_v55 }
 0x34e   :  { %v569_v11 = vmul.f32 %v567_v5, %v548_v58 }
 0x380   :  { %v558_v45 = vpop.permute.xlu2 %557 }
 0x381   :  { %v560_v46 = vmul.f32 %v558_v45, %v529_v44 }
 0x383   :  { %562 = vrot.lane.b32.xlu1 %v560_v46, %s3953_s5 }
 0x3a2   :  { %v572_v57 = vpop.permute.xlu0 %571 }
 0x3a3   :  { %v574_v60 = vmul.f32 %v572_v57, %v548_v58 }
 0x3a5   :  { %576 = vrot.lane.b32.xlu2 %v574_v60, %s3953_s5 }
 0x3f5   :  { %v563_v0 = vpop.permute.xlu1 %562 }
 0x3f6   :  { %v4207_v3 = vadd.f32 %v563_v0, %v555_v62 }
 0x3f8   :  { %3322 = vtanh.f32 %v4207_v3 }
 0x3fe   :  { %v3323_v6 = vpop.eup %3322 }
 0x3ff   :  { %582 = vrot.lane.b32.xlu0 %v3323_v6, %s3953_s5  ;;  %v577_v14 = vpop.permute.xlu2 %576 }
 0x400   :  { %v4212_v16 = vadd.f32 %v577_v14, %v569_v11 }
 0x402   :  { %3324 = vtanh.f32 %v4212_v16 }
 0x408   :  { %v3325_v17 = vpop.eup %3324 }
 0x409   :  { %588 = vrot.lane.b32.xlu1 %v3325_v17, %s3953_s5 }
 0x471   :  { %v583_v59 = vpop.permute.xlu0 %582 }
 0x472   :  { %v4216_v19 = vmul.f32 %v583_v59, %v529_v44  ;;  %v683_v59 = vrot.slane %v4207_v3, 6 }
 0x474   :  { %v592_v21 = vpack.c.bf16 %v4216_v19, %v4216_v19 }
 0x476   :  { %v594_v22 = vrot.slane %v592_v21, 1 }
 0x478   :  { %595 = vrot.lane.b32.xlu2 %v594_v22, %s3940_s9 }
 0x47b   :  { %v589_v63 = vpop.permute.xlu1 %588 }
 0x47c   :  { %v4221_v23 = vmul.f32 %v589_v63, %v548_v58 }
 0x47e   :  { %v617_v24 = vpack.c.bf16 %v4221_v23, %v4221_v23 }
 0x480   :  { %v619_v25 = vrot.slane %v617_v24, 2  ;;  %v697_v24 = vrot.slane %v4212_v16, 2 }
 0x482   :  { %620 = vrot.lane.b32.xlu0 %v619_v25, %s3940_s9 }
 0x4d2   :  { %v596_v26 = vpop.permute.xlu2 %595 }
 0x4d3   :  { %3074 = vmatmul.msk.bf16.vlgmr.msrb.gmra.mxu2 %vm342_vm9, %v596_v26 }
 0x4d4   :  { %1118 = vmatpush.bf16.msrb.mxu2 %v4114_v1 }
 0x4d8   :  { %1119 = vmatpush.bf16.msrb.mxu2 %v4131_v7 }
 0x4f4   :  { %v621_v27 = vpop.permute.xlu0 %620 }
 0x4f5   :  { %3075 = vmatmul.msk.bf16.vlgmr.msrb.gmra.mxu3 %vm342_vm9, %v621_v27 }
 0x4f6   :  { %1143 = vmatpush.bf16.msrb.mxu3 %v4119_v2 }
 0x4fa   :  { %1144 = vmatpush.bf16.msrb.mxu3 %v4137_v8 }
 0x556   :  { %v609_v28 = vpop.f32.mrf.mxu2 }
 0x557   :  { %v614_v29 = vrot.slane %v609_v28, 4 }
 0x559   :  { %v616_v30 = vadd.f32 %v614_v29, %v4164_v15 }
 0x55b   :  { %3326 = vtanh.f32 %v616_v30  ;;  %v3076_v38 = vmul.f32 -1.442695, %v616_v30 }
 0x55e   :  { %v611_v31 = vpop.f32.mrf.mxu2 }
 0x561   :  { %v3327_v32 = vpop.eup %3326 }
 0x562   :  { %687 = vrot.lane.b32.xlu1 %v3327_v32, %s3953_s5 }
 0x578   :  { %v634_v33 = vpop.f32.mrf.mxu3 }
 0x579   :  { %v639_v34 = vrot.slane %v634_v33, 6 }
 0x57b   :  { %v641_v35 = vadd.f32 %v639_v34, %v4167_v20 }
 0x57d   :  { %3328 = vtanh.f32 %v641_v35  ;;  %v3077_v40 = vmul.f32 -1.442695, %v641_v35 }
 0x57e   :  { %3330 = vpow2.f32 %v3076_v38 }
 0x57f   :  { %3332 = vpow2.f32 %v3077_v40 }
 0x580   :  { %v636_v36 = vpop.f32.mrf.mxu3 }
 0x583   :  { %v3329_v37 = vpop.eup %3328 }
 0x584   :  { %701 = vrot.lane.b32.xlu2 %v3329_v37, %s3953_s5  ;;  %v3331_v39 = vpop.eup %3330 }
 0x585   :  { %v645_v41 = vadd.f32 1.0, %v3331_v39  ;;  %v3333_v42 = vpop.eup %3332 }
 0x586   :  { %v664_v44 = vadd.f32 1.0, %v3333_v42 }
 0x587   :  { %3334 = vrcp.f32 %v645_v41  ;;  %v657_v51 = vand.u32 2147483648, %v645_v41  ;;  %vm651_vm3 = vweird.f32 %v645_v41  ;;  %v655_v52 = vand.u32 2147483647, %v645_v41 }
 0x588   :  { %3336 = vrcp.f32 %v664_v44  ;;  %v676_v62 = vand.u32 2147483648, %v664_v44  ;;  %vm670_vm7 = vweird.f32 %v664_v44  ;;  %v674_v0 = vand.u32 2147483647, %v664_v44 }
 0x589   :  { %v658_v55 = vor.u32 1.1754944e-38, %v657_v51  ;;  %vm656_vm5 = vcmp.eq.f32.partialorder %v655_v52, 8.507059e+37 }
 0x58a   :  { %v677_v6 = vor.u32 1.1754944e-38, %v676_v62  ;;  %vm675_vm10 = vcmp.eq.f32.partialorder %v674_v0, 8.507059e+37 }
 0x58d   :  { %v3335_v43 = vpop.eup %3334 }
 0x58e   :  { %v647_v45 = vmul.f32 %v3335_v43, %v645_v41  ;;  %v3337_v47 = vpop.eup %3336  ;;  %vm652_vm2 = vweird.f32 %v3335_v43 }
 0x58f   :  { %v666_v49 = vmul.f32 %v3337_v47, %v664_v44  ;;  %vm653_vm4 = vmor %vm651_vm3, %vm652_vm2  ;;  %vm671_vm6 = vweird.f32 %v3337_v47 }
 0x590   :  { %v648_v46 = vsub.f32 1.0, %v647_v45  ;;  %vm672_vm8 = vmor %vm670_vm7, %vm671_vm6 }
 0x591   :  { %v667_v53 = vsub.f32 1.0, %v666_v49 }
 0x592   :  { %v649_v48 = vmul.f32 %v3335_v43, %v648_v46 }
 0x593   :  { %v668_v56 = vmul.f32 %v3337_v47, %v667_v53 }
 0x594   :  { %v650_v50 = vadd.f32 %v3335_v43, %v649_v48 }
 0x595   :  { %v669_v61 = vadd.f32 %v3337_v47, %v668_v56 }
 0x596   :  { %v654_v54 = vsel %vm653_vm4, %v3335_v43, %v650_v50 }
 0x597   :  { %v659_v58 = vsel %vm656_vm5, %v658_v55, %v654_v54  ;;  %v673_v5 = vsel %vm672_vm8, %v3337_v47, %v669_v61 }
 0x598   :  { %v678_v11 = vsel %vm675_vm10, %v677_v6, %v673_v5  ;;  %v685_v21 = vmul.f32 %v683_v59, %v659_v58 }
 0x599   :  { %v699_v26 = vmul.f32 %v697_v24, %v678_v11 }
 0x5d4   :  { %v688_v57 = vpop.permute.xlu1 %687 }
 0x5d5   :  { %v690_v60 = vmul.f32 %v688_v57, %v659_v58 }
 0x5d7   :  { %692 = vrot.lane.b32.xlu0 %v690_v60, %s3953_s5 }
 0x5de   :  { %v702_v14 = vpop.permute.xlu2 %701 }
 0x5df   :  { %v704_v17 = vmul.f32 %v702_v14, %v678_v11 }
 0x5e1   :  { %706 = vrot.lane.b32.xlu1 %v704_v17, %s3953_s5 }
 0x649   :  { %v693_v22 = vpop.permute.xlu0 %692 }
 0x64a   :  { %v4239_v63 = vadd.f32 %v693_v22, %v685_v21 }
 0x64c   :  { %3338 = vtanh.f32 %v4239_v63  ;;  %v810_v24 = vrot.slane %v4239_v63, 6 }
 0x652   :  { %v3339_v25 = vpop.eup %3338 }
 0x653   :  { %712 = vrot.lane.b32.xlu2 %v3339_v25, %s3953_s5  ;;  %v707_v27 = vpop.permute.xlu1 %706 }
 0x654   :  { %v4244_v28 = vadd.f32 %v707_v27, %v699_v26 }
 0x656   :  { %3340 = vtanh.f32 %v4244_v28 }
 0x65c   :  { %v3341_v29 = vpop.eup %3340 }
 0x65d   :  { %718 = vrot.lane.b32.xlu0 %v3341_v29, %s3953_s5 }
 0x6ad   :  { %v713_v3 = vpop.permute.xlu2 %712 }
 0x6ae   :  { %v4248_v30 = vmul.f32 %v713_v3, %v659_v58  ;;  %v824_v3 = vrot.slane %v4244_v28, 2 }
 0x6b0   :  { %v722_v31 = vpack.c.bf16 %v4248_v30, %v4248_v30 }
 0x6b2   :  { %v724_v32 = vrot.slane %v722_v31, 2 }
 0x6b4   :  { %725 = vrot.lane.b32.xlu1 %v724_v32, %s3940_s9 }
 0x6cf   :  { %v719_v16 = vpop.permute.xlu0 %718 }
 0x6d0   :  { %v4253_v33 = vmul.f32 %v719_v16, %v678_v11 }
 0x6d2   :  { %v747_v34 = vpack.c.bf16 %v4253_v33, %v4253_v33 }
 0x6d4   :  { %v749_v35 = vrot.slane %v747_v34, 1 }
 0x6d6   :  { %750 = vrot.lane.b32.xlu2 %v749_v35, %s3940_s9 }
 0x726   :  { %v726_v36 = vpop.permute.xlu1 %725 }
 0x727   :  { %3078 = vmatmul.msk.bf16.vlgmr.msra.gmra.mxu0 %vm342_vm9, %v726_v36 }
 0x728   :  { %1248 = vmatpush.bf16.msra.mxu0 %v4114_v1 }
 0x72c   :  { %1249 = vmatpush.bf16.msra.mxu0 %v4131_v7 }
 0x730   :  { %v751_v37 = vpop.permute.xlu2 %750 }
 0x731   :  { %3079 = vmatmul.msk.bf16.vlgmr.msra.gmra.mxu1 %vm342_vm9, %v751_v37 }
 0x732   :  { %1273 = vmatpush.bf16.msra.mxu1 %v4119_v2 }
 0x736   :  { %1274 = vmatpush.bf16.msra.mxu1 %v4137_v8 }
 0x7a4   :  { %v739_v38 = vpop.f32.mrf.mxu0 }
 0x7a5   :  { %v744_v39 = vrot.slane %v739_v38, 2 }
 0x7a7   :  { %v746_v40 = vadd.f32 %v744_v39, %v4164_v15 }
 0x7a9   :  { %3342 = vtanh.f32 %v746_v40  ;;  %v3080_v2 = vmul.f32 -1.442695, %v746_v40 }
 0x7ac   :  { %v741_v41 = vpop.f32.mrf.mxu0 }
 0x7ae   :  { %v764_v42 = vpop.f32.mrf.mxu1 }
 0x7af   :  { %v3343_v43 = vpop.eup %3342  ;;  %v768_v44 = vadd.f32 %v764_v42, %v4167_v20  ;;  %v4294_v42 = vadd.f32 %v4161_v13, %v4198_v18 }
 0x7b0   :  { %814 = vrot.lane.b32.xlu0 %v3343_v43, %s3953_s5 }
 0x7b1   :  { %3344 = vtanh.f32 %v768_v44  ;;  %v3081_v8 = vmul.f32 -1.442695, %v768_v44 }
 0x7b2   :  { %3346 = vpow2.f32 %v3080_v2 }
 0x7b3   :  { %3348 = vpow2.f32 %v3081_v8 }
 0x7b6   :  { %v766_v1 = vpop.f32.mrf.mxu1 }
 0x7b7   :  { %v3345_v7 = vpop.eup %3344 }
 0x7b8   :  { %828 = vrot.lane.b32.xlu1 %v3345_v7, %s3953_s5  ;;  %v3347_v45 = vpop.eup %3346 }
 0x7b9   :  { %v772_v46 = vadd.f32 1.0, %v3347_v45  ;;  %v3349_v15 = vpop.eup %3348 }
 0x7ba   :  { %v791_v47 = vadd.f32 1.0, %v3349_v15 }
 0x7bb   :  { %3350 = vrcp.f32 %v772_v46  ;;  %v784_v55 = vand.u32 2147483648, %v772_v46  ;;  %vm778_vm12 = vweird.f32 %v772_v46  ;;  %v782_v56 = vand.u32 2147483647, %v772_v46 }
 0x7bc   :  { %3352 = vrcp.f32 %v791_v47  ;;  %v803_v6 = vand.u32 2147483648, %v791_v47  ;;  %vm797_vm0 = vweird.f32 %v791_v47  ;;  %v801_v11 = vand.u32 2147483647, %v791_v47 }
 0x7bd   :  { %v785_v60 = vor.u32 1.1754944e-38, %v784_v55  ;;  %vm783_vm14 = vcmp.eq.f32.partialorder %v782_v56, 8.507059e+37 }
 0x7be   :  { %v804_v17 = vor.u32 1.1754944e-38, %v803_v6  ;;  %vm802_vm2 = vcmp.eq.f32.partialorder %v801_v11, 8.507059e+37 }
 0x7c1   :  { %v3351_v48 = vpop.eup %3350 }
 0x7c2   :  { %v774_v49 = vmul.f32 %v3351_v48, %v772_v46  ;;  %v3353_v50 = vpop.eup %3352  ;;  %vm779_vm11 = vweird.f32 %v3351_v48 }
 0x7c3   :  { %v793_v52 = vmul.f32 %v3353_v50, %v791_v47  ;;  %vm780_vm13 = vmor %vm778_vm12, %vm779_vm11  ;;  %vm798_vm15 = vweird.f32 %v3353_v50 }
 0x7c4   :  { %v775_v20 = vsub.f32 1.0, %v774_v49  ;;  %vm799_vm1 = vmor %vm797_vm0, %vm798_vm15 }
 0x7c5   :  { %v794_v54 = vsub.f32 1.0, %v793_v52 }
 0x7c6   :  { %v776_v51 = vmul.f32 %v3351_v48, %v775_v20 }
 0x7c7   :  { %v795_v58 = vmul.f32 %v3353_v50, %v794_v54 }
 0x7c8   :  { %v777_v53 = vadd.f32 %v3351_v48, %v776_v51 }
 0x7c9   :  { %v796_v5 = vadd.f32 %v3353_v50, %v795_v58 }
 0x7ca   :  { %v781_v57 = vsel %vm780_vm13, %v3351_v48, %v777_v53 }
 0x7cb   :  { %v786_v62 = vsel %vm783_vm14, %v785_v60, %v781_v57  ;;  %v800_v14 = vsel %vm799_vm1, %v3353_v50, %v796_v5 }
 0x7cc   :  { %v805_v21 = vsel %vm802_vm2, %v804_v17, %v800_v14  ;;  %v812_v25 = vmul.f32 %v810_v24, %v786_v62 }
 0x7cd   :  { %v826_v31 = vmul.f32 %v824_v3, %v805_v21 }
 0x822   :  { %v815_v61 = vpop.permute.xlu0 %814 }
 0x823   :  { %v817_v0 = vmul.f32 %v815_v61, %v786_v62 }
 0x825   :  { %819 = vrot.lane.b32.xlu2 %v817_v0, %s3953_s5 }
 0x82a   :  { %v829_v59 = vpop.permute.xlu1 %828 }
 0x82b   :  { %v831_v22 = vmul.f32 %v829_v59, %v805_v21 }
 0x82d   :  { %833 = vrot.lane.b32.xlu0 %v831_v22, %s3953_s5 }
 0x87f   :  { %v820_v26 = vpop.permute.xlu2 %819 }
 0x880   :  { %v4271_v27 = vadd.f32 %v820_v26, %v812_v25 }
 0x882   :  { %3354 = vtanh.f32 %v4271_v27 }
 0x888   :  { %v3355_v29 = vpop.eup %3354 }
 0x889   :  { %839 = vrot.lane.b32.xlu1 %v3355_v29, %s3953_s5  ;;  %v936_v29 = vrot.slane %v4271_v27, 6 }
 0x89f   :  { %v834_v32 = vpop.permute.xlu0 %833 }
 0x8a0   :  { %v4276_v16 = vadd.f32 %v834_v32, %v826_v31 }
 0x8a2   :  { %3356 = vtanh.f32 %v4276_v16 }
 0x8a8   :  { %v3357_v34 = vpop.eup %3356 }
 0x8a9   :  { %845 = vrot.lane.b32.xlu2 %v3357_v34, %s3953_s5  ;;  %v950_v34 = vrot.slane %v4276_v16, 2 }
 0x8fb   :  { %v840_v63 = vpop.permute.xlu1 %839 }
 0x8fc   :  { %v4280_v35 = vmul.f32 %v840_v63, %v786_v62 }
 0x8fe   :  { %v849_v36 = vpack.c.bf16 %v4280_v35, %v4280_v35 }
 0x900   :  { %v851_v37 = vrot.slane %v849_v36, 3 }
 0x902   :  { %852 = vrot.lane.b32.xlu1 %v851_v37, %s3940_s9 }
 0x903   :  { %v846_v38 = vpop.permute.xlu2 %845 }
 0x904   :  { %v4285_v28 = vmul.f32 %v846_v38, %v805_v21 }
 0x906   :  { %v871_v39 = vpack.c.bf16 %v4285_v28, %v4285_v28 }
 0x908   :  { %873 = vrot.lane.b32.xlu0 %v871_v39, %s3940_s9 }
 0x974   :  { %v853_v40 = vpop.permute.xlu1 %852 }
 0x975   :  { %3082 = vmatmul.msk.bf16.vlgmr.msra.gmra.mxu2 %vm342_vm9, %v853_v40 }
 0x97a   :  { %v874_v41 = vpop.permute.xlu0 %873 }
 0x97b   :  { %3083 = vmatmul.msk.bf16.vlgmr.msra.gmra.mxu3 %vm342_vm9, %v874_v41 }
 0x9f8   :  { %v866_v43 = vpop.f32.mrf.mxu2 }
 0x9f9   :  { %v870_v44 = vadd.f32 %v866_v43, %v4294_v42 }
 0x9fb   :  { %3358 = vtanh.f32 %v870_v44  ;;  %v3084_v47 = vmul.f32 -1.442695, %v870_v44 }
 0x9fe   :  { %v887_v1 = vpop.f32.mrf.mxu3 }
 0x9ff   :  { %v892_v7 = vrot.slane %v887_v1, 2 }
 0xa00   :  { %v868_v2 = vpop.f32.mrf.mxu2 }
 0xa01   :  { %v3359_v8 = vpop.eup %3358  ;;  %v894_v45 = vadd.f32 %v892_v7, %v4159_v12 }
 0xa02   :  { %940 = vrot.lane.b32.xlu2 %v3359_v8, %s3953_s5 }
 0xa03   :  { %3360 = vtanh.f32 %v894_v45  ;;  %v3085_v50 = vmul.f32 -1.442695, %v894_v45 }
 0xa04   :  { %3362 = vpow2.f32 %v3084_v47 }
 0xa06   :  { %v889_v46 = vpop.f32.mrf.mxu3 }
 0xa09   :  { %v3361_v15 = vpop.eup %3360 }
 0xa0a   :  { %954 = vrot.lane.b32.xlu0 %v3361_v15, %s3953_s5  ;;  %v3363_v13 = vpop.eup %3362 }
 0xa0b   :  { %v898_v18 = vadd.f32 1.0, %v3363_v13 }
 0xa0d   :  { %3364 = vrcp.f32 %v898_v18  ;;  %v910_v53 = vand.u32 2147483648, %v898_v18  ;;  %vm904_vm4 = vweird.f32 %v898_v18  ;;  %v908_v54 = vand.u32 2147483647, %v898_v18 }
 0xa0e   :  { %3366 = vpow2.f32 %v3085_v50 }
 0xa0f   :  { %v911_v57 = vor.u32 1.1754944e-38, %v910_v53  ;;  %vm909_vm6 = vcmp.eq.f32.partialorder %v908_v54, 8.507059e+37 }
 0xa13   :  { %v3365_v48 = vpop.eup %3364 }
 0xa14   :  { %v900_v49 = vmul.f32 %v3365_v48, %v898_v18  ;;  %vm905_vm3 = vweird.f32 %v3365_v48  ;;  %v3367_v55 = vpop.eup %3366 }
 0xa15   :  { %vm906_vm5 = vmor %vm904_vm4, %vm905_vm3  ;;  %v917_v58 = vadd.f32 1.0, %v3367_v55 }
 0xa16   :  { %v901_v20 = vsub.f32 1.0, %v900_v49 }
 0xa17   :  { %3368 = vrcp.f32 %v917_v58  ;;  %v929_v17 = vand.u32 2147483648, %v917_v58  ;;  %vm923_vm8 = vweird.f32 %v917_v58  ;;  %v927_v59 = vand.u32 2147483647, %v917_v58 }
 0xa18   :  { %v902_v51 = vmul.f32 %v3365_v48, %v901_v20 }
 0xa19   :  { %v930_v22 = vor.u32 1.1754944e-38, %v929_v17  ;;  %vm928_vm11 = vcmp.eq.f32.partialorder %v927_v59, 8.507059e+37 }
 0xa1a   :  { %v903_v52 = vadd.f32 %v3365_v48, %v902_v51 }
 0xa1c   :  { %v907_v56 = vsel %vm906_vm5, %v3365_v48, %v903_v52 }
 0xa1d   :  { %v912_v60 = vsel %vm909_vm6, %v911_v57, %v907_v56  ;;  %v3369_v0 = vpop.eup %3368 }
 0xa1e   :  { %v919_v5 = vmul.f32 %v3369_v0, %v917_v58  ;;  %vm924_vm7 = vweird.f32 %v3369_v0  ;;  %v938_v3 = vmul.f32 %v936_v29, %v912_v60 }
 0xa1f   :  { %vm925_vm10 = vmor %vm923_vm8, %vm924_vm7 }
 0xa20   :  { %v920_v6 = vsub.f32 1.0, %v919_v5 }
 0xa22   :  { %v921_v11 = vmul.f32 %v3369_v0, %v920_v6 }
 0xa24   :  { %v922_v14 = vadd.f32 %v3369_v0, %v921_v11 }
 0xa26   :  { %v926_v21 = vsel %vm925_vm10, %v3369_v0, %v922_v14 }
 0xa27   :  { %v931_v25 = vsel %vm928_vm11, %v930_v22, %v926_v21 }
 0xa28   :  { %v952_v63 = vmul.f32 %v950_v34, %v931_v25 }
 0xa5c   :  { %v941_v61 = vpop.permute.xlu2 %940 }
 0xa5d   :  { %v943_v62 = vmul.f32 %v941_v61, %v912_v60 }
 0xa5f   :  { %945 = vrot.lane.b32.xlu1 %v943_v62, %s3953_s5 }
 0xa7c   :  { %v955_v24 = vpop.permute.xlu0 %954 }
 0xa7d   :  { %v957_v26 = vmul.f32 %v955_v24, %v931_v25 }
 0xa7f   :  { %959 = vrot.lane.b32.xlu2 %v957_v26, %s3953_s5 }
 0xad1   :  { %v946_v31 = vpop.permute.xlu1 %945 }
 0xad2   :  { %v4303_v32 = vadd.f32 %v946_v31, %v938_v3 }
 0xad4   :  { %3370 = vtanh.f32 %v4303_v32 }
 0xad9   :  { %v960_v36 = vpop.permute.xlu2 %959 }
 0xada   :  { %v3371_v37 = vpop.eup %3370  ;;  %v4307_v38 = vadd.f32 %v960_v36, %v952_v63 }
 0xadb   :  { %965 = vrot.lane.b32.xlu0 %v3371_v37, %s3953_s5  ;;  %v1065_v37 = vrot.slane %v4303_v32, 6 }
 0xadc   :  { %3372 = vtanh.f32 %v4307_v38 }
 0xae2   :  { %v3373_v39 = vpop.eup %3372 }
 0xae3   :  { %971 = vrot.lane.b32.xlu1 %v3373_v39, %s3953_s5 }
 0xb4d   :  { %v966_v27 = vpop.permute.xlu0 %965 }
 0xb4e   :  { %v4312_v40 = vmul.f32 %v966_v27, %v912_v60 }
 0xb50   :  { %v975_v41 = vpack.c.bf16 %v4312_v40, %v4312_v40 }
 0xb52   :  { %977 = vrot.lane.b32.xlu2 %v975_v41, %s3940_s9 }
 0xb55   :  { %v972_v16 = vpop.permute.xlu1 %971 }
 0xb56   :  { %v4317_v43 = vmul.f32 %v972_v16, %v931_v25  ;;  %v1079_v16 = vrot.slane %v4307_v38, 2 }
 0xb58   :  { %v999_v44 = vpack.c.bf16 %v4317_v43, %v4317_v43 }
 0xb5a   :  { %v1001_v1 = vrot.slane %v999_v44, 3 }
 0xb5c   :  { %1002 = vrot.lane.b32.xlu0 %v1001_v1, %s3940_s9 }
 0xbac   :  { %v978_v7 = vpop.permute.xlu2 %977 }
 0xbad   :  { %3086 = vmatmul.msk.bf16.vlgmr.msrb.gmra.mxu0 %vm342_vm9, %v978_v7 }
 0xbce   :  { %v1003_v2 = vpop.permute.xlu0 %1002 }
 0xbcf   :  { %3087 = vmatmul.msk.bf16.vlgmr.msrb.gmra.mxu1 %vm342_vm9, %v1003_v2 }
 0xc2a   :  { %v991_v8 = vpop.f32.mrf.mxu0 }
 0xc2b   :  { %v996_v45 = vrot.slane %v991_v8, 6 }
 0xc2d   :  { %v998_v46 = vadd.f32 %v996_v45, %v4294_v42 }
 0xc2f   :  { %3374 = vtanh.f32 %v998_v46  ;;  %v3088_v50 = vmul.f32 -1.442695, %v998_v46 }
 0xc32   :  { %v993_v15 = vpop.f32.mrf.mxu0 }
 0xc35   :  { %v3375_v47 = vpop.eup %3374 }
 0xc36   :  { %1069 = vrot.lane.b32.xlu1 %v3375_v47, %s3953_s5 }
 0xc4c   :  { %v1016_v13 = vpop.f32.mrf.mxu1 }
 0xc4d   :  { %v1021_v18 = vrot.slane %v1016_v13, 4 }
 0xc4f   :  { %v1023_v48 = vadd.f32 %v1021_v18, %v4159_v12 }
 0xc51   :  { %3376 = vtanh.f32 %v1023_v48  ;;  %v3089_v52 = vmul.f32 -1.442695, %v1023_v48 }
 0xc52   :  { %3378 = vpow2.f32 %v3088_v50 }
 0xc53   :  { %3380 = vpow2.f32 %v3089_v52 }
 0xc54   :  { %v1018_v49 = vpop.f32.mrf.mxu1 }
 0xc57   :  { %v3377_v20 = vpop.eup %3376 }
 0xc58   :  { %1083 = vrot.lane.b32.xlu2 %v3377_v20, %s3953_s5  ;;  %v3379_v51 = vpop.eup %3378 }
 0xc59   :  { %v1027_v53 = vadd.f32 1.0, %v3379_v51  ;;  %v3381_v54 = vpop.eup %3380 }
 0xc5a   :  { %v1046_v56 = vadd.f32 1.0, %v3381_v54 }
 0xc5b   :  { %3382 = vrcp.f32 %v1027_v53  ;;  %v1039_v5 = vand.u32 2147483648, %v1027_v53  ;;  %vm1033_vm13 = vweird.f32 %v1027_v53  ;;  %v1037_v6 = vand.u32 2147483647, %v1027_v53 }
 0xc5c   :  { %3384 = vrcp.f32 %v1046_v56  ;;  %v1058_v26 = vand.u32 2147483648, %v1046_v56  ;;  %vm1052_vm1 = vweird.f32 %v1046_v56  ;;  %v1056_v29 = vand.u32 2147483647, %v1046_v56 }
 0xc5d   :  { %v1040_v17 = vor.u32 1.1754944e-38, %v1039_v5  ;;  %vm1038_vm15 = vcmp.eq.f32.partialorder %v1037_v6, 8.507059e+37 }
 0xc5e   :  { %v1059_v31 = vor.u32 1.1754944e-38, %v1058_v26  ;;  %vm1057_vm3 = vcmp.eq.f32.partialorder %v1056_v29, 8.507059e+37 }
 0xc61   :  { %v3383_v55 = vpop.eup %3382 }
 0xc62   :  { %v1029_v57 = vmul.f32 %v3383_v55, %v1027_v53  ;;  %v3385_v60 = vpop.eup %3384  ;;  %vm1034_vm12 = vweird.f32 %v3383_v55 }
 0xc63   :  { %v1048_v62 = vmul.f32 %v3385_v60, %v1046_v56  ;;  %vm1035_vm14 = vmor %vm1033_vm13, %vm1034_vm12  ;;  %vm1053_vm0 = vweird.f32 %v3385_v60 }
 0xc64   :  { %v1030_v58 = vsub.f32 1.0, %v1029_v57  ;;  %vm1054_vm2 = vmor %vm1052_vm1, %vm1053_vm0 }
 0xc65   :  { %v1049_v11 = vsub.f32 1.0, %v1048_v62 }
 0xc66   :  { %v1031_v61 = vmul.f32 %v3383_v55, %v1030_v58 }
 0xc67   :  { %v1050_v59 = vmul.f32 %v3385_v60, %v1049_v11 }
 0xc68   :  { %v1032_v0 = vadd.f32 %v3383_v55, %v1031_v61 }
 0xc69   :  { %v1051_v25 = vadd.f32 %v3385_v60, %v1050_v59 }
 0xc6a   :  { %v1036_v14 = vsel %vm1035_vm14, %v3383_v55, %v1032_v0 }
 0xc6b   :  { %v1041_v22 = vsel %vm1038_vm15, %v1040_v17, %v1036_v14  ;;  %v1055_v3 = vsel %vm1054_vm2, %v3385_v60, %v1051_v25 }
 0xc6c   :  { %v1060_v34 = vsel %vm1057_vm3, %v1059_v31, %v1055_v3  ;;  %v1067_v39 = vmul.f32 %v1065_v37, %v1041_v22 }
 0xc6d   :  { %v1081_v1 = vmul.f32 %v1079_v16, %v1060_v34 }
 0xca8   :  { %v1070_v21 = vpop.permute.xlu1 %1069 }
 0xca9   :  { %v1072_v24 = vmul.f32 %v1070_v21, %v1041_v22 }
 0xcab   :  { %1074 = vrot.lane.b32.xlu0 %v1072_v24, %s3953_s5 }
 0xcb2   :  { %v1084_v63 = vpop.permute.xlu2 %1083 }
 0xcb3   :  { %v1086_v36 = vmul.f32 %v1084_v63, %v1060_v34 }
 0xcb5   :  { %1088 = vrot.lane.b32.xlu1 %v1086_v36, %s3953_s5 }
 0xd1d   :  { %v1075_v27 = vpop.permute.xlu0 %1074 }
 0xd1e   :  { %v4331_v41 = vadd.f32 %v1075_v27, %v1067_v39 }
 0xd20   :  { %3386 = vtanh.f32 %v4331_v41 }
 0xd26   :  { %v3387_v44 = vpop.eup %3386 }
 0xd27   :  { %1094 = vrot.lane.b32.xlu2 %v3387_v44, %s3953_s5  ;;  %v1089_v7 = vpop.permute.xlu1 %1088 }
 0xd28   :  { %v4336_v2 = vadd.f32 %v1089_v7, %v1081_v1 }
 0xd2a   :  { %3388 = vtanh.f32 %v4336_v2 }
 0xd30   :  { %v3389_v8 = vpop.eup %3388 }
 0xd31   :  { %1100 = vrot.lane.b32.xlu0 %v3389_v8, %s3953_s5 }
 0xd81   :  { %v1095_v32 = vpop.permute.xlu2 %1094 }
 0xd82   :  { %v4340_v45 = vmul.f32 %v1095_v32, %v1041_v22 }
 0xd84   :  { %v1104_v46 = vpack.c.bf16 %v4340_v45, %v4340_v45 }
 0xd86   :  { %v1106_v15 = vrot.slane %v1104_v46, 1  ;;  %v1195_v46 = vrot.slane %v4331_v41, 6 }
 0xd88   :  { %1107 = vrot.lane.b32.xlu1 %v1106_v15, %s3940_s9 }
 0xda3   :  { %v1101_v38 = vpop.permute.xlu0 %1100 }
 0xda4   :  { %v4345_v47 = vmul.f32 %v1101_v38, %v1060_v34 }
 0xda6   :  { %v1129_v13 = vpack.c.bf16 %v4345_v47, %v4345_v47 }
 0xda8   :  { %v1131_v18 = vrot.slane %v1129_v13, 2 }
 0xdaa   :  { %1132 = vrot.lane.b32.xlu2 %v1131_v18, %s3940_s9 }
 0xdfa   :  { %v1108_v48 = vpop.permute.xlu1 %1107 }
 0xdfb   :  { %3090 = vmatmul.msk.bf16.vlgmr.msrb.gmra.mxu2 %vm342_vm9, %v1108_v48  ;;  %v1209_v48 = vrot.slane %v4336_v2, 2 }
 0xe04   :  { %v1133_v49 = vpop.permute.xlu2 %1132 }
 0xe05   :  { %3091 = vmatmul.msk.bf16.vlgmr.msrb.gmra.mxu3 %vm342_vm9, %v1133_v49 }
 0xe7e   :  { %v1121_v20 = vpop.f32.mrf.mxu2 }
 0xe7f   :  { %v1126_v50 = vrot.slane %v1121_v20, 4 }
 0xe81   :  { %v1128_v51 = vadd.f32 %v1126_v50, %v4294_v42 }
 0xe83   :  { %3390 = vtanh.f32 %v1128_v51  ;;  %v3092_v60 = vmul.f32 -1.442695, %v1128_v51 }
 0xe86   :  { %v1123_v52 = vpop.f32.mrf.mxu2 }
 0xe88   :  { %v1146_v53 = vpop.f32.mrf.mxu3 }
 0xe89   :  { %v3391_v54 = vpop.eup %3390  ;;  %v1151_v55 = vrot.slane %v1146_v53, 6 }
 0xe8a   :  { %1199 = vrot.lane.b32.xlu0 %v3391_v54, %s3953_s5 }
 0xe8b   :  { %v1153_v56 = vadd.f32 %v1151_v55, %v4159_v12 }
 0xe8d   :  { %3392 = vtanh.f32 %v1153_v56  ;;  %v3093_v62 = vmul.f32 -1.442695, %v1153_v56 }
 0xe8e   :  { %3394 = vpow2.f32 %v3092_v60 }
 0xe8f   :  { %3396 = vpow2.f32 %v3093_v62 }
 0xe90   :  { %v1148_v57 = vpop.f32.mrf.mxu3 }
 0xe93   :  { %v3393_v58 = vpop.eup %3392 }
 0xe94   :  { %1213 = vrot.lane.b32.xlu1 %v3393_v58, %s3953_s5  ;;  %v3395_v61 = vpop.eup %3394 }
 0xe95   :  { %v1157_v0 = vadd.f32 1.0, %v3395_v61  ;;  %v3397_v5 = vpop.eup %3396 }
 0xe96   :  { %v1176_v11 = vadd.f32 1.0, %v3397_v5 }
 0xe97   :  { %3398 = vrcp.f32 %v1157_v0  ;;  %v1169_v25 = vand.u32 2147483648, %v1157_v0  ;;  %vm1163_vm5 = vweird.f32 %v1157_v0  ;;  %v1167_v26 = vand.u32 2147483647, %v1157_v0 }
 0xe98   :  { %3400 = vrcp.f32 %v1176_v11  ;;  %v1188_v27 = vand.u32 2147483648, %v1176_v11  ;;  %vm1182_vm10 = vweird.f32 %v1176_v11  ;;  %v1186_v16 = vand.u32 2147483647, %v1176_v11 }
 0xe99   :  { %v1170_v31 = vor.u32 1.1754944e-38, %v1169_v25  ;;  %vm1168_vm7 = vcmp.eq.f32.partialorder %v1167_v26, 8.507059e+37 }
 0xe9a   :  { %v1189_v1 = vor.u32 1.1754944e-38, %v1188_v27  ;;  %vm1187_vm12 = vcmp.eq.f32.partialorder %v1186_v16, 8.507059e+37 }
 0xe9d   :  { %v3399_v6 = vpop.eup %3398 }
 0xe9e   :  { %v1159_v14 = vmul.f32 %v3399_v6, %v1157_v0  ;;  %v3401_v59 = vpop.eup %3400  ;;  %vm1164_vm4 = vweird.f32 %v3399_v6 }
 0xe9f   :  { %v1178_v22 = vmul.f32 %v3401_v59, %v1176_v11  ;;  %vm1165_vm6 = vmor %vm1163_vm5, %vm1164_vm4  ;;  %vm1183_vm8 = vweird.f32 %v3401_v59  ;;  %vm1391_vm5 = vcmask 261126  }
 0xea0   :  { %v1160_v17 = vsub.f32 1.0, %v1159_v14  ;;  %vm1184_vm11 = vmor %vm1182_vm10, %vm1183_vm8  ;;  %vm1385_vm8 = vcmask 259076  }
 0xea1   :  { %v1179_v29 = vsub.f32 1.0, %v1178_v22 }
 0xea2   :  { %v1161_v21 = vmul.f32 %v3399_v6, %v1160_v17 }
 0xea3   :  { %v1180_v34 = vmul.f32 %v3401_v59, %v1179_v29 }
 0xea4   :  { %v1162_v24 = vadd.f32 %v3399_v6, %v1161_v21 }
 0xea5   :  { %v1181_v39 = vadd.f32 %v3401_v59, %v1180_v34 }
 0xea6   :  { %v1166_v3 = vsel %vm1165_vm6, %v3399_v6, %v1162_v24  ;;  %vm1379_vm6 = vcmask 257026  }
 0xea7   :  { %v1171_v36 = vsel %vm1168_vm7, %v1170_v31, %v1166_v3  ;;  %v1185_v44 = vsel %vm1184_vm11, %v3401_v59, %v1181_v39  ;;  %vm1373_vm7 = vcmask 254976  }
 0xea8   :  { %v1190_v8 = vsel %vm1187_vm12, %v1189_v1, %v1185_v44  ;;  %v1197_v15 = vmul.f32 %v1195_v46, %v1171_v36 }
 0xea9   :  { %v1211_v49 = vmul.f32 %v1209_v48, %v1190_v8 }
 0xefc   :  { %v1200_v63 = vpop.permute.xlu0 %1199 }
 0xefd   :  { %v1202_v37 = vmul.f32 %v1200_v63, %v1171_v36 }
 0xeff   :  { %1204 = vrot.lane.b32.xlu2 %v1202_v37, %s3953_s5 }
 0xf06   :  { %v1214_v7 = vpop.permute.xlu1 %1213 }
 0xf07   :  { %v1216_v32 = vmul.f32 %v1214_v7, %v1190_v8 }
 0xf09   :  { %1218 = vrot.lane.b32.xlu0 %v1216_v32, %s3953_s5 }
 0xf59   :  { %v1205_v38 = vpop.permute.xlu2 %1204 }
 0xf5a   :  { %v4359_v13 = vadd.f32 %v1205_v38, %v1197_v15 }
 0xf5c   :  { %3402 = vtanh.f32 %v4359_v13 }
 0xf62   :  { %v3403_v18 = vpop.eup %3402 }
 0xf63   :  { %1224 = vrot.lane.b32.xlu1 %v3403_v18, %s3953_s5 }
 0xf7b   :  { %v1219_v20 = vpop.permute.xlu0 %1218 }
 0xf7c   :  { %v4364_v50 = vadd.f32 %v1219_v20, %v1211_v49 }
 0xf7e   :  { %3404 = vtanh.f32 %v4364_v50 }
 0xf84   :  { %v3405_v51 = vpop.eup %3404 }
 0xf85   :  { %1230 = vrot.lane.b32.xlu2 %v3405_v51, %s3953_s5 }
 0xfd5   :  { %v1225_v41 = vpop.permute.xlu1 %1224 }
 0xfd6   :  { %v4368_v52 = vmul.f32 %v1225_v41, %v1171_v36  ;;  %v1364_v41 = vadd.f32 %v4317_v43, %v4280_v35 }
 0xfd8   :  { %v1234_v53 = vpack.c.bf16 %v4368_v52, %v4368_v52 }
 0xfda   :  { %v1236_v54 = vrot.slane %v1234_v53, 2  ;;  %v1322_v53 = vrot.slane %v4359_v13, 6  ;;  %v1365_v13 = vadd.f32 %v4312_v40, %v4285_v28 }
 0xfdc   :  { %1237 = vrot.lane.b32.xlu0 %v1236_v54, %s3940_s9 }
 0xfdf   :  { %v1231_v55 = vpop.permute.xlu2 %1230 }
 0xfe0   :  { %v4373_v2 = vmul.f32 %v1231_v55, %v1190_v8 }
 0xfe2   :  { %v1259_v56 = vpack.c.bf16 %v4373_v2, %v4373_v2  ;;  %v1362_v35 = vadd.f32 %v4373_v2, %v4216_v19  ;;  %v1366_v19 = vadd.f32 %v4340_v45, %v4253_v33 }
 0xfe4   :  { %v1261_v57 = vrot.slane %v1259_v56, 1 }
 0xfe6   :  { %1262 = vrot.lane.b32.xlu1 %v1261_v57, %s3940_s9  ;;  %v1336_v57 = vrot.slane %v4364_v50, 2  ;;  %v1363_v50 = vadd.f32 %v4345_v47, %v4248_v30 }
0x104e   :  { %v1238_v58 = vpop.permute.xlu0 %1237 }
0x104f   :  { %3094 = vmatmul.msk.bf16.vlgmr.msra.gmra.mxu0 %vm342_vm9, %v1238_v58 }
0x1058   :  { %v1263_v60 = vpop.permute.xlu1 %1262 }
0x1059   :  { %3095 = vmatmul.msk.bf16.vlgmr.msra.gmra.mxu1 %vm342_vm9, %v1263_v60 }
0x10cc   :  { %v1251_v61 = vpop.f32.mrf.mxu0 }
0x10cd   :  { %v1256_v62 = vrot.slane %v1251_v61, 2 }
0x10cf   :  { %v1258_v0 = vadd.f32 %v1256_v62, %v4294_v42 }
0x10d1   :  { %3406 = vtanh.f32 %v1258_v0  ;;  %v3096_v21 = vmul.f32 -1.442695, %v1258_v0 }
0x10d4   :  { %v1253_v5 = vpop.f32.mrf.mxu0 }
0x10d6   :  { %v1276_v6 = vpop.f32.mrf.mxu1 }
0x10d7   :  { %v3407_v11 = vpop.eup %3406  ;;  %v1280_v14 = vadd.f32 %v1276_v6, %v4159_v12 }
0x10d8   :  { %1326 = vrot.lane.b32.xlu2 %v3407_v11, %s3953_s5 }
0x10d9   :  { %3408 = vtanh.f32 %v1280_v14  ;;  %v3097_v29 = vmul.f32 -1.442695, %v1280_v14  ;;  %v3243_v14 = vld [vmem:[#allocation14 + $0x8] sm:$0xff] }
0x10da   :  { %3410 = vpow2.f32 %v3096_v21  ;;  %1479 = vmatpush.bf16.msra.mxu3 %v3243_v14  ;;  %v4429_v21 = vld [vmem:[#allocation15] sm:$0xff] }
0x10de   :  { %v1278_v17 = vpop.f32.mrf.mxu1 }
0x10df   :  { %v3409_v59 = vpop.eup %3408  ;;  %v3241_v17 = vld [vmem:[%s4808_s7 + $0x8] sm:$0xff] }
0x10e0   :  { %1340 = vrot.lane.b32.xlu0 %v3409_v59, %s3953_s5  ;;  %v3411_v22 = vpop.eup %3410  ;;  %v4420_v59 = vld [vmem:[#allocation15 + $0x8] sm:$0xff]  ;;  %1445 = vmatpush.bf16.msra.mxu2 %v3241_v17 }
0x10e1   :  { %v1284_v24 = vadd.f32 1.0, %v3411_v22  ;;  %1539 = vmatpush.bf16.msrb.mxu1 %v4420_v59  ;;  %v4433_v22 = vld [vmem:[#allocation11] sm:$0xff] }
0x10e3   :  { %3412 = vrcp.f32 %v1284_v24  ;;  %v1296_v12 = vand.u32 2147483648, %v1284_v24  ;;  %vm1290_vm14 = vweird.f32 %v1284_v24  ;;  %v1294_v34 = vand.u32 2147483647, %v1284_v24 }
0x10e4   :  { %3414 = vpow2.f32 %v3097_v29 }
0x10e5   :  { %v1297_v37 = vor.u32 1.1754944e-38, %v1296_v12  ;;  %vm1295_vm0 = vcmp.eq.f32.partialorder %v1294_v34, 8.507059e+37  ;;  %1540 = vmatpush.bf16.msrb.mxu1 %v4429_v21 }
0x10e8   :  { %1541 = vmatmul.bf16.vlgmr.msrb.gmra.mxu1 %v3952_v9 }
0x10e9   :  { %v3413_v25 = vpop.eup %3412  ;;  %1792 = vmatpush.bf16.msra.mxu1 %v4420_v59 }
0x10ea   :  { %v1286_v42 = vmul.f32 %v3413_v25, %v1284_v24  ;;  %vm1291_vm13 = vweird.f32 %v3413_v25  ;;  %v3415_v63 = vpop.eup %3414 }
0x10eb   :  { %vm1292_vm15 = vmor %vm1290_vm14, %vm1291_vm13  ;;  %v1303_v39 = vadd.f32 1.0, %v3415_v63  ;;  %v4458_v63 = vld [vmem:[#allocation12] ss:$0 sm:$0xff] }
0x10ec   :  { %v1287_v26 = vsub.f32 1.0, %v1286_v42 }
0x10ed   :  { %3416 = vrcp.f32 %v1303_v39  ;;  %v1315_v15 = vand.u32 2147483648, %v1303_v39  ;;  %vm1309_vm2 = vweird.f32 %v1303_v39  ;;  %v1313_v38 = vand.u32 2147483647, %v1303_v39  ;;  %1793 = vmatpush.bf16.msra.mxu1 %v4429_v21 }
0x10ee   :  { %v1288_v3 = vmul.f32 %v3413_v25, %v1287_v26 }
0x10ef   :  { %v1316_v48 = vor.u32 1.1754944e-38, %v1315_v15  ;;  %vm1314_vm4 = vcmp.eq.f32.partialorder %v1313_v38, 8.507059e+37 }
0x10f0   :  { %v1289_v31 = vadd.f32 %v3413_v25, %v1288_v3 }
0x10f1   :  { %2045 = vmatpush.bf16.msrb.mxu1 %v4420_v59 }
0x10f2   :  { %v1293_v36 = vsel %vm1292_vm15, %v3413_v25, %v1289_v31 }
0x10f3   :  { %v1298_v27 = vsel %vm1295_vm0, %v1297_v37, %v1293_v36  ;;  %v3417_v1 = vpop.eup %3416  ;;  %v3287_v36 = vld [vmem:[#allocation17] ss:$0 sm:$0xff] }
0x10f4   :  { %v1305_v7 = vmul.f32 %v3417_v1, %v1303_v39  ;;  %vm1310_vm1 = vweird.f32 %v3417_v1  ;;  %v1324_v54 = vmul.f32 %v1322_v53, %v1298_v27 }
0x10f5   :  { %vm1311_vm3 = vmor %vm1309_vm2, %vm1310_vm1  ;;  %2046 = vmatpush.bf16.msrb.mxu1 %v4429_v21 }
0x10f6   :  { %v1306_v8 = vsub.f32 1.0, %v1305_v7 }
0x10f8   :  { %v1307_v32 = vmul.f32 %v3417_v1, %v1306_v8 }
0x10fa   :  { %v1308_v46 = vadd.f32 %v3417_v1, %v1307_v32 }
0x10fc   :  { %v1312_v18 = vsel %vm1311_vm3, %v3417_v1, %v1308_v46 }
0x10fd   :  { %v1317_v20 = vsel %vm1314_vm4, %v1316_v48, %v1312_v18 }
0x10fe   :  { %v1338_v58 = vmul.f32 %v1336_v57, %v1317_v20 }
0x1132   :  { %v1327_v16 = vpop.permute.xlu2 %1326 }
0x1133   :  { %v1329_v44 = vmul.f32 %v1327_v16, %v1298_v27 }
0x1135   :  { %1331 = vrot.lane.b32.xlu1 %v1329_v44, %s3953_s5 }
0x1152   :  { %v1341_v49 = vpop.permute.xlu0 %1340 }
0x1153   :  { %v1343_v51 = vmul.f32 %v1341_v49, %v1317_v20 }
0x1155   :  { %1345 = vrot.lane.b32.xlu2 %v1343_v51, %s3953_s5 }
0x115d   :  { %1388 = vrot.lane.b32.xlu2 %v1364_v41, %s3940_s9 }
0x11a7   :  { %v1332_v55 = vpop.permute.xlu1 %1331 }
0x11a8   :  { %v1334_v56 = vadd.f32 %v1332_v55, %v1324_v54 }
0x11aa   :  { %3418 = vtanh.f32 %v1334_v56 }
0x11af   :  { %v1346_v60 = vpop.permute.xlu2 %1345 }
0x11b0   :  { %v3419_v61 = vpop.eup %3418  ;;  %v1348_v62 = vadd.f32 %v1346_v60, %v1338_v58 }
0x11b1   :  { %1351 = vrot.lane.b32.xlu0 %v3419_v61, %s3953_s5 }
0x11b2   :  { %3420 = vtanh.f32 %v1348_v62 }
0x11b7   :  { %v1389_v0 = vpop.permute.xlu2 %1388 }
0x11b8   :  { %v3421_v43 = vpop.eup %3420  ;;  %1392 = vst.msk [vmem:[#allocation2] sm:$0xc0] %vm1391_vm5, %v1389_v0 }
0x11b9   :  { %1376 = vrot.lane.b32.xlu0 %v1362_v35, %s3940_s9  ;;  %1357 = vrot.lane.b32.xlu1 %v3421_v43, %s3953_s5 }
0x11c1   :  { %1394 = vrot.lane.b32.xlu0 %v1365_v13, %s3940_s9  ;;  %1382 = vrot.lane.b32.xlu1 %v1363_v50, %s3940_s9 }
0x11c9   :  { %1399 = vrot.lane.b32.xlu1 %v1366_v19, %s3940_s9 }
0x1223   :  { %v1352_v2 = vpop.permute.xlu0 %1351 }
0x1224   :  { %v1354_v5 = vmul.f32 %v1352_v2, %v1298_v27 }
0x1226   :  { %v1368_v6 = vadd.f32 %v1354_v5, %v4187_v10  ;;  %v1367_v10 = vadd.f32 %v4368_v52, %v4221_v23  ;;  %v3240_v23 = vld [vmem:[%s4808_s7] sm:$0xff]  ;;  %v4427_v52 = vld [vmem:[#allocation11 + $0x8] sm:$0xff]  ;;  %s3954_s7 = smov 96  }
0x1227   :  { %1446 = vmatpush.bf16.msra.mxu2 %v3240_v23  ;;  %1513 = vmatpush.bf16.msrb.mxu0 %v4427_v52 }
0x1228   :  { %1409 = vrot.lane.b32.xlu0 %v1368_v6, %s3940_s9 }
0x122b   :  { %v1377_v28 = vpop.permute.xlu0 %1376  ;;  %v1358_v40 = vpop.permute.xlu1 %1357  ;;  %1637 = vmatpush.bf16.msrb.mxu2 %v4427_v52  ;;  %1514 = vmatpush.bf16.msrb.mxu0 %v4433_v22 }
0x122c   :  { %1380 = vst.msk [vmem:[#allocation2] sm:$0xc] %vm1379_vm6, %v1377_v28  ;;  %v1360_v30 = vmul.f32 %v1358_v40, %v1317_v20 }
0x122e   :  { %v1361_v47 = vadd.f32 %v1360_v30, %v4182_v4  ;;  %v3242_v4 = vld [vmem:[#allocation14] sm:$0xff]  ;;  %1515 = vmatmul.bf16.vlgmr.msrb.gmra.mxu0 %v3952_v9  ;;  %v1542_v9 = vpop.f32.mrf.mxu1 }
0x122f   :  { %1480 = vmatpush.bf16.msra.mxu3 %v3242_v4  ;;  %1638 = vmatpush.bf16.msrb.mxu2 %v4433_v22  ;;  %v1547_v1 = vrot.slane %v1542_v9, 2 }
0x1230   :  { %1370 = vrot.lane.b32.xlu2 %v1361_v47, %s3940_s9  ;;  %1767 = vmatpush.bf16.msra.mxu0 %v4427_v52 }
0x1233   :  { %v1395_v33 = vpop.permute.xlu0 %1394  ;;  %v1383_v45 = vpop.permute.xlu1 %1382  ;;  %1662 = vmatpush.bf16.msrb.mxu3 %v4420_v59 }
0x1234   :  { %1397 = vst.msk [vmem:[#allocation2 + $0x8] sm:$0x3] %vm1373_vm7, %v1395_v33  ;;  %1768 = vmatpush.bf16.msra.mxu0 %v4433_v22 }
0x1235   :  { %1386 = vst.msk [vmem:[#allocation2] sm:$0x30] %vm1385_vm8, %v1383_v45 }
0x1236   :  { %v1544_v12 = vpop.f32.mrf.mxu1 }
0x1237   :  { %1663 = vmatpush.bf16.msrb.mxu3 %v4429_v21 }
0x1238   :  { %1404 = vrot.lane.b32.xlu2 %v1367_v10, %s3940_s9  ;;  %2024 = vmatpush.bf16.msrb.mxu0 %v4427_v52 }
0x123b   :  { %v1400_v11 = vpop.permute.xlu1 %1399 }
0x123c   :  { %1402 = vst.msk [vmem:[#allocation2 + $0x8] sm:$0xc] %vm1379_vm6, %v1400_v11  ;;  %2025 = vmatpush.bf16.msrb.mxu0 %v4433_v22 }
0x128a   :  { %v1371_v24 = vpop.permute.xlu2 %1370 }
0x128b   :  { %1374 = vst.msk [vmem:[#allocation2] sm:$0x3] %vm1373_vm7, %v1371_v24 }
0x1292   :  { %v1405_v25 = vpop.permute.xlu2 %1404  ;;  %v1413_v26 = vld [vmem:[#allocation2] sm:$0xff] }
0x1293   :  { %1407 = vst.msk [vmem:[#allocation2 + $0x8] sm:$0x30] %vm1385_vm8, %v1405_v25 }
0x129a   :  { %v1410_v42 = vpop.permute.xlu0 %1409 }
0x129b   :  { %1412 = vst.msk [vmem:[#allocation2 + $0x8] sm:$0xc0] %vm1391_vm5, %v1410_v42 }
0x12a2   :  { %v1414_v29 = vld [vmem:[#allocation2 + $0x8] sm:$0xff] }
0x12a3   :  { %v1415_v3 = vpack.c.bf16 %v1414_v29, %v1413_v26 }
0x12a5   :  { %3106 = vmatmul.msk.bf16.vlgmr.msra.gmra.mxu2 %vm342_vm9, %v1415_v3  ;;  %3115 = vmatmul.msk.bf16.vlgmr.msra.gmra.mxu3 %vm342_vm9, %v1415_v3 }
0x12a6   :  { %1897 = vmatpush.bf16.msra.mxu2 %v4427_v52  ;;  %1922 = vmatpush.bf16.msra.mxu3 %v4420_v59 }
0x12aa   :  { %1898 = vmatpush.bf16.msra.mxu2 %v4433_v22  ;;  %1923 = vmatpush.bf16.msra.mxu3 %v4429_v21 }
0x12ab   :  { %v1516_v31 = vpop.f32.mrf.mxu0 }
0x12b3   :  { %v1518_v34 = vpop.f32.mrf.mxu0 }
0x1328   :  { %v1448_v37 = vpop.f32.mrf.mxu2  ;;  %v1482_v39 = vpop.f32.mrf.mxu3 }
0x1329   :  { %v4461_v27 = vadd.f32 %v4458_v63, %v1448_v37  ;;  %v4463_v16 = vadd.f32 %v3287_v36, %v1482_v39 }
0x132b   :  { %v1520_v44 = vadd.f32 %v1516_v31, %v4461_v27 }
0x132d   :  { %3422 = vtanh.f32 %v1520_v44  ;;  %v3132_v38 = vmul.f32 -1.442695, %v1520_v44 }
0x1330   :  { %v1484_v7 = vpop.f32.mrf.mxu3 }
0x1331   :  { %v4466_v8 = vadd.f32 %v3287_v36, %v1484_v7  ;;  %v4497_v36 = vpop.f32.mrf.mxu2 }
0x1333   :  { %v3423_v32 = vpop.eup %3422  ;;  %v1549_v46 = vadd.f32 %v1547_v1, %v4466_v8 }
0x1334   :  { %1592 = vrot.lane.b32.xlu2 %v3423_v32, %s3953_s5 }
0x1335   :  { %3424 = vtanh.f32 %v1549_v46  ;;  %v3133_v41 = vmul.f32 -1.442695, %v1549_v46 }
0x1336   :  { %3426 = vpow2.f32 %v3132_v38 }
0x133b   :  { %v3425_v15 = vpop.eup %3424 }
0x133c   :  { %1603 = vrot.lane.b32.xlu1 %v3425_v15, %s3953_s5  ;;  %v3427_v18 = vpop.eup %3426 }
0x133d   :  { %v1553_v48 = vadd.f32 1.0, %v3427_v18 }
0x133f   :  { %3428 = vrcp.f32 %v1553_v48  ;;  %v1565_v55 = vand.u32 2147483648, %v1553_v48  ;;  %vm1559_vm11 = vweird.f32 %v1553_v48  ;;  %v1563_v56 = vand.u32 2147483647, %v1553_v48 }
0x1340   :  { %3430 = vpow2.f32 %v3133_v41 }
0x1341   :  { %v1566_v60 = vor.u32 1.1754944e-38, %v1565_v55  ;;  %vm1564_vm13 = vcmp.eq.f32.partialorder %v1563_v56, 8.507059e+37 }
0x1345   :  { %v3429_v49 = vpop.eup %3428 }
0x1346   :  { %v1555_v20 = vmul.f32 %v3429_v49, %v1553_v48  ;;  %vm1560_vm10 = vweird.f32 %v3429_v49  ;;  %v3431_v57 = vpop.eup %3430 }
0x1347   :  { %vm1561_vm12 = vmor %vm1559_vm11, %vm1560_vm10  ;;  %v1572_v61 = vadd.f32 1.0, %v3431_v57 }
0x1348   :  { %v1556_v51 = vsub.f32 1.0, %v1555_v20 }
0x1349   :  { %3432 = vrcp.f32 %v1572_v61  ;;  %v1584_v5 = vand.u32 2147483648, %v1572_v61  ;;  %vm1578_vm15 = vweird.f32 %v1572_v61  ;;  %v1582_v6 = vand.u32 2147483647, %v1572_v61 }
0x134a   :  { %v1557_v53 = vmul.f32 %v3429_v49, %v1556_v51 }
0x134b   :  { %v1585_v40 = vor.u32 1.1754944e-38, %v1584_v5  ;;  %vm1583_vm1 = vcmp.eq.f32.partialorder %v1582_v6, 8.507059e+37 }
0x134c   :  { %v1558_v54 = vadd.f32 %v3429_v49, %v1557_v53 }
0x134e   :  { %v1562_v58 = vsel %vm1561_vm12, %v3429_v49, %v1558_v54 }
0x134f   :  { %v1567_v0 = vsel %vm1564_vm13, %v1566_v60, %v1562_v58  ;;  %v3433_v43 = vpop.eup %3432 }
0x1350   :  { %v1574_v13 = vmul.f32 %v3433_v43, %v1572_v61  ;;  %vm1579_vm14 = vweird.f32 %v3433_v43  ;;  %v1590_v45 = vmul.f32 0.0, %v1567_v0 }
0x1351   :  { %vm1580_vm0 = vmor %vm1578_vm15, %vm1579_vm14 }
0x1352   :  { %v1575_v50 = vsub.f32 1.0, %v1574_v13 }
0x1354   :  { %v1576_v19 = vmul.f32 %v3433_v43, %v1575_v50 }
0x1356   :  { %v1577_v2 = vadd.f32 %v3433_v43, %v1576_v19 }
0x1358   :  { %v1581_v28 = vsel %vm1580_vm0, %v3433_v43, %v1577_v2 }
0x1359   :  { %v1586_v47 = vsel %vm1583_vm1, %v1585_v40, %v1581_v28 }
0x135a   :  { %v1601_v4 = vmul.f32 0.0, %v1586_v47 }
0x138e   :  { %v1593_v62 = vpop.permute.xlu2 %1592 }
0x138f   :  { %v1595_v35 = vmul.f32 %v1593_v62, %v1567_v0 }
0x1391   :  { %1597 = vrot.lane.b32.xlu1 %v1595_v35, %s3953_s5 }
0x13ae   :  { %v1604_v30 = vpop.permute.xlu1 %1603 }
0x13af   :  { %v1606_v33 = vmul.f32 %v1604_v30, %v1586_v47 }
0x13b1   :  { %1608 = vrot.lane.b32.xlu0 %v1606_v33, %s3953_s5 }
0x1403   :  { %v1598_v10 = vpop.permute.xlu1 %1597 }
0x1404   :  { %v4473_v11 = vadd.f32 %v1598_v10, %v1590_v45 }
0x1406   :  { %3434 = vtanh.f32 %v4473_v11 }
0x140c   :  { %v3435_v14 = vpop.eup %3434 }
0x140d   :  { %1614 = vrot.lane.b32.xlu0 %v3435_v14, %s3953_s5  ;;  %v1714_v14 = vrot.slane %v4473_v11, 6 }
0x1423   :  { %v1609_v17 = vpop.permute.xlu0 %1608 }
0x1424   :  { %v4477_v23 = vadd.f32 %v1609_v17, %v1601_v4 }
0x1426   :  { %3436 = vtanh.f32 %v4477_v23 }
0x142c   :  { %v3437_v24 = vpop.eup %3436 }
0x142d   :  { %1620 = vrot.lane.b32.xlu2 %v3437_v24, %s3953_s5 }
0x147f   :  { %v1615_v25 = vpop.permute.xlu0 %1614 }
0x1480   :  { %v4481_v42 = vmul.f32 %v1615_v25, %v1567_v0  ;;  %v1728_v25 = vrot.slane %v4477_v23, 2 }
0x1482   :  { %v1624_v26 = vpack.c.bf16 %v4481_v42, %v4481_v42 }
0x1484   :  { %1626 = vrot.lane.b32.xlu2 %v1624_v26, %s3940_s9 }
0x1487   :  { %v1621_v29 = vpop.permute.xlu2 %1620 }
0x1488   :  { %v4486_v3 = vmul.f32 %v1621_v29, %v1586_v47 }
0x148a   :  { %v1648_v9 = vpack.c.bf16 %v4486_v3, %v4486_v3 }
0x148c   :  { %v1650_v31 = vrot.slane %v1648_v9, 3 }
0x148e   :  { %1651 = vrot.lane.b32.xlu1 %v1650_v31, %s3940_s9 }
0x14de   :  { %v1627_v12 = vpop.permute.xlu2 %1626 }
0x14df   :  { %3134 = vmatmul.msk.bf16.vlgmr.msrb.gmra.mxu2 %vm342_vm9, %v1627_v12 }
0x14e0   :  { %2149 = vmatpush.bf16.msrb.mxu2 %v4427_v52 }
0x14e4   :  { %2150 = vmatpush.bf16.msrb.mxu2 %v4433_v22 }
0x1500   :  { %v1652_v34 = vpop.permute.xlu1 %1651 }
0x1501   :  { %3135 = vmatmul.msk.bf16.vlgmr.msrb.gmra.mxu3 %vm342_vm9, %v1652_v34 }
0x1502   :  { %2174 = vmatpush.bf16.msrb.mxu3 %v4420_v59 }
0x1506   :  { %2175 = vmatpush.bf16.msrb.mxu3 %v4429_v21 }
0x1562   :  { %v1640_v37 = vpop.f32.mrf.mxu2 }
0x1563   :  { %v1645_v39 = vrot.slane %v1640_v37, 6 }
0x1565   :  { %v1647_v44 = vadd.f32 %v1645_v39, %v4461_v27 }
0x1567   :  { %3438 = vtanh.f32 %v1647_v44  ;;  %v3136_v48 = vmul.f32 -1.442695, %v1647_v44 }
0x156a   :  { %v1642_v1 = vpop.f32.mrf.mxu2 }
0x156d   :  { %v3439_v7 = vpop.eup %3438 }
0x156e   :  { %1718 = vrot.lane.b32.xlu1 %v3439_v7, %s3953_s5 }
0x1584   :  { %v1665_v32 = vpop.f32.mrf.mxu3 }
0x1585   :  { %v1670_v46 = vrot.slane %v1665_v32, 4 }
0x1587   :  { %v1672_v15 = vadd.f32 %v1670_v46, %v4466_v8 }
0x1589   :  { %3440 = vtanh.f32 %v1672_v15  ;;  %v3137_v54 = vmul.f32 -1.442695, %v1672_v15 }
0x158a   :  { %3442 = vpow2.f32 %v3136_v48 }
0x158c   :  { %v1667_v38 = vpop.f32.mrf.mxu3 }
0x158f   :  { %v3441_v18 = vpop.eup %3440 }
0x1590   :  { %1732 = vrot.lane.b32.xlu0 %v3441_v18, %s3953_s5  ;;  %v3443_v49 = vpop.eup %3442 }
0x1591   :  { %v1676_v20 = vadd.f32 1.0, %v3443_v49 }
0x1593   :  { %3444 = vrcp.f32 %v1676_v20  ;;  %v1688_v57 = vand.u32 2147483648, %v1676_v20  ;;  %vm1682_vm3 = vweird.f32 %v1676_v20  ;;  %v1686_v58 = vand.u32 2147483647, %v1676_v20 }
0x1594   :  { %3446 = vpow2.f32 %v3137_v54 }
0x1595   :  { %v1689_v61 = vor.u32 1.1754944e-38, %v1688_v57  ;;  %vm1687_vm5 = vcmp.eq.f32.partialorder %v1686_v58, 8.507059e+37 }
0x1599   :  { %v3445_v51 = vpop.eup %3444 }
0x159a   :  { %v1678_v41 = vmul.f32 %v3445_v51, %v1676_v20  ;;  %vm1683_vm2 = vweird.f32 %v3445_v51  ;;  %v3447_v62 = vpop.eup %3446 }
0x159b   :  { %vm1684_vm4 = vmor %vm1682_vm3, %vm1683_vm2  ;;  %v1695_v13 = vadd.f32 1.0, %v3447_v62 }
0x159c   :  { %v1679_v53 = vsub.f32 1.0, %v1678_v41 }
0x159d   :  { %3448 = vrcp.f32 %v1695_v13  ;;  %v1707_v28 = vand.u32 2147483648, %v1695_v13  ;;  %vm1701_vm7 = vweird.f32 %v1695_v13  ;;  %v1705_v40 = vand.u32 2147483647, %v1695_v13 }
0x159e   :  { %v1680_v55 = vmul.f32 %v3445_v51, %v1679_v53 }
0x159f   :  { %v1708_v47 = vor.u32 1.1754944e-38, %v1707_v28  ;;  %vm1706_vm10 = vcmp.eq.f32.partialorder %v1705_v40, 8.507059e+37 }
0x15a0   :  { %v1681_v56 = vadd.f32 %v3445_v51, %v1680_v55 }
0x15a2   :  { %v1685_v60 = vsel %vm1684_vm4, %v3445_v51, %v1681_v56 }
0x15a3   :  { %v1690_v35 = vsel %vm1687_vm5, %v1689_v61, %v1685_v60  ;;  %v3449_v50 = vpop.eup %3448 }
0x15a4   :  { %v1697_v19 = vmul.f32 %v3449_v50, %v1695_v13  ;;  %vm1702_vm6 = vweird.f32 %v3449_v50  ;;  %v1716_v4 = vmul.f32 %v1714_v14, %v1690_v35 }
0x15a5   :  { %vm1703_vm8 = vmor %vm1701_vm7, %vm1702_vm6 }
0x15a6   :  { %v1698_v2 = vsub.f32 1.0, %v1697_v19 }
0x15a8   :  { %v1699_v5 = vmul.f32 %v3449_v50, %v1698_v2 }
0x15aa   :  { %v1700_v6 = vadd.f32 %v3449_v50, %v1699_v5 }
0x15ac   :  { %v1704_v30 = vsel %vm1703_vm8, %v3449_v50, %v1700_v6 }
0x15ad   :  { %v1709_v33 = vsel %vm1706_vm10, %v1708_v47, %v1704_v30 }
0x15ae   :  { %v1730_v29 = vmul.f32 %v1728_v25, %v1709_v33 }
0x15e0   :  { %v1719_v0 = vpop.permute.xlu1 %1718 }
0x15e1   :  { %v1721_v43 = vmul.f32 %v1719_v0, %v1690_v35 }
0x15e3   :  { %1723 = vrot.lane.b32.xlu0 %v1721_v43, %s3953_s5 }
0x1602   :  { %v1733_v45 = vpop.permute.xlu0 %1732 }
0x1603   :  { %v1735_v10 = vmul.f32 %v1733_v45, %v1709_v33 }
0x1605   :  { %1737 = vrot.lane.b32.xlu2 %v1735_v10, %s3953_s5 }
0x1655   :  { %v1724_v17 = vpop.permute.xlu0 %1723 }
0x1656   :  { %v4506_v24 = vadd.f32 %v1724_v17, %v1716_v4 }
0x1658   :  { %3450 = vtanh.f32 %v4506_v24 }
0x165e   :  { %v3451_v26 = vpop.eup %3450 }
0x165f   :  { %v1738_v9 = vpop.permute.xlu2 %1737  ;;  %1743 = vrot.lane.b32.xlu2 %v3451_v26, %s3953_s5 }
0x1660   :  { %v4511_v31 = vadd.f32 %v1738_v9, %v1730_v29 }
0x1662   :  { %3452 = vtanh.f32 %v4511_v31 }
0x1668   :  { %v3453_v12 = vpop.eup %3452 }
0x1669   :  { %1749 = vrot.lane.b32.xlu1 %v3453_v12, %s3953_s5  ;;  %v1844_v12 = vrot.slane %v4506_v24, 6 }
0x16b9   :  { %v1744_v11 = vpop.permute.xlu2 %1743 }
0x16ba   :  { %v4515_v34 = vmul.f32 %v1744_v11, %v1690_v35 }
0x16bc   :  { %v1753_v37 = vpack.c.bf16 %v4515_v34, %v4515_v34 }
0x16be   :  { %v1755_v39 = vrot.slane %v1753_v37, 1 }
0x16c0   :  { %1756 = vrot.lane.b32.xlu1 %v1755_v39, %s3940_s9 }
0x16db   :  { %v1750_v23 = vpop.permute.xlu1 %1749 }
0x16dc   :  { %v4520_v44 = vmul.f32 %v1750_v23, %v1709_v33 }
0x16de   :  { %v1778_v1 = vpack.c.bf16 %v4520_v44, %v4520_v44 }
0x16e0   :  { %v1780_v7 = vrot.slane %v1778_v1, 2  ;;  %v1858_v1 = vrot.slane %v4511_v31, 2 }
0x16e2   :  { %1781 = vrot.lane.b32.xlu0 %v1780_v7, %s3940_s9 }
0x1732   :  { %v1757_v32 = vpop.permute.xlu1 %1756 }
0x1733   :  { %3138 = vmatmul.msk.bf16.vlgmr.msra.gmra.mxu0 %vm342_vm9, %v1757_v32 }
0x1734   :  { %2279 = vmatpush.bf16.msra.mxu0 %v4427_v52 }
0x1738   :  { %2280 = vmatpush.bf16.msra.mxu0 %v4433_v22 }
0x1754   :  { %v1782_v46 = vpop.permute.xlu0 %1781 }
0x1755   :  { %3139 = vmatmul.msk.bf16.vlgmr.msra.gmra.mxu1 %vm342_vm9, %v1782_v46 }
0x1756   :  { %2304 = vmatpush.bf16.msra.mxu1 %v4420_v59 }
0x175a   :  { %2305 = vmatpush.bf16.msra.mxu1 %v4429_v21 }
0x17b0   :  { %v1770_v15 = vpop.f32.mrf.mxu0 }
0x17b1   :  { %v1775_v38 = vrot.slane %v1770_v15, 4 }
0x17b3   :  { %v1777_v18 = vadd.f32 %v1775_v38, %v4461_v27 }
0x17b5   :  { %3454 = vtanh.f32 %v1777_v18  ;;  %v3140_v55 = vmul.f32 -1.442695, %v1777_v18 }
0x17b8   :  { %v1772_v48 = vpop.f32.mrf.mxu0 }
0x17bb   :  { %v3455_v49 = vpop.eup %3454 }
0x17bc   :  { %1848 = vrot.lane.b32.xlu0 %v3455_v49, %s3953_s5 }
0x17d2   :  { %v1795_v20 = vpop.f32.mrf.mxu1 }
0x17d3   :  { %v1800_v51 = vrot.slane %v1795_v20, 6 }
0x17d5   :  { %v1802_v41 = vadd.f32 %v1800_v51, %v4466_v8 }
0x17d7   :  { %3456 = vtanh.f32 %v1802_v41  ;;  %v3141_v57 = vmul.f32 -1.442695, %v1802_v41 }
0x17d8   :  { %3458 = vpow2.f32 %v3140_v55 }
0x17d9   :  { %3460 = vpow2.f32 %v3141_v57 }
0x17da   :  { %v1797_v53 = vpop.f32.mrf.mxu1 }
0x17dd   :  { %v3457_v54 = vpop.eup %3456 }
0x17de   :  { %1862 = vrot.lane.b32.xlu2 %v3457_v54, %s3953_s5  ;;  %v3459_v56 = vpop.eup %3458 }
0x17df   :  { %v1806_v58 = vadd.f32 1.0, %v3459_v56  ;;  %v3461_v60 = vpop.eup %3460 }
0x17e0   :  { %v1825_v62 = vadd.f32 1.0, %v3461_v60 }
0x17e1   :  { %3462 = vrcp.f32 %v1806_v58  ;;  %v1818_v2 = vand.u32 2147483648, %v1806_v58  ;;  %vm1812_vm12 = vweird.f32 %v1806_v58  ;;  %v1816_v5 = vand.u32 2147483647, %v1806_v58 }
0x17e2   :  { %3464 = vrcp.f32 %v1825_v62  ;;  %v1837_v14 = vand.u32 2147483648, %v1825_v62  ;;  %vm1831_vm0 = vweird.f32 %v1825_v62  ;;  %v1835_v4 = vand.u32 2147483647, %v1825_v62 }
0x17e3   :  { %v1819_v40 = vor.u32 1.1754944e-38, %v1818_v2  ;;  %vm1817_vm14 = vcmp.eq.f32.partialorder %v1816_v5, 8.507059e+37 }
0x17e4   :  { %v1838_v25 = vor.u32 1.1754944e-38, %v1837_v14  ;;  %vm1836_vm2 = vcmp.eq.f32.partialorder %v1835_v4, 8.507059e+37 }
0x17e7   :  { %v3463_v61 = vpop.eup %3462 }
0x17e8   :  { %v1808_v0 = vmul.f32 %v3463_v61, %v1806_v58  ;;  %v3465_v43 = vpop.eup %3464  ;;  %vm1813_vm11 = vweird.f32 %v3463_v61 }
0x17e9   :  { %v1827_v50 = vmul.f32 %v3465_v43, %v1825_v62  ;;  %vm1814_vm13 = vmor %vm1812_vm12, %vm1813_vm11  ;;  %vm1832_vm15 = vweird.f32 %v3465_v43 }
0x17ea   :  { %v1809_v35 = vsub.f32 1.0, %v1808_v0  ;;  %vm1833_vm1 = vmor %vm1831_vm0, %vm1832_vm15 }
0x17eb   :  { %v1828_v6 = vsub.f32 1.0, %v1827_v50 }
0x17ec   :  { %v1810_v13 = vmul.f32 %v3463_v61, %v1809_v35 }
0x17ed   :  { %v1829_v30 = vmul.f32 %v3465_v43, %v1828_v6 }
0x17ee   :  { %v1811_v19 = vadd.f32 %v3463_v61, %v1810_v13 }
0x17ef   :  { %v1830_v10 = vadd.f32 %v3465_v43, %v1829_v30 }
0x17f0   :  { %v1815_v28 = vsel %vm1814_vm13, %v3463_v61, %v1811_v19 }
0x17f1   :  { %v1820_v47 = vsel %vm1817_vm14, %v1819_v40, %v1815_v28  ;;  %v1834_v17 = vsel %vm1833_vm1, %v3465_v43, %v1830_v10 }
0x17f2   :  { %v1839_v29 = vsel %vm1836_vm2, %v1838_v25, %v1834_v17  ;;  %v1846_v11 = vmul.f32 %v1844_v12, %v1820_v47 }
0x17f3   :  { %v1860_v7 = vmul.f32 %v1858_v1, %v1839_v29 }
0x182e   :  { %v1849_v33 = vpop.permute.xlu0 %1848 }
0x182f   :  { %v1851_v45 = vmul.f32 %v1849_v33, %v1820_v47 }
0x1831   :  { %1853 = vrot.lane.b32.xlu2 %v1851_v45, %s3953_s5 }
0x1838   :  { %v1863_v26 = vpop.permute.xlu2 %1862 }
0x1839   :  { %v1865_v9 = vmul.f32 %v1863_v26, %v1839_v29 }
0x183b   :  { %1867 = vrot.lane.b32.xlu1 %v1865_v9, %s3953_s5 }
0x188b   :  { %v1854_v37 = vpop.permute.xlu2 %1853 }
0x188c   :  { %v4538_v39 = vadd.f32 %v1854_v37, %v1846_v11 }
0x188e   :  { %3466 = vtanh.f32 %v4538_v39  ;;  %v1971_v37 = vrot.slane %v4538_v39, 6 }
0x1894   :  { %v3467_v23 = vpop.eup %3466 }
0x1895   :  { %1873 = vrot.lane.b32.xlu1 %v3467_v23, %s3953_s5 }
0x18ad   :  { %v1868_v32 = vpop.permute.xlu1 %1867 }
0x18ae   :  { %v4543_v46 = vadd.f32 %v1868_v32, %v1860_v7 }
0x18b0   :  { %3468 = vtanh.f32 %v4543_v46 }
0x18b6   :  { %v3469_v15 = vpop.eup %3468 }
0x18b7   :  { %1879 = vrot.lane.b32.xlu0 %v3469_v15, %s3953_s5  ;;  %v1985_v15 = vrot.slane %v4543_v46, 2 }
0x1907   :  { %v1874_v24 = vpop.permute.xlu1 %1873 }
0x1908   :  { %v4547_v38 = vmul.f32 %v1874_v24, %v1820_v47 }
0x190a   :  { %v1883_v18 = vpack.c.bf16 %v4547_v38, %v4547_v38 }
0x190c   :  { %v1885_v48 = vrot.slane %v1883_v18, 2 }
0x190e   :  { %1886 = vrot.lane.b32.xlu0 %v1885_v48, %s3940_s9 }
0x1929   :  { %v1880_v49 = vpop.permute.xlu0 %1879 }
0x192a   :  { %v4552_v31 = vmul.f32 %v1880_v49, %v1839_v29 }
0x192c   :  { %v1908_v20 = vpack.c.bf16 %v4552_v31, %v4552_v31 }
0x192e   :  { %v1910_v51 = vrot.slane %v1908_v20, 1 }
0x1930   :  { %1911 = vrot.lane.b32.xlu2 %v1910_v51, %s3940_s9 }
0x1980   :  { %v1887_v41 = vpop.permute.xlu0 %1886 }
0x1981   :  { %3142 = vmatmul.msk.bf16.vlgmr.msra.gmra.mxu2 %vm342_vm9, %v1887_v41 }
0x1982   :  { %2409 = vmatpush.bf16.msra.mxu2 %v4427_v52 }
0x1986   :  { %2410 = vmatpush.bf16.msra.mxu2 %v4433_v22 }
0x198a   :  { %v1912_v53 = vpop.permute.xlu2 %1911 }
0x198b   :  { %3143 = vmatmul.msk.bf16.vlgmr.msra.gmra.mxu3 %vm342_vm9, %v1912_v53 }
0x198c   :  { %2434 = vmatpush.bf16.msra.mxu3 %v4420_v59 }
0x1990   :  { %2435 = vmatpush.bf16.msra.mxu3 %v4429_v21 }
0x1a04   :  { %v1900_v54 = vpop.f32.mrf.mxu2 }
0x1a05   :  { %v1905_v55 = vrot.slane %v1900_v54, 2 }
0x1a07   :  { %v1907_v56 = vadd.f32 %v1905_v55, %v4461_v27 }
0x1a09   :  { %3470 = vtanh.f32 %v1907_v56  ;;  %v3144_v59 = vmul.f32 -1.442695, %v1907_v56 }
0x1a0c   :  { %v1902_v57 = vpop.f32.mrf.mxu2 }
0x1a0d   :  { %v4593_v57 = vadd.f32 %v4458_v63, %v4497_v36 }
0x1a0e   :  { %v1925_v58 = vpop.f32.mrf.mxu3 }
0x1a0f   :  { %v3471_v60 = vpop.eup %3470  ;;  %v1929_v61 = vadd.f32 %v1925_v58, %v4466_v8 }
0x1a10   :  { %1975 = vrot.lane.b32.xlu2 %v3471_v60, %s3953_s5 }
0x1a11   :  { %3472 = vtanh.f32 %v1929_v61  ;;  %v3145_v43 = vmul.f32 -1.442695, %v1929_v61 }
0x1a12   :  { %3474 = vpow2.f32 %v3144_v59 }
0x1a16   :  { %v1927_v52 = vpop.f32.mrf.mxu3 }
0x1a17   :  { %v3473_v22 = vpop.eup %3472 }
0x1a18   :  { %1989 = vrot.lane.b32.xlu1 %v3473_v22, %s3953_s5  ;;  %v3475_v21 = vpop.eup %3474 }
0x1a19   :  { %v1933_v62 = vadd.f32 1.0, %v3475_v21 }
0x1a1b   :  { %3476 = vrcp.f32 %v1933_v62  ;;  %v1945_v8 = vand.u32 2147483648, %v1933_v62  ;;  %vm1939_vm4 = vweird.f32 %v1933_v62  ;;  %v1943_v19 = vand.u32 2147483647, %v1933_v62 }
0x1a1c   :  { %3478 = vpow2.f32 %v3145_v43 }
0x1a1d   :  { %v1946_v6 = vor.u32 1.1754944e-38, %v1945_v8  ;;  %vm1944_vm6 = vcmp.eq.f32.partialorder %v1943_v19, 8.507059e+37 }
0x1a21   :  { %v3477_v0 = vpop.eup %3476 }
0x1a22   :  { %v1935_v27 = vmul.f32 %v3477_v0, %v1933_v62  ;;  %vm1940_vm3 = vweird.f32 %v3477_v0  ;;  %v3479_v2 = vpop.eup %3478 }
0x1a23   :  { %vm1941_vm5 = vmor %vm1939_vm4, %vm1940_vm3  ;;  %v1952_v28 = vadd.f32 1.0, %v3479_v2 }
0x1a24   :  { %v1936_v35 = vsub.f32 1.0, %v1935_v27 }
0x1a25   :  { %3480 = vrcp.f32 %v1952_v28  ;;  %v1964_v17 = vand.u32 2147483648, %v1952_v28  ;;  %vm1958_vm8 = vweird.f32 %v1952_v28  ;;  %v1962_v25 = vand.u32 2147483647, %v1952_v28 }
0x1a26   :  { %v1937_v13 = vmul.f32 %v3477_v0, %v1936_v35 }
0x1a27   :  { %v1965_v29 = vor.u32 1.1754944e-38, %v1964_v17  ;;  %vm1963_vm11 = vcmp.eq.f32.partialorder %v1962_v25, 8.507059e+37 }
0x1a28   :  { %v1938_v50 = vadd.f32 %v3477_v0, %v1937_v13 }
0x1a2a   :  { %v1942_v5 = vsel %vm1941_vm5, %v3477_v0, %v1938_v50 }
0x1a2b   :  { %v1947_v30 = vsel %vm1944_vm6, %v1946_v6, %v1942_v5  ;;  %v3481_v33 = vpop.eup %3480 }
0x1a2c   :  { %v1954_v45 = vmul.f32 %v3481_v33, %v1952_v28  ;;  %vm1959_vm7 = vweird.f32 %v3481_v33  ;;  %v1973_v23 = vmul.f32 %v1971_v37, %v1947_v30 }
0x1a2d   :  { %vm1960_vm10 = vmor %vm1958_vm8, %vm1959_vm7 }
0x1a2e   :  { %v1955_v10 = vsub.f32 1.0, %v1954_v45 }
0x1a30   :  { %v1956_v14 = vmul.f32 %v3481_v33, %v1955_v10 }
0x1a32   :  { %v1957_v4 = vadd.f32 %v3481_v33, %v1956_v14 }
0x1a34   :  { %v1961_v26 = vsel %vm1960_vm10, %v3481_v33, %v1957_v4 }
0x1a35   :  { %v1966_v12 = vsel %vm1963_vm11, %v1965_v29, %v1961_v26 }
0x1a36   :  { %v1987_v24 = vmul.f32 %v1985_v15, %v1966_v12 }
0x1a6a   :  { %v1976_v40 = vpop.permute.xlu2 %1975 }
0x1a6b   :  { %v1978_v47 = vmul.f32 %v1976_v40, %v1947_v30 }
0x1a6d   :  { %1980 = vrot.lane.b32.xlu1 %v1978_v47, %s3953_s5 }
0x1a8a   :  { %v1990_v9 = vpop.permute.xlu1 %1989 }
0x1a8b   :  { %v1992_v11 = vmul.f32 %v1990_v9, %v1966_v12 }
0x1a8d   :  { %1994 = vrot.lane.b32.xlu0 %v1992_v11, %s3953_s5 }
0x1adf   :  { %v1981_v1 = vpop.permute.xlu1 %1980 }
0x1ae0   :  { %v4570_v7 = vadd.f32 %v1981_v1, %v1973_v23 }
0x1ae2   :  { %3482 = vtanh.f32 %v4570_v7  ;;  %v2097_v1 = vrot.slane %v4570_v7, 6 }
0x1ae8   :  { %v3483_v32 = vpop.eup %3482 }
0x1ae9   :  { %2000 = vrot.lane.b32.xlu0 %v3483_v32, %s3953_s5 }
0x1aff   :  { %v1995_v18 = vpop.permute.xlu0 %1994 }
0x1b00   :  { %v4575_v48 = vadd.f32 %v1995_v18, %v1987_v24 }
0x1b02   :  { %3484 = vtanh.f32 %v4575_v48  ;;  %v2111_v18 = vrot.slane %v4575_v48, 2 }
0x1b08   :  { %v3485_v49 = vpop.eup %3484 }
0x1b09   :  { %2006 = vrot.lane.b32.xlu2 %v3485_v49, %s3953_s5 }
0x1b5b   :  { %v2001_v39 = vpop.permute.xlu0 %2000 }
0x1b5c   :  { %v4579_v20 = vmul.f32 %v2001_v39, %v1947_v30 }
0x1b5e   :  { %v2010_v51 = vpack.c.bf16 %v4579_v20, %v4579_v20 }
0x1b60   :  { %v2012_v41 = vrot.slane %v2010_v51, 3 }
0x1b62   :  { %2013 = vrot.lane.b32.xlu2 %v2012_v41, %s3940_s9 }
0x1b63   :  { %v2007_v53 = vpop.permute.xlu2 %2006 }
0x1b64   :  { %v4584_v46 = vmul.f32 %v2007_v53, %v1966_v12 }
0x1b66   :  { %v2032_v54 = vpack.c.bf16 %v4584_v46, %v4584_v46 }
0x1b68   :  { %2034 = vrot.lane.b32.xlu1 %v2032_v54, %s3940_s9 }
0x1bbc   :  { %v2014_v55 = vpop.permute.xlu2 %2013 }
0x1bbd   :  { %3146 = vmatmul.msk.bf16.vlgmr.msrb.gmra.mxu0 %vm342_vm9, %v2014_v55 }
0x1bda   :  { %v2035_v56 = vpop.permute.xlu1 %2034 }
0x1bdb   :  { %3147 = vmatmul.msk.bf16.vlgmr.msrb.gmra.mxu1 %vm342_vm9, %v2035_v56 }
0x1c3a   :  { %v2027_v58 = vpop.f32.mrf.mxu0 }
0x1c3b   :  { %v2031_v60 = vadd.f32 %v2027_v58, %v4593_v57 }
0x1c3d   :  { %3486 = vtanh.f32 %v2031_v60  ;;  %v3148_v27 = vmul.f32 -1.442695, %v2031_v60 }
0x1c42   :  { %v2029_v61 = vpop.f32.mrf.mxu0 }
0x1c43   :  { %v3487_v52 = vpop.eup %3486 }
0x1c44   :  { %2101 = vrot.lane.b32.xlu1 %v3487_v52, %s3953_s5 }
0x1c58   :  { %v2048_v22 = vpop.f32.mrf.mxu1 }
0x1c59   :  { %v2053_v59 = vrot.slane %v2048_v22, 2 }
0x1c5b   :  { %v2055_v21 = vadd.f32 %v2053_v59, %v4463_v16 }
0x1c5d   :  { %3488 = vtanh.f32 %v2055_v21  ;;  %v3149_v50 = vmul.f32 -1.442695, %v2055_v21 }
0x1c5e   :  { %3490 = vpow2.f32 %v3148_v27 }
0x1c60   :  { %v2050_v62 = vpop.f32.mrf.mxu1 }
0x1c63   :  { %v3489_v0 = vpop.eup %3488 }
0x1c64   :  { %2115 = vrot.lane.b32.xlu0 %v3489_v0, %s3953_s5  ;;  %v3491_v63 = vpop.eup %3490 }
0x1c65   :  { %v2059_v36 = vadd.f32 1.0, %v3491_v63 }
0x1c67   :  { %3492 = vrcp.f32 %v2059_v36  ;;  %v2071_v2 = vand.u32 2147483648, %v2059_v36  ;;  %vm2065_vm13 = vweird.f32 %v2059_v36  ;;  %v2069_v5 = vand.u32 2147483647, %v2059_v36 }
0x1c68   :  { %3494 = vpow2.f32 %v3149_v50 }
0x1c69   :  { %v2072_v40 = vor.u32 1.1754944e-38, %v2071_v2  ;;  %vm2070_vm15 = vcmp.eq.f32.partialorder %v2069_v5, 8.507059e+37 }
0x1c6d   :  { %v3493_v35 = vpop.eup %3492 }
0x1c6e   :  { %v2061_v43 = vmul.f32 %v3493_v35, %v2059_v36  ;;  %vm2066_vm12 = vweird.f32 %v3493_v35  ;;  %v3495_v6 = vpop.eup %3494 }
0x1c6f   :  { %vm2067_vm14 = vmor %vm2065_vm13, %vm2066_vm12  ;;  %v2078_v30 = vadd.f32 1.0, %v3495_v6 }
0x1c70   :  { %v2062_v13 = vsub.f32 1.0, %v2061_v43 }
0x1c71   :  { %3496 = vrcp.f32 %v2078_v30  ;;  %v2090_v26 = vand.u32 2147483648, %v2078_v30  ;;  %vm2084_vm1 = vweird.f32 %v2078_v30  ;;  %v2088_v29 = vand.u32 2147483647, %v2078_v30 }
0x1c72   :  { %v2063_v8 = vmul.f32 %v3493_v35, %v2062_v13 }
0x1c73   :  { %v2091_v12 = vor.u32 1.1754944e-38, %v2090_v26  ;;  %vm2089_vm3 = vcmp.eq.f32.partialorder %v2088_v29, 8.507059e+37 }
0x1c74   :  { %v2064_v19 = vadd.f32 %v3493_v35, %v2063_v8 }
0x1c76   :  { %v2068_v28 = vsel %vm2067_vm14, %v3493_v35, %v2064_v19 }
0x1c77   :  { %v2073_v33 = vsel %vm2070_vm15, %v2072_v40, %v2068_v28  ;;  %v3497_v10 = vpop.eup %3496 }
0x1c78   :  { %v2080_v14 = vmul.f32 %v3497_v10, %v2078_v30  ;;  %vm2085_vm0 = vweird.f32 %v3497_v10  ;;  %v2099_v32 = vmul.f32 %v2097_v1, %v2073_v33 }
0x1c79   :  { %vm2086_vm2 = vmor %vm2084_vm1, %vm2085_vm0 }
0x1c7a   :  { %v2081_v4 = vsub.f32 1.0, %v2080_v14 }
0x1c7c   :  { %v2082_v17 = vmul.f32 %v3497_v10, %v2081_v4 }
0x1c7e   :  { %v2083_v25 = vadd.f32 %v3497_v10, %v2082_v17 }
0x1c80   :  { %v2087_v9 = vsel %vm2086_vm2, %v3497_v10, %v2083_v25 }
0x1c81   :  { %v2092_v11 = vsel %vm2089_vm3, %v2091_v12, %v2087_v9 }
0x1c82   :  { %v2113_v49 = vmul.f32 %v2111_v18, %v2092_v11 }
0x1cb6   :  { %v2102_v47 = vpop.permute.xlu1 %2101 }
0x1cb7   :  { %v2104_v45 = vmul.f32 %v2102_v47, %v2073_v33 }
0x1cb9   :  { %2106 = vrot.lane.b32.xlu0 %v2104_v45, %s3953_s5 }
0x1cd6   :  { %v2116_v37 = vpop.permute.xlu0 %2115 }
0x1cd7   :  { %v2118_v23 = vmul.f32 %v2116_v37, %v2092_v11 }
0x1cd9   :  { %2120 = vrot.lane.b32.xlu2 %v2118_v23, %s3953_s5 }
0x1d2b   :  { %v2107_v15 = vpop.permute.xlu0 %2106 }
0x1d2c   :  { %v4602_v24 = vadd.f32 %v2107_v15, %v2099_v32 }
0x1d2e   :  { %3498 = vtanh.f32 %v4602_v24 }
0x1d33   :  { %v2121_v39 = vpop.permute.xlu2 %2120 }
0x1d34   :  { %v3499_v51 = vpop.eup %3498  ;;  %v4606_v41 = vadd.f32 %v2121_v39, %v2113_v49  ;;  %v2226_v39 = vrot.slane %v4602_v24, 6 }
0x1d35   :  { %2126 = vrot.lane.b32.xlu2 %v3499_v51, %s3953_s5 }
0x1d36   :  { %3500 = vtanh.f32 %v4606_v41 }
0x1d3c   :  { %v3501_v53 = vpop.eup %3500 }
0x1d3d   :  { %2132 = vrot.lane.b32.xlu1 %v3501_v53, %s3953_s5 }
0x1d8f   :  { %v2127_v7 = vpop.permute.xlu2 %2126 }
0x1d90   :  { %v4611_v54 = vmul.f32 %v2127_v7, %v2073_v33 }
0x1d92   :  { %v2136_v55 = vpack.c.bf16 %v4611_v54, %v4611_v54 }
0x1d94   :  { %2138 = vrot.lane.b32.xlu1 %v2136_v55, %s3940_s9 }
0x1daf   :  { %v2133_v48 = vpop.permute.xlu1 %2132 }
0x1db0   :  { %v4616_v56 = vmul.f32 %v2133_v48, %v2092_v11  ;;  %v2240_v48 = vrot.slane %v4606_v41, 2 }
0x1db2   :  { %v2160_v58 = vpack.c.bf16 %v4616_v56, %v4616_v56 }
0x1db4   :  { %v2162_v60 = vrot.slane %v2160_v58, 3 }
0x1db6   :  { %2163 = vrot.lane.b32.xlu0 %v2162_v60, %s3940_s9 }
0x1e06   :  { %v2139_v61 = vpop.permute.xlu1 %2138 }
0x1e07   :  { %3150 = vmatmul.msk.bf16.vlgmr.msrb.gmra.mxu2 %vm342_vm9, %v2139_v61 }
0x1e28   :  { %v2164_v52 = vpop.permute.xlu0 %2163 }
0x1e29   :  { %3151 = vmatmul.msk.bf16.vlgmr.msrb.gmra.mxu3 %vm342_vm9, %v2164_v52 }
0x1e8a   :  { %v2152_v22 = vpop.f32.mrf.mxu2 }
0x1e8b   :  { %v2157_v59 = vrot.slane %v2152_v22, 6 }
0x1e8d   :  { %v2159_v21 = vadd.f32 %v2157_v59, %v4593_v57 }
0x1e8f   :  { %3502 = vtanh.f32 %v2159_v21  ;;  %v3152_v13 = vmul.f32 -1.442695, %v2159_v21 }
0x1e92   :  { %v2154_v62 = vpop.f32.mrf.mxu2 }
0x1e95   :  { %v3503_v0 = vpop.eup %3502 }
0x1e96   :  { %2230 = vrot.lane.b32.xlu0 %v3503_v0, %s3953_s5 }
0x1eac   :  { %v2177_v27 = vpop.f32.mrf.mxu3 }
0x1ead   :  { %v2182_v63 = vrot.slane %v2177_v27, 4 }
0x1eaf   :  { %v2184_v36 = vadd.f32 %v2182_v63, %v4463_v16 }
0x1eb1   :  { %3504 = vtanh.f32 %v2184_v36  ;;  %v3153_v8 = vmul.f32 -1.442695, %v2184_v36 }
0x1eb2   :  { %3506 = vpow2.f32 %v3152_v13 }
0x1eb3   :  { %3508 = vpow2.f32 %v3153_v8 }
0x1eb4   :  { %v2179_v35 = vpop.f32.mrf.mxu3 }
0x1eb7   :  { %v3505_v43 = vpop.eup %3504 }
0x1eb8   :  { %2244 = vrot.lane.b32.xlu2 %v3505_v43, %s3953_s5  ;;  %v3507_v50 = vpop.eup %3506 }
0x1eb9   :  { %v2188_v19 = vadd.f32 1.0, %v3507_v50  ;;  %v3509_v2 = vpop.eup %3508 }
0x1eba   :  { %v2207_v6 = vadd.f32 1.0, %v3509_v2 }
0x1ebb   :  { %3510 = vrcp.f32 %v2188_v19  ;;  %v2200_v10 = vand.u32 2147483648, %v2188_v19  ;;  %vm2194_vm5 = vweird.f32 %v2188_v19  ;;  %v2198_v14 = vand.u32 2147483647, %v2188_v19 }
0x1ebc   :  { %3512 = vrcp.f32 %v2207_v6  ;;  %v2219_v37 = vand.u32 2147483648, %v2207_v6  ;;  %vm2213_vm10 = vweird.f32 %v2207_v6  ;;  %v2217_v23 = vand.u32 2147483647, %v2207_v6 }
0x1ebd   :  { %v2201_v25 = vor.u32 1.1754944e-38, %v2200_v10  ;;  %vm2199_vm7 = vcmp.eq.f32.partialorder %v2198_v14, 8.507059e+37 }
0x1ebe   :  { %v2220_v32 = vor.u32 1.1754944e-38, %v2219_v37  ;;  %vm2218_vm12 = vcmp.eq.f32.partialorder %v2217_v23, 8.507059e+37 }
0x1ec1   :  { %v3511_v5 = vpop.eup %3510 }
0x1ec2   :  { %v2190_v28 = vmul.f32 %v3511_v5, %v2188_v19  ;;  %v3513_v30 = vpop.eup %3512  ;;  %vm2195_vm4 = vweird.f32 %v3511_v5 }
0x1ec3   :  { %v2209_v33 = vmul.f32 %v3513_v30, %v2207_v6  ;;  %vm2196_vm6 = vmor %vm2194_vm5, %vm2195_vm4  ;;  %vm2214_vm8 = vweird.f32 %v3513_v30 }
0x1ec4   :  { %v2191_v40 = vsub.f32 1.0, %v2190_v28  ;;  %vm2215_vm11 = vmor %vm2213_vm10, %vm2214_vm8 }
0x1ec5   :  { %v2210_v4 = vsub.f32 1.0, %v2209_v33 }
0x1ec6   :  { %v2192_v47 = vmul.f32 %v3511_v5, %v2191_v40 }
0x1ec7   :  { %v2211_v26 = vmul.f32 %v3513_v30, %v2210_v4 }
0x1ec8   :  { %v2193_v45 = vadd.f32 %v3511_v5, %v2192_v47 }
0x1ec9   :  { %v2212_v11 = vadd.f32 %v3513_v30, %v2211_v26 }
0x1eca   :  { %v2197_v17 = vsel %vm2196_vm6, %v3511_v5, %v2193_v45 }
0x1ecb   :  { %v2202_v29 = vsel %vm2199_vm7, %v2201_v25, %v2197_v17  ;;  %v2216_v1 = vsel %vm2215_vm11, %v3513_v30, %v2212_v11 }
0x1ecc   :  { %v2221_v18 = vsel %vm2218_vm12, %v2220_v32, %v2216_v1  ;;  %v2228_v51 = vmul.f32 %v2226_v39, %v2202_v29 }
0x1ecd   :  { %v2242_v58 = vmul.f32 %v2240_v48, %v2221_v18 }
0x1f08   :  { %v2231_v9 = vpop.permute.xlu0 %2230 }
0x1f09   :  { %v2233_v12 = vmul.f32 %v2231_v9, %v2202_v29 }
0x1f0b   :  { %2235 = vrot.lane.b32.xlu2 %v2233_v12, %s3953_s5 }
0x1f12   :  { %v2245_v15 = vpop.permute.xlu2 %2244 }
0x1f13   :  { %v2247_v49 = vmul.f32 %v2245_v15, %v2221_v18 }
0x1f15   :  { %2249 = vrot.lane.b32.xlu1 %v2247_v49, %s3953_s5 }
0x1f65   :  { %v2236_v53 = vpop.permute.xlu2 %2235 }
0x1f66   :  { %v4630_v7 = vadd.f32 %v2236_v53, %v2228_v51 }
0x1f68   :  { %3514 = vtanh.f32 %v4630_v7 }
0x1f6e   :  { %v3515_v55 = vpop.eup %3514 }
0x1f6f   :  { %2255 = vrot.lane.b32.xlu1 %v3515_v55, %s3953_s5 }
0x1f87   :  { %v2250_v60 = vpop.permute.xlu1 %2249 }
0x1f88   :  { %v4635_v61 = vadd.f32 %v2250_v60, %v2242_v58 }
0x1f8a   :  { %3516 = vtanh.f32 %v4635_v61 }
0x1f90   :  { %v3517_v52 = vpop.eup %3516 }
0x1f91   :  { %2261 = vrot.lane.b32.xlu0 %v3517_v52, %s3953_s5 }
0x1fe1   :  { %v2256_v24 = vpop.permute.xlu1 %2255 }
0x1fe2   :  { %v4639_v22 = vmul.f32 %v2256_v24, %v2202_v29  ;;  %v2356_v24 = vrot.slane %v4630_v7, 6 }
0x1fe4   :  { %v2265_v59 = vpack.c.bf16 %v4639_v22, %v4639_v22 }
0x1fe6   :  { %v2267_v21 = vrot.slane %v2265_v59, 1 }
0x1fe8   :  { %2268 = vrot.lane.b32.xlu0 %v2267_v21, %s3940_s9 }
0x2003   :  { %v2262_v62 = vpop.permute.xlu0 %2261 }
0x2004   :  { %v4644_v41 = vmul.f32 %v2262_v62, %v2221_v18 }
0x2006   :  { %v2290_v0 = vpack.c.bf16 %v4644_v41, %v4644_v41 }
0x2008   :  { %v2292_v27 = vrot.slane %v2290_v0, 2 }
0x200a   :  { %2293 = vrot.lane.b32.xlu2 %v2292_v27, %s3940_s9  ;;  %v2370_v27 = vrot.slane %v4635_v61, 2 }
0x205a   :  { %v2269_v63 = vpop.permute.xlu0 %2268 }
0x205b   :  { %3154 = vmatmul.msk.bf16.vlgmr.msra.gmra.mxu0 %vm342_vm9, %v2269_v63 }
0x2064   :  { %v2294_v36 = vpop.permute.xlu2 %2293 }
0x2065   :  { %3155 = vmatmul.msk.bf16.vlgmr.msra.gmra.mxu1 %vm342_vm9, %v2294_v36 }
0x20d8   :  { %v2282_v35 = vpop.f32.mrf.mxu0 }
0x20d9   :  { %v2287_v43 = vrot.slane %v2282_v35, 4 }
0x20db   :  { %v2289_v13 = vadd.f32 %v2287_v43, %v4593_v57 }
0x20dd   :  { %3518 = vtanh.f32 %v2289_v13  ;;  %v3156_v40 = vmul.f32 -1.442695, %v2289_v13 }
0x20e0   :  { %v2284_v50 = vpop.f32.mrf.mxu0 }
0x20e2   :  { %v2307_v8 = vpop.f32.mrf.mxu1 }
0x20e3   :  { %v3519_v19 = vpop.eup %3518  ;;  %v2312_v2 = vrot.slane %v2307_v8, 6 }
0x20e4   :  { %2360 = vrot.lane.b32.xlu2 %v3519_v19, %s3953_s5 }
0x20e5   :  { %v2314_v5 = vadd.f32 %v2312_v2, %v4463_v16 }
0x20e7   :  { %3520 = vtanh.f32 %v2314_v5  ;;  %v3157_v14 = vmul.f32 -1.442695, %v2314_v5 }
0x20e8   :  { %3522 = vpow2.f32 %v3156_v40  ;;  %v2537_v40 = vld [vmem:[#allocation23] sm:$0x1] }
0x20ea   :  { %v2309_v6 = vpop.f32.mrf.mxu1 }
0x20ed   :  { %v3521_v28 = vpop.eup %3520 }
0x20ee   :  { %2374 = vrot.lane.b32.xlu1 %v3521_v28, %s3953_s5  ;;  %v3523_v30 = vpop.eup %3522 }
0x20ef   :  { %v2318_v47 = vadd.f32 1.0, %v3523_v30  ;;  %v2538_v30 = vadd.f32 1e-05, %v2537_v40 }
0x20f1   :  { %3524 = vrcp.f32 %v2318_v47  ;;  %v2330_v25 = vand.u32 2147483648, %v2318_v47  ;;  %vm2324_vm14 = vweird.f32 %v2318_v47  ;;  %v2328_v26 = vand.u32 2147483647, %v2318_v47 }
0x20f2   :  { %3526 = vpow2.f32 %v3157_v14  ;;  %vm2545_vm5 = vweird.f32 %v2538_v30 }
0x20f3   :  { %v2331_v9 = vor.u32 1.1754944e-38, %v2330_v25  ;;  %vm2329_vm0 = vcmp.eq.f32.partialorder %v2328_v26, 8.507059e+37 }
0x20f7   :  { %v3525_v33 = vpop.eup %3524 }
0x20f8   :  { %v2320_v45 = vmul.f32 %v3525_v33, %v2318_v47  ;;  %vm2325_vm13 = vweird.f32 %v3525_v33  ;;  %v3527_v12 = vpop.eup %3526 }
0x20f9   :  { %vm2326_vm15 = vmor %vm2324_vm14, %vm2325_vm13  ;;  %v2337_v1 = vadd.f32 1.0, %v3527_v12 }
0x20fa   :  { %v2321_v10 = vsub.f32 1.0, %v2320_v45 }
0x20fb   :  { %3528 = vrcp.f32 %v2337_v1  ;;  %v2349_v51 = vand.u32 2147483648, %v2337_v1  ;;  %vm2343_vm2 = vweird.f32 %v2337_v1  ;;  %v2347_v53 = vand.u32 2147483647, %v2337_v1 }
0x20fc   :  { %v2322_v4 = vmul.f32 %v3525_v33, %v2321_v10 }
0x20fd   :  { %v2350_v48 = vor.u32 1.1754944e-38, %v2349_v51  ;;  %vm2348_vm4 = vcmp.eq.f32.partialorder %v2347_v53, 8.507059e+37 }
0x20fe   :  { %v2323_v17 = vadd.f32 %v3525_v33, %v2322_v4 }
0x2100   :  { %v2327_v29 = vsel %vm2326_vm15, %v3525_v33, %v2323_v17 }
0x2101   :  { %v2332_v37 = vsel %vm2329_vm0, %v2331_v9, %v2327_v29  ;;  %v3529_v32 = vpop.eup %3528 }
0x2102   :  { %v2339_v15 = vmul.f32 %v3529_v32, %v2337_v1  ;;  %vm2344_vm1 = vweird.f32 %v3529_v32  ;;  %v2358_v59 = vmul.f32 %v2356_v24, %v2332_v37 }
0x2103   :  { %vm2345_vm3 = vmor %vm2343_vm2, %vm2344_vm1 }
0x2104   :  { %v2340_v18 = vsub.f32 1.0, %v2339_v15 }
0x2106   :  { %v2341_v49 = vmul.f32 %v3529_v32, %v2340_v18  ;;  %v4697_v18 = vld [vmem:[#allocation21 + $0x1] ss:$0 sm:$0xff] }
0x2108   :  { %v2342_v39 = vadd.f32 %v3529_v32, %v2341_v49 }
0x210a   :  { %v2346_v55 = vsel %vm2345_vm3, %v3529_v32, %v2342_v39 }
0x210b   :  { %v2351_v60 = vsel %vm2348_vm4, %v2350_v48, %v2346_v55 }
0x210c   :  { %v2372_v63 = vmul.f32 %v2370_v27, %v2351_v60 }
0x213e   :  { %v2361_v11 = vpop.permute.xlu2 %2360 }
0x213f   :  { %v2363_v23 = vmul.f32 %v2361_v11, %v2332_v37 }
0x2141   :  { %2365 = vrot.lane.b32.xlu1 %v2363_v23, %s3953_s5  ;;  %v4689_v23 = vld [vmem:[#allocation20] ss:$0 sm:$0xff] }
0x2160   :  { %v2375_v58 = vpop.permute.xlu1 %2374 }
0x2161   :  { %v2377_v52 = vmul.f32 %v2375_v58, %v2351_v60 }
0x2163   :  { %2379 = vrot.lane.b32.xlu0 %v2377_v52, %s3953_s5 }
0x21b3   :  { %v2366_v21 = vpop.permute.xlu1 %2365 }
0x21b4   :  { %v4658_v62 = vadd.f32 %v2366_v21, %v2358_v59 }
0x21b6   :  { %3530 = vtanh.f32 %v4658_v62 }
0x21bc   :  { %v3531_v0 = vpop.eup %3530 }
0x21bd   :  { %2385 = vrot.lane.b32.xlu0 %v3531_v0, %s3953_s5 }
0x21d5   :  { %v2380_v36 = vpop.permute.xlu0 %2379 }
0x21d6   :  { %v4663_v35 = vadd.f32 %v2380_v36, %v2372_v63 }
0x21d8   :  { %3532 = vtanh.f32 %v4663_v35 }
0x21d9   :  { %3534 = vrsqrt.f32 %v2538_v30 }
0x21de   :  { %v3533_v43 = vpop.eup %3532 }
0x21df   :  { %2391 = vrot.lane.b32.xlu2 %v3533_v43, %s3953_s5  ;;  %v3535_v47 = vpop.eup %3534 }
0x21e0   :  { %v2540_v33 = vmul.f32 %v3535_v47, %v2538_v30  ;;  %vm2546_vm6 = vweird.f32 %v3535_v47 }
0x21e1   :  { %vm2547_vm7 = vmor %vm2545_vm5, %vm2546_vm6 }
0x21e2   :  { %v2541_v45 = vmul.f32 %v3535_v47, %v2540_v33 }
0x21e4   :  { %v2542_v4 = vmul.f32 0.5, %v2541_v45 }
0x21e6   :  { %v2543_v25 = vsub.f32 1.5, %v2542_v4 }
0x21e8   :  { %v2544_v9 = vmul.f32 %v3535_v47, %v2543_v25 }
0x21ea   :  { %v2548_v12 = vsel %vm2547_vm7, %v3535_v47, %v2544_v9 }
0x21eb   :  { %v4681_v11 = vperm.slane %v2548_v12, 0 }
0x222f   :  { %v2386_v7 = vpop.permute.xlu0 %2385 }
0x2230   :  { %v4667_v13 = vmul.f32 %v2386_v7, %v2332_v37  ;;  %v4685_v37 = vld [vmem:[#allocation18] ss:$0 sm:$0xff]  ;;  %v3288_v7 = vld [vmem:[#allocation21] ss:$0 sm:$0xff] }
0x2232   :  { %v2395_v50 = vpack.c.bf16 %v4667_v13, %v4667_v13 }
0x2234   :  { %v2397_v8 = vrot.slane %v2395_v50, 2 }
0x2236   :  { %2398 = vrot.lane.b32.xlu2 %v2397_v8, %s3940_s9  ;;  %v2765_v8 = vld [vmem:[#allocation23 + $0x1] sm:$0x1] }
0x2239   :  { %v2392_v19 = vpop.permute.xlu2 %2391 }
0x223a   :  { %v4672_v61 = vmul.f32 %v2392_v19, %v2351_v60  ;;  %v2766_v19 = vadd.f32 1e-05, %v2765_v8 }
0x223c   :  { %v2420_v2 = vpack.c.bf16 %v4672_v61, %v4672_v61  ;;  %vm2773_vm1 = vweird.f32 %v2766_v19 }
0x223e   :  { %v2422_v5 = vrot.slane %v2420_v2, 1 }
0x2240   :  { %2423 = vrot.lane.b32.xlu1 %v2422_v5, %s3940_s9 }
0x2290   :  { %v2399_v6 = vpop.permute.xlu2 %2398 }
0x2291   :  { %3158 = vmatmul.msk.bf16.vlgmr.msra.gmra.mxu2 %vm342_vm9, %v2399_v6 }
0x22b2   :  { %v2424_v28 = vpop.permute.xlu1 %2423 }
0x22b3   :  { %3159 = vmatmul.msk.bf16.vlgmr.msra.gmra.mxu3 %vm342_vm9, %v2424_v28 }
0x2314   :  { %v2412_v10 = vpop.f32.mrf.mxu2 }
0x2315   :  { %v2417_v14 = vrot.slane %v2412_v10, 2 }
0x2317   :  { %v2419_v17 = vadd.f32 %v2417_v14, %v4593_v57 }
0x2319   :  { %3536 = vtanh.f32 %v2419_v17  ;;  %v3160_v49 = vmul.f32 -1.442695, %v2419_v17 }
0x231c   :  { %v2414_v26 = vpop.f32.mrf.mxu2 }
0x231f   :  { %v3537_v29 = vpop.eup %3536 }
0x2320   :  { %2487 = vrot.lane.b32.xlu1 %v3537_v29, %s3953_s5 }
0x2328   :  { %2578 = vrot.lane.b32.xlu1 %v4681_v11, %s3953_s5 }
0x2330   :  { %2582 = vrot.lane.b32.xlu1 %v4685_v37, %s3953_s5 }
0x2336   :  { %v2437_v57 = vpop.f32.mrf.mxu3 }
0x2337   :  { %v2441_v1 = vadd.f32 %v2437_v57, %v4463_v16  ;;  %v2524_v57 = vadd.f32 %v4644_v41, %v4547_v38  ;;  %v4731_v38 = vld [vmem:[#allocation20 + $0x1] ss:$0 sm:$0xff] }
0x2338   :  { %2586 = vrot.lane.b32.xlu1 %v4689_v23, %s3953_s5 }
0x2339   :  { %3538 = vtanh.f32 %v2441_v1  ;;  %v3161_v48 = vmul.f32 -1.442695, %v2441_v1 }
0x233a   :  { %3540 = vpow2.f32 %v3160_v49  ;;  %v4724_v49 = vld [vmem:[#allocation18 + $0x1] ss:$0 sm:$0xff] }
0x233e   :  { %v2439_v32 = vpop.f32.mrf.mxu3 }
0x233f   :  { %v3539_v15 = vpop.eup %3538  ;;  %v2659_v32 = vsub.f32 %v2524_v57, %v3288_v7 }
0x2340   :  { %2501 = vrot.lane.b32.xlu0 %v3539_v15, %s3953_s5  ;;  %2565 = vrot.lane.b32.xlu1 %v4689_v23, %s3940_s9  ;;  %v3541_v39 = vpop.eup %3540 }
0x2341   :  { %v2445_v16 = vadd.f32 1.0, %v3541_v39  ;;  %v2661_v15 = vmul.f32 %v2659_v32, %v4681_v11 }
0x2343   :  { %3542 = vrcp.f32 %v2445_v16  ;;  %v2457_v52 = vand.u32 2147483648, %v2445_v16  ;;  %vm2451_vm10 = vweird.f32 %v2445_v16  ;;  %v2455_v24 = vand.u32 2147483647, %v2445_v16 }
0x2344   :  { %3544 = vpow2.f32 %v3161_v48  ;;  %v2663_v39 = vmul.f32 %v4685_v37, %v2661_v15  ;;  %v2497_v48 = vrot.slane %v4663_v35, 2 }
0x2345   :  { %v2458_v0 = vor.u32 1.1754944e-38, %v2457_v52  ;;  %vm2456_vm12 = vcmp.eq.f32.partialorder %v2455_v24, 8.507059e+37 }
0x2346   :  { %v2665_v41 = vadd.f32 %v4689_v23, %v2663_v39 }
0x2348   :  { %2761 = vrot.lane.b32.xlu1 %v4697_v18, %s3940_s9 }
0x2349   :  { %v3543_v51 = vpop.eup %3542 }
0x234a   :  { %v2447_v53 = vmul.f32 %v3543_v51, %v2445_v16  ;;  %vm2452_vm8 = vweird.f32 %v3543_v51  ;;  %v3545_v59 = vpop.eup %3544 }
0x234b   :  { %vm2453_vm11 = vmor %vm2451_vm10, %vm2452_vm8  ;;  %v2464_v27 = vadd.f32 1.0, %v3545_v59 }
0x234c   :  { %v2448_v55 = vsub.f32 1.0, %v2447_v53 }
0x234d   :  { %3546 = vrcp.f32 %v2464_v27  ;;  %v2476_v47 = vand.u32 2147483648, %v2464_v27  ;;  %vm2470_vm14 = vweird.f32 %v2464_v27  ;;  %v2474_v33 = vand.u32 2147483647, %v2464_v27 }
0x234e   :  { %v2449_v58 = vmul.f32 %v3543_v51, %v2448_v55  ;;  %3548 = vrsqrt.f32 %v2766_v19 }
0x234f   :  { %v2477_v14 = vor.u32 1.1754944e-38, %v2476_v47  ;;  %vm2475_vm0 = vcmp.eq.f32.partialorder %v2474_v33, 8.507059e+37 }
0x2350   :  { %v2450_v60 = vadd.f32 %v3543_v51, %v2449_v58 }
0x2352   :  { %v2454_v21 = vsel %vm2453_vm11, %v3543_v51, %v2450_v60  ;;  %v2483_v51 = vrot.slane %v4658_v62, 6 }
0x2353   :  { %v4701_v36 = vsel %vm2456_vm12, %v2458_v0, %v2454_v21  ;;  %v3547_v50 = vpop.eup %3546 }
0x2354   :  { %v2466_v2 = vmul.f32 %v3547_v50, %v2464_v27  ;;  %v3549_v28 = vpop.eup %3548  ;;  %vm2471_vm13 = vweird.f32 %v3547_v50 }
0x2355   :  { %v2768_v30 = vmul.f32 %v3549_v28, %v2766_v19  ;;  %vm2472_vm15 = vmor %vm2470_vm14, %vm2471_vm13  ;;  %vm2774_vm2 = vweird.f32 %v3549_v28 }
0x2356   :  { %v2467_v5 = vsub.f32 1.0, %v2466_v2  ;;  %vm2775_vm3 = vmor %vm2773_vm1, %vm2774_vm2 }
0x2357   :  { %v2769_v10 = vmul.f32 %v3549_v28, %v2768_v30 }
0x2358   :  { %v2468_v6 = vmul.f32 %v3547_v50, %v2467_v5  ;;  %v3253_v5 = vld [vmem:[#allocation24 + $0x28] sm:$0xff] }
0x2359   :  { %v2770_v26 = vmul.f32 0.5, %v2769_v10  ;;  %2696 = vmatpush.bf16.msrb.mxu2 %v3253_v5 }
0x235a   :  { %v2469_v40 = vadd.f32 %v3547_v50, %v2468_v6  ;;  %v2525_v6 = vadd.f32 %v4616_v56, %v4579_v20 }
0x235b   :  { %v2771_v29 = vsub.f32 1.5, %v2770_v26 }
0x235c   :  { %v2473_v45 = vsel %vm2472_vm15, %v3547_v50, %v2469_v40  ;;  %v2528_v50 = vadd.f32 %v4667_v13, %v4520_v44 }
0x235d   :  { %v4709_v4 = vsel %vm2475_vm0, %v2477_v14, %v2473_v45  ;;  %v2772_v9 = vmul.f32 %v3549_v28, %v2771_v29 }
0x235e   :  { %v2499_v58 = vmul.f32 %v2497_v48, %v4709_v4 }
0x235f   :  { %v2776_v12 = vsel %vm2775_vm3, %v3549_v28, %v2772_v9  ;;  %v2889_v28 = vsub.f32 %v2528_v50, %v4697_v18  ;;  %v3261_v50 = vld [vmem:[#allocation24 + $0x68] sm:$0xff] }
0x2360   :  { %v2778_v1 = vperm.slane %v2776_v12, 0 }
0x2362   :  { %v2891_v47 = vmul.f32 %v2889_v28, %v2778_v1 }
0x2392   :  { %v2488_v63 = vpop.permute.xlu1 %2487 }
0x2393   :  { %v2490_v43 = vmul.f32 %v2488_v63, %v4701_v36  ;;  %v2523_v63 = vadd.f32 %v4672_v61, %v4515_v34  ;;  %v3252_v61 = vld [vmem:[#allocation24 + $0x20] sm:$0xff] }
0x2394   :  { %2697 = vmatpush.bf16.msrb.mxu2 %v3252_v61 }
0x2395   :  { %2492 = vrot.lane.b32.xlu0 %v2490_v43, %s3953_s5 }
0x2398   :  { %2926 = vmatpush.bf16.msra.mxu2 %v3261_v50 }
0x239a   :  { %v2579_v0 = vpop.permute.xlu1 %2578 }
0x239d   :  { %2704 = vrot.lane.b32.xlu0 %v3288_v7, %s3954_s7 }
0x23a5   :  { %2533 = vrot.lane.b32.xlu0 %v3288_v7, %s3940_s9 }
0x23ad   :  { %2551 = vrot.lane.b32.xlu0 %v4681_v11, %s3940_s9 }
0x23b2   :  { %v2502_v17 = vpop.permute.xlu0 %2501 }
0x23b3   :  { %v2504_v25 = vmul.f32 %v2502_v17, %v4709_v4  ;;  %v2893_v17 = vmul.f32 %v4724_v49, %v2891_v47 }
0x23b5   :  { %2558 = vrot.lane.b32.xlu0 %v4685_v37, %s3940_s9  ;;  %2506 = vrot.lane.b32.xlu2 %v2504_v25, %s3953_s5  ;;  %v2895_v29 = vadd.f32 %v4731_v38, %v2893_v17  ;;  %v3263_v17 = vld [vmem:[#allocation24 + $0x78] sm:$0xff] }
0x23b7   :  { %v2896_v9 = vpack.c.bf16 %v2895_v29, %v2895_v29 }
0x23b9   :  { %v2902_v57 = vrot.slane %v2896_v9, 2 }
0x23bd   :  { %2934 = vrot.lane.b32.xlu0 %v4697_v18, %s3954_s7  ;;  %2574 = vrot.lane.b32.xlu2 %v3288_v7, %s3953_s5  ;;  %v2583_v7 = vpop.permute.xlu1 %2582 }
0x23c5   :  { %2938 = vrot.lane.b32.xlu0 %v2778_v1, %s3954_s7  ;;  %2708 = vrot.lane.b32.xlu2 %v4681_v11, %s3954_s7  ;;  %v2666_v11 = vpack.c.bf16 %v2665_v41, %v2665_v41  ;;  %v2587_v40 = vpop.permute.xlu1 %2586 }
0x23c7   :  { %v2672_v16 = vrot.slane %v2666_v11, 2  ;;  %v3254_v11 = vld [vmem:[#allocation24 + $0x30] sm:$0xff] }
0x23cd   :  { %2942 = vrot.lane.b32.xlu0 %v4724_v49, %s3954_s7  ;;  %2712 = vrot.lane.b32.xlu2 %v4685_v37, %s3954_s7  ;;  %v2485_v37 = vmul.f32 %v2483_v51, %v4701_v36  ;;  %v2566_v48 = vpop.permute.xlu1 %2565 }
0x23d5   :  { %2946 = vrot.lane.b32.xlu0 %v4731_v38, %s3954_s7  ;;  %2716 = vrot.lane.b32.xlu2 %v4689_v23, %s3954_s7 }
0x23dd   :  { %2673 = vrot.lane.b32.xlu0 %v2672_v16, %s3940_s9  ;;  %2834 = vrot.lane.b32.xlu2 %v4697_v18, %s3953_s5 }
0x2407   :  { %v2493_v53 = vpop.permute.xlu0 %2492 }
0x2408   :  { %v2495_v55 = vadd.f32 %v2493_v53, %v2485_v37 }
0x240a   :  { %3550 = vtanh.f32 %v2495_v55 }
0x240f   :  { %v2507_v60 = vpop.permute.xlu2 %2506  ;;  %v2705_v23 = vpop.permute.xlu0 %2704 }
0x2410   :  { %v3551_v52 = vpop.eup %3550  ;;  %v2509_v24 = vadd.f32 %v2507_v60, %v2499_v58  ;;  %v2707_v34 = vsub.f32 %v2525_v6, %v2705_v23  ;;  %v2527_v60 = vadd.f32 %v4639_v22, %v4552_v31  ;;  %v3260_v22 = vld [vmem:[#allocation24 + $0x60] sm:$0xff] }
0x2411   :  { %2512 = vrot.lane.b32.xlu2 %v3551_v52, %s3953_s5  ;;  %2927 = vmatpush.bf16.msra.mxu2 %v3260_v22 }
0x2412   :  { %3552 = vtanh.f32 %v2509_v24 }
0x2417   :  { %v2575_v59 = vpop.permute.xlu2 %2574  ;;  %v4746_v21 = vpop.permute.xlu0 %2533 }
0x2418   :  { %v3553_v62 = vpop.eup %3552  ;;  %v2577_v43 = vsub.f32 %v2523_v63, %v2575_v59  ;;  %v2762_v59 = vpop.permute.xlu1 %2761  ;;  %v3250_v63 = vld [vmem:[#allocation24 + $0x10] sm:$0xff] }
0x2419   :  { %2518 = vrot.lane.b32.xlu1 %v3553_v62, %s3953_s5  ;;  %2838 = vrot.lane.b32.xlu2 %v2778_v1, %s3953_s5 }
0x241a   :  { %v2581_v8 = vmul.f32 %v2579_v0, %v2577_v43  ;;  %v3251_v0 = vld [vmem:[#allocation24 + $0x18] sm:$0xff] }
0x241b   :  { %2620 = vmatpush.bf16.msrb.mxu0 %v3251_v0 }
0x241c   :  { %v2585_v44 = vmul.f32 %v2583_v7, %v2581_v8 }
0x241e   :  { %v2589_v20 = vadd.f32 %v2587_v40, %v2585_v44 }
0x241f   :  { %v2709_v27 = vpop.permute.xlu2 %2708  ;;  %v4750_v35 = vpop.permute.xlu0 %2551  ;;  %2621 = vmatpush.bf16.msrb.mxu0 %v3250_v63 }
0x2420   :  { %v2711_v13 = vmul.f32 %v2709_v27, %v2707_v34  ;;  %v2590_v14 = vpack.c.bf16 %v2589_v20, %v2589_v20  ;;  %v3257_v20 = vld [vmem:[#allocation24 + $0x48] sm:$0xff] }
0x2421   :  { %2779 = vrot.lane.b32.xlu1 %v2778_v1, %s3940_s9  ;;  %2842 = vrot.lane.b32.xlu2 %v4724_v49, %s3953_s5 }
0x2422   :  { %v2596_v26 = vrot.slane %v2590_v14, 1  ;;  %v3248_v14 = vld [vmem:[#allocation24] sm:$0xff] }
0x2423   :  { %2826 = vmatpush.bf16.msra.mxu0 %v3257_v20 }
0x2427   :  { %v2713_v19 = vpop.permute.xlu2 %2712  ;;  %v4759_v2 = vpop.permute.xlu0 %2558 }
0x2428   :  { %v2715_v30 = vmul.f32 %v2713_v19, %v2711_v13 }
0x2429   :  { %2786 = vrot.lane.b32.xlu1 %v4724_v49, %s3940_s9  ;;  %2846 = vrot.lane.b32.xlu2 %v4731_v38, %s3953_s5  ;;  %v3255_v49 = vld [vmem:[#allocation24 + $0x38] sm:$0xff] }
0x242a   :  { %2750 = vmatpush.bf16.msrb.mxu3 %v3255_v49 }
0x242e   :  { %2751 = vmatpush.bf16.msrb.mxu3 %v3254_v11 }
0x242f   :  { %v2717_v33 = vpop.permute.xlu2 %2716  ;;  %v2935_v45 = vpop.permute.xlu0 %2934 }
0x2430   :  { %v2719_v56 = vadd.f32 %v2717_v33, %v2715_v30 }
0x2431   :  { %2793 = vrot.lane.b32.xlu1 %v4731_v38, %s3940_s9 }
0x2432   :  { %v2720_v10 = vpack.c.bf16 %v2719_v56, %v2719_v56  ;;  %v3249_v56 = vld [vmem:[#allocation24 + $0x8] sm:$0xff]  ;;  %2980 = vmatpush.bf16.msra.mxu3 %v3263_v17 }
0x2433   :  { %2651 = vmatpush.bf16.msrb.mxu1 %v3249_v56 }
0x2434   :  { %v2726_v25 = vrot.slane %v2720_v10, 3  ;;  %v3256_v10 = vld [vmem:[#allocation24 + $0x40] sm:$0xff] }
0x2435   :  { %2827 = vmatpush.bf16.msra.mxu0 %v3256_v10 }
0x2436   :  { %2727 = vrot.lane.b32.xlu2 %v2726_v25, %s3940_s9  ;;  %v3259_v25 = vld [vmem:[#allocation24 + $0x58] sm:$0xff] }
0x2437   :  { %v2939_v18 = vpop.permute.xlu0 %2938  ;;  %v2835_v15 = vpop.permute.xlu2 %2834  ;;  %2652 = vmatpush.bf16.msrb.mxu1 %v3248_v14 }
0x2438   :  { %v2837_v23 = vsub.f32 %v2527_v60, %v2835_v15 }
0x2439   :  { %2597 = vrot.lane.b32.xlu1 %v2596_v26, %s3940_s9  ;;  %v3258_v26 = vld [vmem:[#allocation24 + $0x50] sm:$0xff] }
0x243b   :  { %2880 = vmatpush.bf16.msra.mxu1 %v3259_v25 }
0x243f   :  { %v2943_v12 = vpop.permute.xlu0 %2942  ;;  %2881 = vmatpush.bf16.msra.mxu1 %v3258_v26 }
0x2441   :  { %2903 = vrot.lane.b32.xlu1 %v2902_v57, %s3940_s9 }
0x2447   :  { %v2947_v1 = vpop.permute.xlu0 %2946 }
0x244f   :  { %v2674_v32 = vpop.permute.xlu0 %2673 }
0x2450   :  { %3188 = vmatmul.msk.bf16.vlgmr.msrb.gmra.mxu2 %vm342_vm9, %v2674_v32 }
0x246b   :  { %v2513_v39 = vpop.permute.xlu2 %2512 }
0x246c   :  { %v2515_v41 = vmul.f32 %v2513_v39, %v4701_v36 }
0x246e   :  { %v2529_v38 = vadd.f32 %v2515_v41, %v4486_v3 }
0x2470   :  { %v2937_v16 = vsub.f32 %v2529_v38, %v2935_v45 }
0x2472   :  { %v2941_v51 = vmul.f32 %v2939_v18, %v2937_v16  ;;  %v3262_v18 = vld [vmem:[#allocation24 + $0x70] sm:$0xff] }
0x2473   :  { %v2839_v37 = vpop.permute.xlu2 %2838  ;;  %2981 = vmatpush.bf16.msra.mxu3 %v3262_v18 }
0x2474   :  { %v2945_v53 = vmul.f32 %v2943_v12, %v2941_v51  ;;  %v2841_v52 = vmul.f32 %v2839_v37, %v2837_v23 }
0x2476   :  { %v2949_v55 = vadd.f32 %v2947_v1, %v2945_v53 }
0x2478   :  { %v2950_v44 = vpack.c.bf16 %v2949_v55, %v2949_v55 }
0x247a   :  { %v2956_v40 = vrot.slane %v2950_v44, 3 }
0x247b   :  { %v2843_v58 = vpop.permute.xlu2 %2842 }
0x247c   :  { %v2845_v24 = vmul.f32 %v2843_v58, %v2841_v52 }
0x2483   :  { %v2847_v62 = vpop.permute.xlu2 %2846 }
0x2484   :  { %v2849_v36 = vadd.f32 %v2847_v62, %v2845_v24 }
0x2486   :  { %v2850_v27 = vpack.c.bf16 %v2849_v36, %v2849_v36 }
0x2488   :  { %v2856_v3 = vrot.slane %v2850_v27, 1 }
0x248a   :  { %2857 = vrot.lane.b32.xlu1 %v2856_v3, %s3940_s9 }
0x248b   :  { %v2519_v43 = vpop.permute.xlu1 %2518 }
0x248c   :  { %v2521_v7 = vmul.f32 %v2519_v43, %v4709_v4 }
0x248e   :  { %v2522_v31 = vadd.f32 %v2521_v7, %v4481_v42  ;;  %v2526_v42 = vadd.f32 %v4611_v54, %v4584_v46 }
0x2490   :  { %v2536_v8 = vsub.f32 %v2522_v31, %v4746_v21  ;;  %v2728_v19 = vpop.permute.xlu2 %2727  ;;  %v2764_v13 = vsub.f32 %v2526_v42, %v2762_v59 }
0x2491   :  { %3197 = vmatmul.msk.bf16.vlgmr.msrb.gmra.mxu3 %vm342_vm9, %v2728_v19 }
0x2492   :  { %v2554_v5 = vmul.f32 %v4750_v35, %v2536_v8 }
0x2493   :  { %v2780_v6 = vpop.permute.xlu1 %2779 }
0x2494   :  { %v2561_v34 = vmul.f32 %v4759_v2, %v2554_v5  ;;  %v2782_v21 = vmul.f32 %v2780_v6, %v2764_v13 }
0x2496   :  { %v2568_v61 = vadd.f32 %v2566_v48, %v2561_v34  ;;  %v2988_v48 = vlaneseq }
0x2498   :  { %v2569_v28 = vpack.c.bf16 %v2568_v61, %v2568_v61  ;;  %v2989_v52 = vand.u32 127, %v2988_v48 }
0x249a   :  { %2628 = vrot.lane.b32.xlu0 %v2569_v28, %s3940_s9  ;;  %vm2990_vm4 = vcmp.lt.s32.totalorder %v2989_v52, 10 }
0x249b   :  { %v2787_v4 = vpop.permute.xlu1 %2786 }
0x249c   :  { %v2789_v30 = vmul.f32 %v2787_v4, %v2782_v21 }
0x24a2   :  { %2957 = vrot.lane.b32.xlu0 %v2956_v40, %s3940_s9 }
0x24a3   :  { %v2794_v35 = vpop.permute.xlu1 %2793 }
0x24a4   :  { %v2796_v47 = vadd.f32 %v2794_v35, %v2789_v30 }
0x24a6   :  { %v2797_v33 = vpack.c.bf16 %v2796_v47, %v2796_v47 }
0x24a8   :  { %2803 = vrot.lane.b32.xlu2 %v2797_v33, %s3940_s9  ;;  %s3955_s9 = smov [#allocation26]  }
0x24a9   :  { %s3023_s0 = sshll.u32 %s3955_s9, 4  ;;  %s3024_s0 = int_to_ptr.vmem [resolvable:$true] %s3023_s0 }
0x24ab   :  { %v2598_v2 = vpop.permute.xlu1 %2597 }
0x24ac   :  { %3170 = vmatmul.msk.bf16.vlgmr.msrb.gmra.mxu0 %vm342_vm9, %v2598_v2 }
0x24b3   :  { %v2904_v45 = vpop.permute.xlu1 %2903 }
0x24b4   :  { %3224 = vmatmul.msk.bf16.vlgmr.msra.gmra.mxu2 %vm342_vm9, %v2904_v45 }
0x24d3   :  { %v2699_v46 = vpop.f32.mrf.mxu2 }
0x24db   :  { %v2701_v54 = vpop.f32.mrf.mxu2 }
0x24fc   :  { %v2858_v1 = vpop.permute.xlu1 %2857 }
0x2502   :  { %v2804_v29 = vpop.permute.xlu2 %2803 }
0x2503   :  { %3206 = vmatmul.msk.bf16.vlgmr.msra.gmra.mxu0 %vm342_vm9, %v2804_v29 }
0x250c   :  { %v2629_v9 = vpop.permute.xlu0 %2628 }
0x250d   :  { %3179 = vmatmul.msk.bf16.vlgmr.msrb.gmra.mxu1 %vm342_vm9, %v2629_v9 }
0x2514   :  { %v2753_v12 = vpop.f32.mrf.mxu3  ;;  %v2958_v57 = vpop.permute.xlu0 %2957 }
0x2515   :  { %3233 = vmatmul.msk.bf16.vlgmr.msra.gmra.mxu3 %vm342_vm9, %v2958_v57 }
0x251c   :  { %v2755_v32 = vpop.f32.mrf.mxu3 }
0x251d   :  { %3215 = vmatmul.msk.bf16.vlgmr.msra.gmra.mxu1 %vm342_vm9, %v2858_v1  ;;  %vm2992_vm9 = vcmask 1041408  }
0x2529   :  { %v2623_v15 = vpop.f32.mrf.mxu0 }
0x2531   :  { %v2625_v49 = vpop.f32.mrf.mxu0 }
0x2537   :  { %v2929_v39 = vpop.f32.mrf.mxu2 }
0x253f   :  { %v2931_v41 = vpop.f32.mrf.mxu2 }
0x2580   :  { %v2829_v11 = vpop.f32.mrf.mxu0 }
0x2588   :  { %v2831_v38 = vpop.f32.mrf.mxu0 }
0x258a   :  { %v2654_v16 = vpop.f32.mrf.mxu1 }
0x258b   :  { %v2655_v51 = vadd.f32 %v2654_v16, %v2623_v15 }
0x258d   :  { %v2703_v37 = vadd.f32 %v2699_v46, %v2655_v51 }
0x258f   :  { %v2757_v55 = vadd.f32 %v2753_v12, %v2703_v37 }
0x2591   :  { %v2833_v60 = vadd.f32 %v2829_v11, %v2757_v55 }
0x2592   :  { %v2656_v53 = vpop.f32.mrf.mxu1 }
0x2598   :  { %v2983_v58 = vpop.f32.mrf.mxu3 }
0x259a   :  { %v2883_v23 = vpop.f32.mrf.mxu1 }
0x259b   :  { %v2887_v24 = vadd.f32 %v2883_v23, %v2833_v60 }
0x259d   :  { %v2933_v59 = vadd.f32 %v2929_v39, %v2887_v24 }
0x259f   :  { %v2987_v62 = vadd.f32 %v2983_v58, %v2933_v59 }
0x25a0   :  { %v2985_v36 = vpop.f32.mrf.mxu3 }
0x25a1   :  { %v2991_v0 = vsel %vm2990_vm4, %v2987_v62, -1e+30 }
0x25a2   :  { %v2885_v27 = vpop.f32.mrf.mxu1  ;;  %v2993_v3 = vsel %vm2992_vm9, %v2991_v0, -inf }
0x25a3   :  { %2994 = vmax.xlane.f32.xlu2 %v2993_v3 }
0x2616   :  { %v2995_v63 = vpop.xlane.xlu2 %2994 }
0x2617   :  { %v2996_v43 = vsub.f32 %v2991_v0, %v2995_v63 }
0x2619   :  { %v2997_v7 = vmul.f32 1.442695, %v2996_v43 }
0x261b   :  { %3554 = vpow2.f32 %v2997_v7 }
0x2621   :  { %v3555_v50 = vpop.eup %3554 }
0x2622   :  { %v2999_v31 = vsel %vm2992_vm9, %v3555_v50, 0.0 }
0x2623   :  { %3000 = vadd.xlane.f32.xlu0 %v2999_v31 }
0x2696   :  { %v3001_v22 = vpop.xlane.xlu0 %3000 }
0x2697   :  { %3556 = vrcp.f32 %v3001_v22  ;;  %v3013_v6 = vand.u32 2147483648, %v3001_v22  ;;  %v3011_v61 = vand.u32 2147483647, %v3001_v22  ;;  %vm3007_vm6 = vweird.f32 %v3001_v22 }
0x2699   :  { %v3014_v4 = vor.u32 1.1754944e-38, %v3013_v6  ;;  %vm3012_vm8 = vcmp.eq.f32.partialorder %v3011_v61, 8.507059e+37 }
0x269d   :  { %v3557_v8 = vpop.eup %3556 }
0x269e   :  { %v3003_v19 = vmul.f32 %v3557_v8, %v3001_v22  ;;  %vm3008_vm5 = vweird.f32 %v3557_v8 }
0x269f   :  { %vm3009_vm7 = vmor %vm3007_vm6, %vm3008_vm5 }
0x26a0   :  { %v3004_v5 = vsub.f32 1.0, %v3003_v19 }
0x26a2   :  { %v3005_v34 = vmul.f32 %v3557_v8, %v3004_v5 }
0x26a4   :  { %v3006_v28 = vadd.f32 %v3557_v8, %v3005_v34 }
0x26a6   :  { %v3010_v42 = vsel %vm3009_vm7, %v3557_v8, %v3006_v28 }
0x26a7   :  { %v3015_v44 = vsel %vm3012_vm8, %v3014_v4, %v3010_v42 }
0x26a8   :  { %v3016_v13 = vmul.f32 %v3555_v50, %v3015_v44 }
0x26aa   :  { %3017 = vst [vmem:[#allocation26] sm:$0x3] %v3016_v13 }
0x26ab   :  { %3028 = dma.vmem_to_hbm [thread:$0]  %s3024_s0, 32, %s3026_s20, [#allocation5]  }
0x26ac   :  { %3934 = dma.done.wait [#allocation5], 32  }
0x26ad   :  { %3935 = vsyncadd [#allocation5], 4294967264 }
0x26ae   :  { %3033 = vsyncpa [#allocation4], 1 }
0x26af   :  { %3034 = vsyncpa [#allocation7], 1 }
0x26b0   :  { %3035 = vsyncpa [#allocation10], 1 }
0x26b1   :  { %3036 = vsyncpa [#allocation13], 1 }
0x26b2   :  { %3037 = vsyncpa [#allocation16], 1 }
0x26b3   :  { %3038 = vsyncpa [#allocation19], 1 }
0x26b4   :  { %3039 = vsyncpa [#allocation22], 1 }
0x26b5   :  { %3040 = vsyncpa [#allocation25], 1 }
0x26b6   :  { %3041 = vsyncpa [#allocation5], 1 }

</bundles_post_ra>
